<compile_context>
chip_gen: v7x
topology: tpu7x:2x2x1
jax: 0.10.0
libtpu: 0.0.40
codegen_flags: <defaults>
</compile_context>

<pallas_src>
import functools

import jax
import jax.numpy as jnp
from jax import lax
from jax.experimental import pallas as pl
from jax.experimental.pallas import tpu as pltpu

# ----------------------------- model dims ----------------------------------
DIM_INPUT = 16      # dim state space
DIM_HIDDEN = 32     # LSTM hidden size
DIM_OUTPUT = 4      # dim action space
EPISODE_LEN = 20    # episodic memory length
ACTOR_MID = 128     # hidden width of the actorOutput Sequential
ALPHA = 0.99
BETA = 1.0

LANES = 128
assert 4 * DIM_HIDDEN == 128, "LSTM gate vector assumed to be one 128-lane row"

# ---------------------- packed weight-slab layout ---------------------------
# (name, rows, real_lanes) -- every section is zero-padded to 128 lanes and
# its row offset is aligned to a multiple of 8 sublanes.
_W_SECTIONS = (
    ("w1x", DIM_INPUT, 4 * DIM_HIDDEN),    # actorLSTM W_ih^T
    ("w1h", DIM_HIDDEN, 4 * DIM_HIDDEN),   # actorLSTM W_hh^T
    ("b1", 1, 4 * DIM_HIDDEN),             # actorLSTM b_ih + b_hh
    ("w2x", DIM_HIDDEN, 4 * DIM_HIDDEN),   # position_LSTM W_ih^T
    ("w2h", DIM_HIDDEN, 4 * DIM_HIDDEN),   # position_LSTM W_hh^T
    ("b2", 1, 4 * DIM_HIDDEN),
    ("wo1", DIM_HIDDEN, ACTOR_MID),        # actorOutput[0] W^T
    ("bo1", 1, ACTOR_MID),
    ("wo2", ACTOR_MID, DIM_OUTPUT),        # actorOutput[1] W^T / beta
    ("bo2", 1, DIM_OUTPUT),                # actorOutput[1] b  / beta (pads=-1e30)
    ("wc", DIM_INPUT, 1),                  # critic W^T
    ("bc", 1, 1),
    ("watt", DIM_INPUT, EPISODE_LEN),      # alpha * episodic_Att W^T
    ("batt", 1, EPISODE_LEN),              # alpha * episodic_Att b
)


def _round8(n):
    return ((n + 7) // 8) * 8


_W_OFF = {}
_r = 0
for _name, _rows, _ in _W_SECTIONS:
    _W_OFF[_name] = _r
    _r += _round8(_rows)
W_ROWS = _r                                 # 352 rows x 128 lanes (~176 KiB)
_W_NROWS = {name: rows for name, rows, _ in _W_SECTIONS}

# init slab (32-lane): rows 0..3 = h1,c1,h2,c2 ; rows 8..8+L = episodic memory
INIT_MEM_ROW = 8
INIT_ROWS = _round8(INIT_MEM_ROW + EPISODE_LEN)


# ------------------------------- kernel -------------------------------------
def _a2c_rollout_kernel(xs_ref, init_ref, w_ref, out_ref, memf_ref, *, T, alpha):
    D, H, L, A = DIM_INPUT, DIM_HIDDEN, EPISODE_LEN, DIM_OUTPUT

    def sec(name):
        off = _W_OFF[name]
        return w_ref[off:off + _W_NROWS[name]]

    # weights loaded from the slab once, reused for all T steps
    w1x, w1h, b1 = sec("w1x"), sec("w1h"), sec("b1")
    w2x, w2h, b2 = sec("w2x"), sec("w2h"), sec("b2")
    wo1, bo1 = sec("wo1"), sec("bo1")
    wo2, bo2 = sec("wo2"), sec("bo2")
    wc, bc = sec("wc"), sec("bc")
    watt, batt = sec("watt"), sec("batt")

    pad_rows = jnp.zeros((8 - 3, LANES), jnp.float32)   # hoisted (no per-step broadcast)

    def lstm(inp, h, c, wx, wh, b):
        # PyTorch gate order: i, f, g, o packed along the 128-lane axis
        gates = (jnp.dot(inp, wx, preferred_element_type=jnp.float32)
                 + jnp.dot(h, wh, preferred_element_type=jnp.float32) + b)
        sg = jax.nn.sigmoid(gates)          # one full-vreg EUP pass
        tg = jnp.tanh(gates)                # one full-vreg EUP pass
        i, f, o = sg[:, 0:H], sg[:, H:2 * H], sg[:, 3 * H:4 * H]
        g = tg[:, 2 * H:3 * H]
        c_new = f * c + i * g
        h_new = o * jnp.tanh(c_new)
        return h_new, c_new

    def step(t, carry):
        h1, c1, h2, c2, mem = carry
        x = xs_ref[t]                                               # (1, D)
        new_h, new_c = lstm(x, h1, c1, w1x, w1h, b1)                # actorLSTM
        pos_h, pos_c = lstm(new_h + new_c, h2, c2, w2x, w2h, b2)    # position_LSTM

        # read_episodic_mem (alpha already folded into watt/batt)
        att = jnp.dot(x, watt, preferred_element_type=jnp.float32) + batt  # (1,128)
        em = jnp.dot(att[:, :L], mem, preferred_element_type=jnp.float32)  # (1,H)

        out = em + (1.0 - alpha) * pos_h
        mid = jnp.dot(out, wo1, preferred_element_type=jnp.float32) + bo1
        # beta folded into wo2/bo2; padding lanes carry a -1e30 bias
        logits = jnp.dot(mid, wo2, preferred_element_type=jnp.float32) + bo2

        z = logits - jnp.max(logits, axis=-1, keepdims=True)
        ez = jnp.exp(z)                                   # padding lanes -> exactly 0
        act = ez / jnp.sum(ez, axis=-1, keepdims=True)    # (1,128), lanes >= A are 0

        val = jnp.dot(x, wc, preferred_element_type=jnp.float32) + bc      # lane 0

        states = jnp.concatenate([new_h, new_c, pos_h, pos_c], axis=1)     # (1,128)
        out_ref[t] = jnp.concatenate([act, val, states, pad_rows], axis=0)  # (8,128)

        # update_episodic_mem: append actorLSTM hidden, drop the oldest entry
        mem = jnp.concatenate([mem[1:], new_h], axis=0)
        return new_h, new_c, pos_h, pos_c, mem

    carry0 = (init_ref[0:1], init_ref[1:2], init_ref[2:3], init_ref[3:4],
              init_ref[INIT_MEM_ROW:INIT_MEM_ROW + L])
    carry = lax.fori_loop(0, T, step, carry0, unroll=True)
    memf_ref[...] = carry[4]


# ------------------------------- wrappers ------------------------------------
def _pack_weight_slab(p, alpha, beta):
    assert beta > 0
    entries = {
        "w1x": p["w_ih1"].T,
        "w1h": p["w_hh1"].T,
        "b1": (p["b_ih1"] + p["b_hh1"])[None, :],
        "w2x": p["w_ih2"].T,
        "w2h": p["w_hh2"].T,
        "b2": (p["b_ih2"] + p["b_hh2"])[None, :],
        "wo1": p["w_out1"].T,
        "bo1": p["b_out1"][None, :],
        "wo2": p["w_out2"].T / beta,          # fold softmax temperature
        "bo2": p["b_out2"][None, :] / beta,
        "wc": p["w_critic"].T,
        "bc": p["b_critic"][None, :],
        "watt": alpha * p["w_att"].T,         # fold alpha of alpha*em_out
        "batt": alpha * p["b_att"][None, :],
    }
    slab = jnp.zeros((W_ROWS, LANES), jnp.float32)
    for name, rows, lanes in _W_SECTIONS:
        a = entries[name].astype(jnp.float32)
        assert a.shape == (rows, lanes), (name, a.shape)
        slab = slab.at[_W_OFF[name]:_W_OFF[name] + rows, :lanes].set(a)
    # padded logit lanes act as -inf so the full-row softmax ignores them
    slab = slab.at[_W_OFF["bo2"], DIM_OUTPUT:].set(-1e30)
    return slab


def _pack_init_slab(h1, c1, h2, c2, mem0):
    init = jnp.zeros((INIT_ROWS, DIM_HIDDEN), jnp.float32)
    init = (init.at[0:1].set(h1).at[1:2].set(c1)
                .at[2:3].set(h2).at[3:4].set(c2))
    init = init.at[INIT_MEM_ROW:INIT_MEM_ROW + EPISODE_LEN].set(mem0)
    return init.astype(jnp.float32)


def a2c_lstm_em_rollout(xs, h1, c1, h2, c2, mem0, params, alpha=ALPHA, beta=BETA):
    """Runs T sequential A2C_LSTM_EM.forward steps fused into one pallas_call.

    xs:(T,1,D) states, h1/c1/h2/c2:(1,H), mem0:(L,H) episodic memory (oldest
    first).  Returns per-step (action_dist (T,A), value (T,1), new_h, new_c,
    pos_h, pos_c each (T,H)) and the final episodic memory (L,H).
    """
    T = xs.shape[0]
    wslab = _pack_weight_slab(params, alpha, beta)   # cache across rollouts in real use
    init = _pack_init_slab(h1, c1, h2, c2, mem0)
    xs = xs.reshape(T, 1, DIM_INPUT).astype(jnp.float32)

    vmem = pl.BlockSpec(memory_space=pltpu.MemorySpace.VMEM)
    kernel = functools.partial(_a2c_rollout_kernel, T=T, alpha=alpha)
    out_slab, mem_final = pl.pallas_call(
        kernel,
        out_shape=(jax.ShapeDtypeStruct((T, 8, LANES), jnp.float32),
                   jax.ShapeDtypeStruct((EPISODE_LEN, DIM_HIDDEN), jnp.float32)),
        in_specs=[vmem, vmem, vmem],
        out_specs=(vmem, vmem),
    )(xs, init, wslab)

    H, A = DIM_HIDDEN, DIM_OUTPUT
    act = out_slab[:, 0, :A]
    val = out_slab[:, 1, :1]
    new_h = out_slab[:, 2, 0 * H:1 * H]
    new_c = out_slab[:, 2, 1 * H:2 * H]
    pos_h = out_slab[:, 2, 2 * H:3 * H]
    pos_c = out_slab[:, 2, 3 * H:4 * H]
    return act, val, new_h, new_c, pos_h, pos_c, mem_final


def a2c_lstm_em_forward(x, h1, c1, h2, c2, mem, params, alpha=ALPHA, beta=BETA):
    """Single-step forward matching the PyTorch interface (episodic memory is
    passed/returned explicitly since the kernel is stateless)."""
    return a2c_lstm_em_rollout(x.reshape(1, 1, DIM_INPUT), h1, c1, h2, c2,
                               mem, params, alpha=alpha, beta=beta)


# ----------------------- pure-JAX reference (for checking) ------------------
def _ref_rollout(xs, h1, c1, h2, c2, mem, p, alpha=ALPHA, beta=BETA):
    def lstm(inp, h, c, wih, whh, bih, bhh):
        H = h.shape[-1]
        g = inp @ wih.T + h @ whh.T + bih + bhh
        i = jax.nn.sigmoid(g[:, :H]); f = jax.nn.sigmoid(g[:, H:2 * H])
        gg = jnp.tanh(g[:, 2 * H:3 * H]); o = jax.nn.sigmoid(g[:, 3 * H:])
        c_n = f * c + i * gg
        return o * jnp.tanh(c_n), c_n

    acts, vals, nhs, ncs, phs, pcs = [], [], [], [], [], []
    for t in range(xs.shape[0]):
        x = xs[t]
        nh, nc = lstm(x, h1, c1, p["w_ih1"], p["w_hh1"], p["b_ih1"], p["b_hh1"])
        ph, pc = lstm(nh + nc, h2, c2, p["w_ih2"], p["w_hh2"], p["b_ih2"], p["b_hh2"])
        w = x @ p["w_att"].T + p["b_att"]
        em = w @ mem
        out = alpha * em + (1 - alpha) * ph
        logits = (out @ p["w_out1"].T + p["b_out1"]) @ p["w_out2"].T + p["b_out2"]
        act = jax.nn.softmax(jnp.squeeze(logits / beta))
        val = x @ p["w_critic"].T + p["b_critic"]
        acts.append(act[None, :]); vals.append(val)
        nhs.append(nh); ncs.append(nc); phs.append(ph); pcs.append(pc)
        mem = jnp.concatenate([mem[1:], nh], axis=0)     # update_episodic_mem
        h1, c1, h2, c2 = nh, nc, ph, pc
    stack = lambda lst: jnp.concatenate(lst, axis=0)
    return (stack(acts), stack(vals), stack(nhs), stack(ncs),
            stack(phs), stack(pcs)), mem


if __name__ == "__main__":
    D, H, L, A, M = DIM_INPUT, DIM_HIDDEN, EPISODE_LEN, DIM_OUTPUT, ACTOR_MID
    T = 8
    key = jax.random.PRNGKey(0)
    ks = jax.random.split(key, 16)

    # TODO(synk): torch.nn.init.orthogonal_ not reproduced exactly; scaled normal init.
    params = {
        "w_ih1": jax.random.normal(ks[0], (4 * H, D)) * 0.1,
        "w_hh1": jax.random.normal(ks[1], (4 * H, H)) * 0.1,
        "b_ih1": jnp.zeros((4 * H,)),
        "b_hh1": jnp.zeros((4 * H,)),
        "w_ih2": jax.random.normal(ks[2], (4 * H, H)) * 0.1,
        "w_hh2": jax.random.normal(ks[3], (4 * H, H)) * 0.1,
        "b_ih2": jnp.zeros((4 * H,)),
        "b_hh2": jnp.zeros((4 * H,)),
        "w_att": jax.random.normal(ks[4], (L, D)) * 0.1,
        "b_att": jnp.zeros((L,)),
        "w_out1": jax.random.normal(ks[5], (M, H)) * 0.1,
        "b_out1": jnp.zeros((M,)),
        "w_out2": jax.random.normal(ks[6], (A, M)) * 0.1,
        "b_out2": jnp.zeros((A,)),
        "w_critic": jax.random.normal(ks[7], (1, D)) * 0.1,
        "b_critic": jnp.zeros((1,)),
    }
    params = {k: v.astype(jnp.float32) for k, v in params.items()}

    xs = jax.random.normal(ks[8], (T, 1, D), dtype=jnp.float32)
    h1 = jax.random.normal(ks[9], (1, H), dtype=jnp.float32) * 0.1
    c1 = jax.random.normal(ks[10], (1, H), dtype=jnp.float32) * 0.1
    h2 = jax.random.normal(ks[11], (1, H), dtype=jnp.float32) * 0.1
    c2 = jax.random.normal(ks[12], (1, H), dtype=jnp.float32) * 0.1
    mem0 = jax.random.normal(ks[13], (L, H), dtype=jnp.float32) * 0.01

    outs = a2c_lstm_em_rollout(xs, h1, c1, h2, c2, mem0, params)
    outs = jax.block_until_ready(outs)
    act, val, nh, nc, ph, pc, mem_f = outs

    (r_act, r_val, r_nh, r_nc, r_ph, r_pc), r_mem = _ref_rollout(
        xs, h1, c1, h2, c2, mem0, params)

    for got, ref in ((act, r_act), (val, r_val), (nh, r_nh), (nc, r_nc),
                     (ph, r_ph), (pc, r_pc), (mem_f, r_mem)):
        assert got.shape == ref.shape, (got.shape, ref.shape)
        assert jnp.allclose(got, ref, atol=1e-4, rtol=1e-4), "mismatch vs reference"

    # single-step (T=1) path reproduces the original forward() interface
    s_act, s_val, s_nh, s_nc, s_ph, s_pc, s_mem = jax.block_until_ready(
        a2c_lstm_em_forward(xs[0], h1, c1, h2, c2, mem0, params))
    assert jnp.allclose(s_act, r_act[0:1], atol=1e-4, rtol=1e-4)
    assert jnp.allclose(s_val, r_val[0:1], atol=1e-4, rtol=1e-4)

    print("KERNEL_OK")
</pallas_src>

<mosaic_0001>
module attributes {stable_mosaic.version = 11 : i64} {
  func.func @_a2c_rollout_kernel(%arg0: memref<8x1x16xf32, #tpu.memory_space<vmem>>, %arg1: memref<32x32xf32, #tpu.memory_space<vmem>>, %arg2: memref<352x128xf32, #tpu.memory_space<vmem>>, %arg3: memref<8x8x128xf32, #tpu.memory_space<vmem>>, %arg4: memref<20x32xf32, #tpu.memory_space<vmem>>) attributes {dimension_semantics = [], scalar_prefetch = 0 : i64, scratch_operands = 0 : i64, tpu.core_type = #tpu.core_type<tc>} {
    %c0 = arith.constant 0 : index
    %c0_0 = arith.constant 0 : index
    %0 = vector.load %arg2[%c0, %c0_0] : memref<352x128xf32, #tpu.memory_space<vmem>>, vector<16x128xf32>
    %c16 = arith.constant 16 : index
    %c0_1 = arith.constant 0 : index
    %1 = vector.load %arg2[%c16, %c0_1] : memref<352x128xf32, #tpu.memory_space<vmem>>, vector<32x128xf32>
    %c48 = arith.constant 48 : index
    %c0_2 = arith.constant 0 : index
    %2 = vector.load %arg2[%c48, %c0_2] : memref<352x128xf32, #tpu.memory_space<vmem>>, vector<1x128xf32>
    %c56 = arith.constant 56 : index
    %c0_3 = arith.constant 0 : index
    %3 = vector.load %arg2[%c56, %c0_3] : memref<352x128xf32, #tpu.memory_space<vmem>>, vector<32x128xf32>
    %c88 = arith.constant 88 : index
    %c0_4 = arith.constant 0 : index
    %4 = vector.load %arg2[%c88, %c0_4] : memref<352x128xf32, #tpu.memory_space<vmem>>, vector<32x128xf32>
    %c120 = arith.constant 120 : index
    %c0_5 = arith.constant 0 : index
    %5 = vector.load %arg2[%c120, %c0_5] : memref<352x128xf32, #tpu.memory_space<vmem>>, vector<1x128xf32>
    %c128 = arith.constant 128 : index
    %c0_6 = arith.constant 0 : index
    %6 = vector.load %arg2[%c128, %c0_6] : memref<352x128xf32, #tpu.memory_space<vmem>>, vector<32x128xf32>
    %c160 = arith.constant 160 : index
    %c0_7 = arith.constant 0 : index
    %7 = vector.load %arg2[%c160, %c0_7] : memref<352x128xf32, #tpu.memory_space<vmem>>, vector<1x128xf32>
    %c168 = arith.constant 168 : index
    %c0_8 = arith.constant 0 : index
    %8 = vector.load %arg2[%c168, %c0_8] : memref<352x128xf32, #tpu.memory_space<vmem>>, vector<128x128xf32>
    %c296 = arith.constant 296 : index
    %c0_9 = arith.constant 0 : index
    %9 = vector.load %arg2[%c296, %c0_9] : memref<352x128xf32, #tpu.memory_space<vmem>>, vector<1x128xf32>
    %c304 = arith.constant 304 : index
    %c0_10 = arith.constant 0 : index
    %10 = vector.load %arg2[%c304, %c0_10] : memref<352x128xf32, #tpu.memory_space<vmem>>, vector<16x128xf32>
    %c320 = arith.constant 320 : index
    %c0_11 = arith.constant 0 : index
    %11 = vector.load %arg2[%c320, %c0_11] : memref<352x128xf32, #tpu.memory_space<vmem>>, vector<1x128xf32>
    %c328 = arith.constant 328 : index
    %c0_12 = arith.constant 0 : index
    %12 = vector.load %arg2[%c328, %c0_12] : memref<352x128xf32, #tpu.memory_space<vmem>>, vector<16x128xf32>
    %c344 = arith.constant 344 : index
    %c0_13 = arith.constant 0 : index
    %13 = vector.load %arg2[%c344, %c0_13] : memref<352x128xf32, #tpu.memory_space<vmem>>, vector<1x128xf32>
    %cst = arith.constant 0.000000e+00 : f32
    %14 = vector.broadcast %cst : f32 to vector<5x128xf32>
    %c0_14 = arith.constant 0 : index
    %c0_15 = arith.constant 0 : index
    %15 = vector.load %arg1[%c0_14, %c0_15] : memref<32x32xf32, #tpu.memory_space<vmem>>, vector<1x32xf32>
    %c1 = arith.constant 1 : index
    %c0_16 = arith.constant 0 : index
    %16 = vector.load %arg1[%c1, %c0_16] : memref<32x32xf32, #tpu.memory_space<vmem>>, vector<1x32xf32>
    %c2 = arith.constant 2 : index
    %c0_17 = arith.constant 0 : index
    %17 = vector.load %arg1[%c2, %c0_17] : memref<32x32xf32, #tpu.memory_space<vmem>>, vector<1x32xf32>
    %c3 = arith.constant 3 : index
    %c0_18 = arith.constant 0 : index
    %18 = vector.load %arg1[%c3, %c0_18] : memref<32x32xf32, #tpu.memory_space<vmem>>, vector<1x32xf32>
    %c8 = arith.constant 8 : index
    %c0_19 = arith.constant 0 : index
    %19 = vector.load %arg1[%c8, %c0_19] : memref<32x32xf32, #tpu.memory_space<vmem>>, vector<20x32xf32>
    %c0_i32 = arith.constant 0 : i32
    %20 = arith.index_cast %c0_i32 : i32 to index
    %c0_20 = arith.constant 0 : index
    %c0_21 = arith.constant 0 : index
    %21 = vector.load %arg0[%20, %c0_20, %c0_21] : memref<8x1x16xf32, #tpu.memory_space<vmem>>, vector<1x1x16xf32>
    %22 = vector.shape_cast %21 : vector<1x1x16xf32> to vector<1x16xf32>
    %cst_22 = arith.constant dense<0.000000e+00> : vector<1x128xf32>
    %23 = tpu.matmul %22, %0, %cst_22 {dimension_numbers = #tpu.dot_dimension_numbers<[1], [0], [0], [1], [0, 0, 1, 1], [], []>} : vector<1x16xf32>, vector<16x128xf32>, vector<1x128xf32> -> vector<1x128xf32>
    %cst_23 = arith.constant dense<0.000000e+00> : vector<1x128xf32>
    %24 = tpu.matmul %15, %1, %cst_23 {dimension_numbers = #tpu.dot_dimension_numbers<[1], [0], [0], [1], [0, 0, 1, 1], [], []>} : vector<1x32xf32>, vector<32x128xf32>, vector<1x128xf32> -> vector<1x128xf32>
    %25 = arith.addf %23, %24 : vector<1x128xf32>
    %26 = arith.addf %25, %2 : vector<1x128xf32>
    %27 = arith.negf %26 : vector<1x128xf32>
    %28 = math.exp %27 : vector<1x128xf32>
    %cst_24 = arith.constant 1.000000e+00 : f32
    %29 = vector.broadcast %cst_24 : f32 to vector<1x128xf32>
    %30 = arith.addf %29, %28 : vector<1x128xf32>
    %31 = arith.divf %29, %30 : vector<1x128xf32>
    %32 = math.tanh %26 : vector<1x128xf32>
    %33 = vector.extract_strided_slice %31 {offsets = [0, 0], sizes = [1, 32], strides = [1, 1]} : vector<1x128xf32> to vector<1x32xf32>
    %34 = vector.extract_strided_slice %31 {offsets = [0, 32], sizes = [1, 32], strides = [1, 1]} : vector<1x128xf32> to vector<1x32xf32>
    %35 = vector.extract_strided_slice %31 {offsets = [0, 96], sizes = [1, 32], strides = [1, 1]} : vector<1x128xf32> to vector<1x32xf32>
    %36 = vector.extract_strided_slice %32 {offsets = [0, 64], sizes = [1, 32], strides = [1, 1]} : vector<1x128xf32> to vector<1x32xf32>
    %37 = arith.mulf %34, %16 : vector<1x32xf32>
    %38 = arith.mulf %33, %36 : vector<1x32xf32>
    %39 = arith.addf %37, %38 : vector<1x32xf32>
    %40 = math.tanh %39 : vector<1x32xf32>
    %41 = arith.mulf %35, %40 : vector<1x32xf32>
    %42 = arith.addf %41, %39 : vector<1x32xf32>
    %cst_25 = arith.constant dense<0.000000e+00> : vector<1x128xf32>
    %43 = tpu.matmul %42, %3, %cst_25 {dimension_numbers = #tpu.dot_dimension_numbers<[1], [0], [0], [1], [0, 0, 1, 1], [], []>} : vector<1x32xf32>, vector<32x128xf32>, vector<1x128xf32> -> vector<1x128xf32>
    %cst_26 = arith.constant dense<0.000000e+00> : vector<1x128xf32>
    %44 = tpu.matmul %17, %4, %cst_26 {dimension_numbers = #tpu.dot_dimension_numbers<[1], [0], [0], [1], [0, 0, 1, 1], [], []>} : vector<1x32xf32>, vector<32x128xf32>, vector<1x128xf32> -> vector<1x128xf32>
    %45 = arith.addf %43, %44 : vector<1x128xf32>
    %46 = arith.addf %45, %5 : vector<1x128xf32>
    %47 = arith.negf %46 : vector<1x128xf32>
    %48 = math.exp %47 : vector<1x128xf32>
    %cst_27 = arith.constant 1.000000e+00 : f32
    %49 = vector.broadcast %cst_27 : f32 to vector<1x128xf32>
    %50 = arith.addf %49, %48 : vector<1x128xf32>
    %51 = arith.divf %49, %50 : vector<1x128xf32>
    %52 = math.tanh %46 : vector<1x128xf32>
    %53 = vector.extract_strided_slice %51 {offsets = [0, 0], sizes = [1, 32], strides = [1, 1]} : vector<1x128xf32> to vector<1x32xf32>
    %54 = vector.extract_strided_slice %51 {offsets = [0, 32], sizes = [1, 32], strides = [1, 1]} : vector<1x128xf32> to vector<1x32xf32>
    %55 = vector.extract_strided_slice %51 {offsets = [0, 96], sizes = [1, 32], strides = [1, 1]} : vector<1x128xf32> to vector<1x32xf32>
    %56 = vector.extract_strided_slice %52 {offsets = [0, 64], sizes = [1, 32], strides = [1, 1]} : vector<1x128xf32> to vector<1x32xf32>
    %57 = arith.mulf %54, %18 : vector<1x32xf32>
    %58 = arith.mulf %53, %56 : vector<1x32xf32>
    %59 = arith.addf %57, %58 : vector<1x32xf32>
    %60 = math.tanh %59 : vector<1x32xf32>
    %61 = arith.mulf %55, %60 : vector<1x32xf32>
    %cst_28 = arith.constant dense<0.000000e+00> : vector<1x128xf32>
    %62 = tpu.matmul %22, %12, %cst_28 {dimension_numbers = #tpu.dot_dimension_numbers<[1], [0], [0], [1], [0, 0, 1, 1], [], []>} : vector<1x16xf32>, vector<16x128xf32>, vector<1x128xf32> -> vector<1x128xf32>
    %63 = arith.addf %62, %13 : vector<1x128xf32>
    %64 = vector.extract_strided_slice %63 {offsets = [0, 0], sizes = [1, 20], strides = [1, 1]} : vector<1x128xf32> to vector<1x20xf32>
    %cst_29 = arith.constant dense<0.000000e+00> : vector<1x32xf32>
    %65 = tpu.matmul %64, %19, %cst_29 {dimension_numbers = #tpu.dot_dimension_numbers<[1], [0], [0], [1], [0, 0, 1, 1], [], []>} : vector<1x20xf32>, vector<20x32xf32>, vector<1x32xf32> -> vector<1x32xf32>
    %cst_30 = arith.constant 0.00999999977 : f32
    %66 = vector.broadcast %cst_30 : f32 to vector<1x32xf32>
    %67 = arith.mulf %66, %61 : vector<1x32xf32>
    %68 = arith.addf %65, %67 : vector<1x32xf32>
    %cst_31 = arith.constant dense<0.000000e+00> : vector<1x128xf32>
    %69 = tpu.matmul %68, %6, %cst_31 {dimension_numbers = #tpu.dot_dimension_numbers<[1], [0], [0], [1], [0, 0, 1, 1], [], []>} : vector<1x32xf32>, vector<32x128xf32>, vector<1x128xf32> -> vector<1x128xf32>
    %70 = arith.addf %69, %7 : vector<1x128xf32>
    %cst_32 = arith.constant dense<0.000000e+00> : vector<1x128xf32>
    %71 = tpu.matmul %70, %8, %cst_32 {dimension_numbers = #tpu.dot_dimension_numbers<[1], [0], [0], [1], [0, 0, 1, 1], [], []>} : vector<1x128xf32>, vector<128x128xf32>, vector<1x128xf32> -> vector<1x128xf32>
    %72 = arith.addf %71, %9 : vector<1x128xf32>
    %cst_33 = arith.constant dense<0xFF800000> : vector<1xf32>
    %73 = vector.multi_reduction <maximumf>, %72, %cst_33 [1] : vector<1x128xf32> to vector<1xf32>
    %74 = vector.shape_cast %73 : vector<1xf32> to vector<1x1xf32>
    %75 = vector.broadcast %74 : vector<1x1xf32> to vector<1x128xf32>
    %76 = arith.subf %72, %75 : vector<1x128xf32>
    %77 = math.exp %76 : vector<1x128xf32>
    %cst_34 = arith.constant dense<0.000000e+00> : vector<1xf32>
    %78 = vector.multi_reduction <add>, %77, %cst_34 [1] : vector<1x128xf32> to vector<1xf32>
    %79 = vector.shape_cast %78 : vector<1xf32> to vector<1x1xf32>
    %80 = vector.broadcast %79 : vector<1x1xf32> to vector<1x128xf32>
    %81 = arith.divf %77, %80 : vector<1x128xf32>
    %cst_35 = arith.constant dense<0.000000e+00> : vector<1x128xf32>
    %82 = tpu.matmul %22, %10, %cst_35 {dimension_numbers = #tpu.dot_dimension_numbers<[1], [0], [0], [1], [0, 0, 1, 1], [], []>} : vector<1x16xf32>, vector<16x128xf32>, vector<1x128xf32> -> vector<1x128xf32>
    %83 = arith.addf %82, %11 : vector<1x128xf32>
    %84 = tpu.concatenate %41, %39, %61, %59 in 1 : vector<1x32xf32>, vector<1x32xf32>, vector<1x32xf32>, vector<1x32xf32> -> vector<1x128xf32>
    %85 = tpu.concatenate %81, %83, %84, %14 in 0 : vector<1x128xf32>, vector<1x128xf32>, vector<1x128xf32>, vector<5x128xf32> -> vector<8x128xf32>
    %86 = arith.index_cast %c0_i32 : i32 to index
    %c0_36 = arith.constant 0 : index
    %c0_37 = arith.constant 0 : index
    %87 = vector.load %arg3[%86, %c0_36, %c0_37] : memref<8x8x128xf32, #tpu.memory_space<vmem>>, vector<1x8x128xf32>
    %88 = vector.shape_cast %87 : vector<1x8x128xf32> to vector<8x128xf32>
    %89 = vector.shape_cast %85 : vector<8x128xf32> to vector<1x8x128xf32>
    tpu.vector_store %arg3[%86, %c0_36, %c0_37], %89 {strides = array<i32>} : memref<8x8x128xf32, #tpu.memory_space<vmem>>, vector<1x8x128xf32>,
    %90 = vector.extract_strided_slice %19 {offsets = [1, 0], sizes = [19, 32], strides = [1, 1]} : vector<20x32xf32> to vector<19x32xf32>
    %91 = tpu.concatenate %90, %41 in 0 : vector<19x32xf32>, vector<1x32xf32> -> vector<20x32xf32>
    %c1_i32 = arith.constant 1 : i32
    %92 = arith.index_cast %c1_i32 : i32 to index
    %c0_38 = arith.constant 0 : index
    %c0_39 = arith.constant 0 : index
    %93 = vector.load %arg0[%92, %c0_38, %c0_39] : memref<8x1x16xf32, #tpu.memory_space<vmem>>, vector<1x1x16xf32>
    %94 = vector.shape_cast %93 : vector<1x1x16xf32> to vector<1x16xf32>
    %cst_40 = arith.constant dense<0.000000e+00> : vector<1x128xf32>
    %95 = tpu.matmul %94, %0, %cst_40 {dimension_numbers = #tpu.dot_dimension_numbers<[1], [0], [0], [1], [0, 0, 1, 1], [], []>} : vector<1x16xf32>, vector<16x128xf32>, vector<1x128xf32> -> vector<1x128xf32>
    %cst_41 = arith.constant dense<0.000000e+00> : vector<1x128xf32>
    %96 = tpu.matmul %41, %1, %cst_41 {dimension_numbers = #tpu.dot_dimension_numbers<[1], [0], [0], [1], [0, 0, 1, 1], [], []>} : vector<1x32xf32>, vector<32x128xf32>, vector<1x128xf32> -> vector<1x128xf32>
    %97 = arith.addf %95, %96 : vector<1x128xf32>
    %98 = arith.addf %97, %2 : vector<1x128xf32>
    %99 = arith.negf %98 : vector<1x128xf32>
    %100 = math.exp %99 : vector<1x128xf32>
    %cst_42 = arith.constant 1.000000e+00 : f32
    %101 = vector.broadcast %cst_42 : f32 to vector<1x128xf32>
    %102 = arith.addf %101, %100 : vector<1x128xf32>
    %103 = arith.divf %101, %102 : vector<1x128xf32>
    %104 = math.tanh %98 : vector<1x128xf32>
    %105 = vector.extract_strided_slice %103 {offsets = [0, 0], sizes = [1, 32], strides = [1, 1]} : vector<1x128xf32> to vector<1x32xf32>
    %106 = vector.extract_strided_slice %103 {offsets = [0, 32], sizes = [1, 32], strides = [1, 1]} : vector<1x128xf32> to vector<1x32xf32>
    %107 = vector.extract_strided_slice %103 {offsets = [0, 96], sizes = [1, 32], strides = [1, 1]} : vector<1x128xf32> to vector<1x32xf32>
    %108 = vector.extract_strided_slice %104 {offsets = [0, 64], sizes = [1, 32], strides = [1, 1]} : vector<1x128xf32> to vector<1x32xf32>
    %109 = arith.mulf %106, %39 : vector<1x32xf32>
    %110 = arith.mulf %105, %108 : vector<1x32xf32>
    %111 = arith.addf %109, %110 : vector<1x32xf32>
    %112 = math.tanh %111 : vector<1x32xf32>
    %113 = arith.mulf %107, %112 : vector<1x32xf32>
    %114 = arith.addf %113, %111 : vector<1x32xf32>
    %cst_43 = arith.constant dense<0.000000e+00> : vector<1x128xf32>
    %115 = tpu.matmul %114, %3, %cst_43 {dimension_numbers = #tpu.dot_dimension_numbers<[1], [0], [0], [1], [0, 0, 1, 1], [], []>} : vector<1x32xf32>, vector<32x128xf32>, vector<1x128xf32> -> vector<1x128xf32>
    %cst_44 = arith.constant dense<0.000000e+00> : vector<1x128xf32>
    %116 = tpu.matmul %61, %4, %cst_44 {dimension_numbers = #tpu.dot_dimension_numbers<[1], [0], [0], [1], [0, 0, 1, 1], [], []>} : vector<1x32xf32>, vector<32x128xf32>, vector<1x128xf32> -> vector<1x128xf32>
    %117 = arith.addf %115, %116 : vector<1x128xf32>
    %118 = arith.addf %117, %5 : vector<1x128xf32>
    %119 = arith.negf %118 : vector<1x128xf32>
    %120 = math.exp %119 : vector<1x128xf32>
    %cst_45 = arith.constant 1.000000e+00 : f32
    %121 = vector.broadcast %cst_45 : f32 to vector<1x128xf32>
    %122 = arith.addf %121, %120 : vector<1x128xf32>
    %123 = arith.divf %121, %122 : vector<1x128xf32>
    %124 = math.tanh %118 : vector<1x128xf32>
    %125 = vector.extract_strided_slice %123 {offsets = [0, 0], sizes = [1, 32], strides = [1, 1]} : vector<1x128xf32> to vector<1x32xf32>
    %126 = vector.extract_strided_slice %123 {offsets = [0, 32], sizes = [1, 32], strides = [1, 1]} : vector<1x128xf32> to vector<1x32xf32>
    %127 = vector.extract_strided_slice %123 {offsets = [0, 96], sizes = [1, 32], strides = [1, 1]} : vector<1x128xf32> to vector<1x32xf32>
    %128 = vector.extract_strided_slice %124 {offsets = [0, 64], sizes = [1, 32], strides = [1, 1]} : vector<1x128xf32> to vector<1x32xf32>
    %129 = arith.mulf %126, %59 : vector<1x32xf32>
    %130 = arith.mulf %125, %128 : vector<1x32xf32>
    %131 = arith.addf %129, %130 : vector<1x32xf32>
    %132 = math.tanh %131 : vector<1x32xf32>
    %133 = arith.mulf %127, %132 : vector<1x32xf32>
    %cst_46 = arith.constant dense<0.000000e+00> : vector<1x128xf32>
    %134 = tpu.matmul %94, %12, %cst_46 {dimension_numbers = #tpu.dot_dimension_numbers<[1], [0], [0], [1], [0, 0, 1, 1], [], []>} : vector<1x16xf32>, vector<16x128xf32>, vector<1x128xf32> -> vector<1x128xf32>
    %135 = arith.addf %134, %13 : vector<1x128xf32>
    %136 = vector.extract_strided_slice %135 {offsets = [0, 0], sizes = [1, 20], strides = [1, 1]} : vector<1x128xf32> to vector<1x20xf32>
    %cst_47 = arith.constant dense<0.000000e+00> : vector<1x32xf32>
    %137 = tpu.matmul %136, %91, %cst_47 {dimension_numbers = #tpu.dot_dimension_numbers<[1], [0], [0], [1], [0, 0, 1, 1], [], []>} : vector<1x20xf32>, vector<20x32xf32>, vector<1x32xf32> -> vector<1x32xf32>
    %cst_48 = arith.constant 0.00999999977 : f32
    %138 = vector.broadcast %cst_48 : f32 to vector<1x32xf32>
    %139 = arith.mulf %138, %133 : vector<1x32xf32>
    %140 = arith.addf %137, %139 : vector<1x32xf32>
    %cst_49 = arith.constant dense<0.000000e+00> : vector<1x128xf32>
    %141 = tpu.matmul %140, %6, %cst_49 {dimension_numbers = #tpu.dot_dimension_numbers<[1], [0], [0], [1], [0, 0, 1, 1], [], []>} : vector<1x32xf32>, vector<32x128xf32>, vector<1x128xf32> -> vector<1x128xf32>
    %142 = arith.addf %141, %7 : vector<1x128xf32>
    %cst_50 = arith.constant dense<0.000000e+00> : vector<1x128xf32>
    %143 = tpu.matmul %142, %8, %cst_50 {dimension_numbers = #tpu.dot_dimension_numbers<[1], [0], [0], [1], [0, 0, 1, 1], [], []>} : vector<1x128xf32>, vector<128x128xf32>, vector<1x128xf32> -> vector<1x128xf32>
    %144 = arith.addf %143, %9 : vector<1x128xf32>
    %cst_51 = arith.constant dense<0xFF800000> : vector<1xf32>
    %145 = vector.multi_reduction <maximumf>, %144, %cst_51 [1] : vector<1x128xf32> to vector<1xf32>
    %146 = vector.shape_cast %145 : vector<1xf32> to vector<1x1xf32>
    %147 = vector.broadcast %146 : vector<1x1xf32> to vector<1x128xf32>
    %148 = arith.subf %144, %147 : vector<1x128xf32>
    %149 = math.exp %148 : vector<1x128xf32>
    %cst_52 = arith.constant dense<0.000000e+00> : vector<1xf32>
    %150 = vector.multi_reduction <add>, %149, %cst_52 [1] : vector<1x128xf32> to vector<1xf32>
    %151 = vector.shape_cast %150 : vector<1xf32> to vector<1x1xf32>
    %152 = vector.broadcast %151 : vector<1x1xf32> to vector<1x128xf32>
    %153 = arith.divf %149, %152 : vector<1x128xf32>
    %cst_53 = arith.constant dense<0.000000e+00> : vector<1x128xf32>
    %154 = tpu.matmul %94, %10, %cst_53 {dimension_numbers = #tpu.dot_dimension_numbers<[1], [0], [0], [1], [0, 0, 1, 1], [], []>} : vector<1x16xf32>, vector<16x128xf32>, vector<1x128xf32> -> vector<1x128xf32>
    %155 = arith.addf %154, %11 : vector<1x128xf32>
    %156 = tpu.concatenate %113, %111, %133, %131 in 1 : vector<1x32xf32>, vector<1x32xf32>, vector<1x32xf32>, vector<1x32xf32> -> vector<1x128xf32>
    %157 = tpu.concatenate %153, %155, %156, %14 in 0 : vector<1x128xf32>, vector<1x128xf32>, vector<1x128xf32>, vector<5x128xf32> -> vector<8x128xf32>
    %158 = arith.index_cast %c1_i32 : i32 to index
    %c0_54 = arith.constant 0 : index
    %c0_55 = arith.constant 0 : index
    %159 = vector.load %arg3[%158, %c0_54, %c0_55] : memref<8x8x128xf32, #tpu.memory_space<vmem>>, vector<1x8x128xf32>
    %160 = vector.shape_cast %159 : vector<1x8x128xf32> to vector<8x128xf32>
    %161 = vector.shape_cast %157 : vector<8x128xf32> to vector<1x8x128xf32>
    tpu.vector_store %arg3[%158, %c0_54, %c0_55], %161 {strides = array<i32>} : memref<8x8x128xf32, #tpu.memory_space<vmem>>, vector<1x8x128xf32>,
    %162 = vector.extract_strided_slice %91 {offsets = [1, 0], sizes = [19, 32], strides = [1, 1]} : vector<20x32xf32> to vector<19x32xf32>
    %163 = tpu.concatenate %162, %113 in 0 : vector<19x32xf32>, vector<1x32xf32> -> vector<20x32xf32>
    %c2_i32 = arith.constant 2 : i32
    %164 = arith.index_cast %c2_i32 : i32 to index
    %c0_56 = arith.constant 0 : index
    %c0_57 = arith.constant 0 : index
    %165 = vector.load %arg0[%164, %c0_56, %c0_57] : memref<8x1x16xf32, #tpu.memory_space<vmem>>, vector<1x1x16xf32>
    %166 = vector.shape_cast %165 : vector<1x1x16xf32> to vector<1x16xf32>
    %cst_58 = arith.constant dense<0.000000e+00> : vector<1x128xf32>
    %167 = tpu.matmul %166, %0, %cst_58 {dimension_numbers = #tpu.dot_dimension_numbers<[1], [0], [0], [1], [0, 0, 1, 1], [], []>} : vector<1x16xf32>, vector<16x128xf32>, vector<1x128xf32> -> vector<1x128xf32>
    %cst_59 = arith.constant dense<0.000000e+00> : vector<1x128xf32>
    %168 = tpu.matmul %113, %1, %cst_59 {dimension_numbers = #tpu.dot_dimension_numbers<[1], [0], [0], [1], [0, 0, 1, 1], [], []>} : vector<1x32xf32>, vector<32x128xf32>, vector<1x128xf32> -> vector<1x128xf32>
    %169 = arith.addf %167, %168 : vector<1x128xf32>
    %170 = arith.addf %169, %2 : vector<1x128xf32>
    %171 = arith.negf %170 : vector<1x128xf32>
    %172 = math.exp %171 : vector<1x128xf32>
    %cst_60 = arith.constant 1.000000e+00 : f32
    %173 = vector.broadcast %cst_60 : f32 to vector<1x128xf32>
    %174 = arith.addf %173, %172 : vector<1x128xf32>
    %175 = arith.divf %173, %174 : vector<1x128xf32>
    %176 = math.tanh %170 : vector<1x128xf32>
    %177 = vector.extract_strided_slice %175 {offsets = [0, 0], sizes = [1, 32], strides = [1, 1]} : vector<1x128xf32> to vector<1x32xf32>
    %178 = vector.extract_strided_slice %175 {offsets = [0, 32], sizes = [1, 32], strides = [1, 1]} : vector<1x128xf32> to vector<1x32xf32>
    %179 = vector.extract_strided_slice %175 {offsets = [0, 96], sizes = [1, 32], strides = [1, 1]} : vector<1x128xf32> to vector<1x32xf32>
    %180 = vector.extract_strided_slice %176 {offsets = [0, 64], sizes = [1, 32], strides = [1, 1]} : vector<1x128xf32> to vector<1x32xf32>
    %181 = arith.mulf %178, %111 : vector<1x32xf32>
    %182 = arith.mulf %177, %180 : vector<1x32xf32>
    %183 = arith.addf %181, %182 : vector<1x32xf32>
    %184 = math.tanh %183 : vector<1x32xf32>
    %185 = arith.mulf %179, %184 : vector<1x32xf32>
    %186 = arith.addf %185, %183 : vector<1x32xf32>
    %cst_61 = arith.constant dense<0.000000e+00> : vector<1x128xf32>
    %187 = tpu.matmul %186, %3, %cst_61 {dimension_numbers = #tpu.dot_dimension_numbers<[1], [0], [0], [1], [0, 0, 1, 1], [], []>} : vector<1x32xf32>, vector<32x128xf32>, vector<1x128xf32> -> vector<1x128xf32>
    %cst_62 = arith.constant dense<0.000000e+00> : vector<1x128xf32>
    %188 = tpu.matmul %133, %4, %cst_62 {dimension_numbers = #tpu.dot_dimension_numbers<[1], [0], [0], [1], [0, 0, 1, 1], [], []>} : vector<1x32xf32>, vector<32x128xf32>, vector<1x128xf32> -> vector<1x128xf32>
    %189 = arith.addf %187, %188 : vector<1x128xf32>
    %190 = arith.addf %189, %5 : vector<1x128xf32>
    %191 = arith.negf %190 : vector<1x128xf32>
    %192 = math.exp %191 : vector<1x128xf32>
    %cst_63 = arith.constant 1.000000e+00 : f32
    %193 = vector.broadcast %cst_63 : f32 to vector<1x128xf32>
    %194 = arith.addf %193, %192 : vector<1x128xf32>
    %195 = arith.divf %193, %194 : vector<1x128xf32>
    %196 = math.tanh %190 : vector<1x128xf32>
    %197 = vector.extract_strided_slice %195 {offsets = [0, 0], sizes = [1, 32], strides = [1, 1]} : vector<1x128xf32> to vector<1x32xf32>
    %198 = vector.extract_strided_slice %195 {offsets = [0, 32], sizes = [1, 32], strides = [1, 1]} : vector<1x128xf32> to vector<1x32xf32>
    %199 = vector.extract_strided_slice %195 {offsets = [0, 96], sizes = [1, 32], strides = [1, 1]} : vector<1x128xf32> to vector<1x32xf32>
    %200 = vector.extract_strided_slice %196 {offsets = [0, 64], sizes = [1, 32], strides = [1, 1]} : vector<1x128xf32> to vector<1x32xf32>
    %201 = arith.mulf %198, %131 : vector<1x32xf32>
    %202 = arith.mulf %197, %200 : vector<1x32xf32>
    %203 = arith.addf %201, %202 : vector<1x32xf32>
    %204 = math.tanh %203 : vector<1x32xf32>
    %205 = arith.mulf %199, %204 : vector<1x32xf32>
    %cst_64 = arith.constant dense<0.000000e+00> : vector<1x128xf32>
    %206 = tpu.matmul %166, %12, %cst_64 {dimension_numbers = #tpu.dot_dimension_numbers<[1], [0], [0], [1], [0, 0, 1, 1], [], []>} : vector<1x16xf32>, vector<16x128xf32>, vector<1x128xf32> -> vector<1x128xf32>
    %207 = arith.addf %206, %13 : vector<1x128xf32>
    %208 = vector.extract_strided_slice %207 {offsets = [0, 0], sizes = [1, 20], strides = [1, 1]} : vector<1x128xf32> to vector<1x20xf32>
    %cst_65 = arith.constant dense<0.000000e+00> : vector<1x32xf32>
    %209 = tpu.matmul %208, %163, %cst_65 {dimension_numbers = #tpu.dot_dimension_numbers<[1], [0], [0], [1], [0, 0, 1, 1], [], []>} : vector<1x20xf32>, vector<20x32xf32>, vector<1x32xf32> -> vector<1x32xf32>
    %cst_66 = arith.constant 0.00999999977 : f32
    %210 = vector.broadcast %cst_66 : f32 to vector<1x32xf32>
    %211 = arith.mulf %210, %205 : vector<1x32xf32>
    %212 = arith.addf %209, %211 : vector<1x32xf32>
    %cst_67 = arith.constant dense<0.000000e+00> : vector<1x128xf32>
    %213 = tpu.matmul %212, %6, %cst_67 {dimension_numbers = #tpu.dot_dimension_numbers<[1], [0], [0], [1], [0, 0, 1, 1], [], []>} : vector<1x32xf32>, vector<32x128xf32>, vector<1x128xf32> -> vector<1x128xf32>
    %214 = arith.addf %213, %7 : vector<1x128xf32>
    %cst_68 = arith.constant dense<0.000000e+00> : vector<1x128xf32>
    %215 = tpu.matmul %214, %8, %cst_68 {dimension_numbers = #tpu.dot_dimension_numbers<[1], [0], [0], [1], [0, 0, 1, 1], [], []>} : vector<1x128xf32>, vector<128x128xf32>, vector<1x128xf32> -> vector<1x128xf32>
    %216 = arith.addf %215, %9 : vector<1x128xf32>
    %cst_69 = arith.constant dense<0xFF800000> : vector<1xf32>
    %217 = vector.multi_reduction <maximumf>, %216, %cst_69 [1] : vector<1x128xf32> to vector<1xf32>
    %218 = vector.shape_cast %217 : vector<1xf32> to vector<1x1xf32>
    %219 = vector.broadcast %218 : vector<1x1xf32> to vector<1x128xf32>
    %220 = arith.subf %216, %219 : vector<1x128xf32>
    %221 = math.exp %220 : vector<1x128xf32>
    %cst_70 = arith.constant dense<0.000000e+00> : vector<1xf32>
    %222 = vector.multi_reduction <add>, %221, %cst_70 [1] : vector<1x128xf32> to vector<1xf32>
    %223 = vector.shape_cast %222 : vector<1xf32> to vector<1x1xf32>
    %224 = vector.broadcast %223 : vector<1x1xf32> to vector<1x128xf32>
    %225 = arith.divf %221, %224 : vector<1x128xf32>
    %cst_71 = arith.constant dense<0.000000e+00> : vector<1x128xf32>
    %226 = tpu.matmul %166, %10, %cst_71 {dimension_numbers = #tpu.dot_dimension_numbers<[1], [0], [0], [1], [0, 0, 1, 1], [], []>} : vector<1x16xf32>, vector<16x128xf32>, vector<1x128xf32> -> vector<1x128xf32>
    %227 = arith.addf %226, %11 : vector<1x128xf32>
    %228 = tpu.concatenate %185, %183, %205, %203 in 1 : vector<1x32xf32>, vector<1x32xf32>, vector<1x32xf32>, vector<1x32xf32> -> vector<1x128xf32>
    %229 = tpu.concatenate %225, %227, %228, %14 in 0 : vector<1x128xf32>, vector<1x128xf32>, vector<1x128xf32>, vector<5x128xf32> -> vector<8x128xf32>
    %230 = arith.index_cast %c2_i32 : i32 to index
    %c0_72 = arith.constant 0 : index
    %c0_73 = arith.constant 0 : index
    %231 = vector.load %arg3[%230, %c0_72, %c0_73] : memref<8x8x128xf32, #tpu.memory_space<vmem>>, vector<1x8x128xf32>
    %232 = vector.shape_cast %231 : vector<1x8x128xf32> to vector<8x128xf32>
    %233 = vector.shape_cast %229 : vector<8x128xf32> to vector<1x8x128xf32>
    tpu.vector_store %arg3[%230, %c0_72, %c0_73], %233 {strides = array<i32>} : memref<8x8x128xf32, #tpu.memory_space<vmem>>, vector<1x8x128xf32>,
    %234 = vector.extract_strided_slice %163 {offsets = [1, 0], sizes = [19, 32], strides = [1, 1]} : vector<20x32xf32> to vector<19x32xf32>
    %235 = tpu.concatenate %234, %185 in 0 : vector<19x32xf32>, vector<1x32xf32> -> vector<20x32xf32>
    %c3_i32 = arith.constant 3 : i32
    %236 = arith.index_cast %c3_i32 : i32 to index
    %c0_74 = arith.constant 0 : index
    %c0_75 = arith.constant 0 : index
    %237 = vector.load %arg0[%236, %c0_74, %c0_75] : memref<8x1x16xf32, #tpu.memory_space<vmem>>, vector<1x1x16xf32>
    %238 = vector.shape_cast %237 : vector<1x1x16xf32> to vector<1x16xf32>
    %cst_76 = arith.constant dense<0.000000e+00> : vector<1x128xf32>
    %239 = tpu.matmul %238, %0, %cst_76 {dimension_numbers = #tpu.dot_dimension_numbers<[1], [0], [0], [1], [0, 0, 1, 1], [], []>} : vector<1x16xf32>, vector<16x128xf32>, vector<1x128xf32> -> vector<1x128xf32>
    %cst_77 = arith.constant dense<0.000000e+00> : vector<1x128xf32>
    %240 = tpu.matmul %185, %1, %cst_77 {dimension_numbers = #tpu.dot_dimension_numbers<[1], [0], [0], [1], [0, 0, 1, 1], [], []>} : vector<1x32xf32>, vector<32x128xf32>, vector<1x128xf32> -> vector<1x128xf32>
    %241 = arith.addf %239, %240 : vector<1x128xf32>
    %242 = arith.addf %241, %2 : vector<1x128xf32>
    %243 = arith.negf %242 : vector<1x128xf32>
    %244 = math.exp %243 : vector<1x128xf32>
    %cst_78 = arith.constant 1.000000e+00 : f32
    %245 = vector.broadcast %cst_78 : f32 to vector<1x128xf32>
    %246 = arith.addf %245, %244 : vector<1x128xf32>
    %247 = arith.divf %245, %246 : vector<1x128xf32>
    %248 = math.tanh %242 : vector<1x128xf32>
    %249 = vector.extract_strided_slice %247 {offsets = [0, 0], sizes = [1, 32], strides = [1, 1]} : vector<1x128xf32> to vector<1x32xf32>
    %250 = vector.extract_strided_slice %247 {offsets = [0, 32], sizes = [1, 32], strides = [1, 1]} : vector<1x128xf32> to vector<1x32xf32>
    %251 = vector.extract_strided_slice %247 {offsets = [0, 96], sizes = [1, 32], strides = [1, 1]} : vector<1x128xf32> to vector<1x32xf32>
    %252 = vector.extract_strided_slice %248 {offsets = [0, 64], sizes = [1, 32], strides = [1, 1]} : vector<1x128xf32> to vector<1x32xf32>
    %253 = arith.mulf %250, %183 : vector<1x32xf32>
    %254 = arith.mulf %249, %252 : vector<1x32xf32>
    %255 = arith.addf %253, %254 : vector<1x32xf32>
    %256 = math.tanh %255 : vector<1x32xf32>
    %257 = arith.mulf %251, %256 : vector<1x32xf32>
    %258 = arith.addf %257, %255 : vector<1x32xf32>
    %cst_79 = arith.constant dense<0.000000e+00> : vector<1x128xf32>
    %259 = tpu.matmul %258, %3, %cst_79 {dimension_numbers = #tpu.dot_dimension_numbers<[1], [0], [0], [1], [0, 0, 1, 1], [], []>} : vector<1x32xf32>, vector<32x128xf32>, vector<1x128xf32> -> vector<1x128xf32>
    %cst_80 = arith.constant dense<0.000000e+00> : vector<1x128xf32>
    %260 = tpu.matmul %205, %4, %cst_80 {dimension_numbers = #tpu.dot_dimension_numbers<[1], [0], [0], [1], [0, 0, 1, 1], [], []>} : vector<1x32xf32>, vector<32x128xf32>, vector<1x128xf32> -> vector<1x128xf32>
    %261 = arith.addf %259, %260 : vector<1x128xf32>
    %262 = arith.addf %261, %5 : vector<1x128xf32>
    %263 = arith.negf %262 : vector<1x128xf32>
    %264 = math.exp %263 : vector<1x128xf32>
    %cst_81 = arith.constant 1.000000e+00 : f32
    %265 = vector.broadcast %cst_81 : f32 to vector<1x128xf32>
    %266 = arith.addf %265, %264 : vector<1x128xf32>
    %267 = arith.divf %265, %266 : vector<1x128xf32>
    %268 = math.tanh %262 : vector<1x128xf32>
    %269 = vector.extract_strided_slice %267 {offsets = [0, 0], sizes = [1, 32], strides = [1, 1]} : vector<1x128xf32> to vector<1x32xf32>
    %270 = vector.extract_strided_slice %267 {offsets = [0, 32], sizes = [1, 32], strides = [1, 1]} : vector<1x128xf32> to vector<1x32xf32>
    %271 = vector.extract_strided_slice %267 {offsets = [0, 96], sizes = [1, 32], strides = [1, 1]} : vector<1x128xf32> to vector<1x32xf32>
    %272 = vector.extract_strided_slice %268 {offsets = [0, 64], sizes = [1, 32], strides = [1, 1]} : vector<1x128xf32> to vector<1x32xf32>
    %273 = arith.mulf %270, %203 : vector<1x32xf32>
    %274 = arith.mulf %269, %272 : vector<1x32xf32>
    %275 = arith.addf %273, %274 : vector<1x32xf32>
    %276 = math.tanh %275 : vector<1x32xf32>
    %277 = arith.mulf %271, %276 : vector<1x32xf32>
    %cst_82 = arith.constant dense<0.000000e+00> : vector<1x128xf32>
    %278 = tpu.matmul %238, %12, %cst_82 {dimension_numbers = #tpu.dot_dimension_numbers<[1], [0], [0], [1], [0, 0, 1, 1], [], []>} : vector<1x16xf32>, vector<16x128xf32>, vector<1x128xf32> -> vector<1x128xf32>
    %279 = arith.addf %278, %13 : vector<1x128xf32>
    %280 = vector.extract_strided_slice %279 {offsets = [0, 0], sizes = [1, 20], strides = [1, 1]} : vector<1x128xf32> to vector<1x20xf32>
    %cst_83 = arith.constant dense<0.000000e+00> : vector<1x32xf32>
    %281 = tpu.matmul %280, %235, %cst_83 {dimension_numbers = #tpu.dot_dimension_numbers<[1], [0], [0], [1], [0, 0, 1, 1], [], []>} : vector<1x20xf32>, vector<20x32xf32>, vector<1x32xf32> -> vector<1x32xf32>
    %cst_84 = arith.constant 0.00999999977 : f32
    %282 = vector.broadcast %cst_84 : f32 to vector<1x32xf32>
    %283 = arith.mulf %282, %277 : vector<1x32xf32>
    %284 = arith.addf %281, %283 : vector<1x32xf32>
    %cst_85 = arith.constant dense<0.000000e+00> : vector<1x128xf32>
    %285 = tpu.matmul %284, %6, %cst_85 {dimension_numbers = #tpu.dot_dimension_numbers<[1], [0], [0], [1], [0, 0, 1, 1], [], []>} : vector<1x32xf32>, vector<32x128xf32>, vector<1x128xf32> -> vector<1x128xf32>
    %286 = arith.addf %285, %7 : vector<1x128xf32>
    %cst_86 = arith.constant dense<0.000000e+00> : vector<1x128xf32>
    %287 = tpu.matmul %286, %8, %cst_86 {dimension_numbers = #tpu.dot_dimension_numbers<[1], [0], [0], [1], [0, 0, 1, 1], [], []>} : vector<1x128xf32>, vector<128x128xf32>, vector<1x128xf32> -> vector<1x128xf32>
    %288 = arith.addf %287, %9 : vector<1x128xf32>
    %cst_87 = arith.constant dense<0xFF800000> : vector<1xf32>
    %289 = vector.multi_reduction <maximumf>, %288, %cst_87 [1] : vector<1x128xf32> to vector<1xf32>
    %290 = vector.shape_cast %289 : vector<1xf32> to vector<1x1xf32>
    %291 = vector.broadcast %290 : vector<1x1xf32> to vector<1x128xf32>
    %292 = arith.subf %288, %291 : vector<1x128xf32>
    %293 = math.exp %292 : vector<1x128xf32>
    %cst_88 = arith.constant dense<0.000000e+00> : vector<1xf32>
    %294 = vector.multi_reduction <add>, %293, %cst_88 [1] : vector<1x128xf32> to vector<1xf32>
    %295 = vector.shape_cast %294 : vector<1xf32> to vector<1x1xf32>
    %296 = vector.broadcast %295 : vector<1x1xf32> to vector<1x128xf32>
    %297 = arith.divf %293, %296 : vector<1x128xf32>
    %cst_89 = arith.constant dense<0.000000e+00> : vector<1x128xf32>
    %298 = tpu.matmul %238, %10, %cst_89 {dimension_numbers = #tpu.dot_dimension_numbers<[1], [0], [0], [1], [0, 0, 1, 1], [], []>} : vector<1x16xf32>, vector<16x128xf32>, vector<1x128xf32> -> vector<1x128xf32>
    %299 = arith.addf %298, %11 : vector<1x128xf32>
    %300 = tpu.concatenate %257, %255, %277, %275 in 1 : vector<1x32xf32>, vector<1x32xf32>, vector<1x32xf32>, vector<1x32xf32> -> vector<1x128xf32>
    %301 = tpu.concatenate %297, %299, %300, %14 in 0 : vector<1x128xf32>, vector<1x128xf32>, vector<1x128xf32>, vector<5x128xf32> -> vector<8x128xf32>
    %302 = arith.index_cast %c3_i32 : i32 to index
    %c0_90 = arith.constant 0 : index
    %c0_91 = arith.constant 0 : index
    %303 = vector.load %arg3[%302, %c0_90, %c0_91] : memref<8x8x128xf32, #tpu.memory_space<vmem>>, vector<1x8x128xf32>
    %304 = vector.shape_cast %303 : vector<1x8x128xf32> to vector<8x128xf32>
    %305 = vector.shape_cast %301 : vector<8x128xf32> to vector<1x8x128xf32>
    tpu.vector_store %arg3[%302, %c0_90, %c0_91], %305 {strides = array<i32>} : memref<8x8x128xf32, #tpu.memory_space<vmem>>, vector<1x8x128xf32>,
    %306 = vector.extract_strided_slice %235 {offsets = [1, 0], sizes = [19, 32], strides = [1, 1]} : vector<20x32xf32> to vector<19x32xf32>
    %307 = tpu.concatenate %306, %257 in 0 : vector<19x32xf32>, vector<1x32xf32> -> vector<20x32xf32>
    %c4_i32 = arith.constant 4 : i32
    %308 = arith.index_cast %c4_i32 : i32 to index
    %c0_92 = arith.constant 0 : index
    %c0_93 = arith.constant 0 : index
    %309 = vector.load %arg0[%308, %c0_92, %c0_93] : memref<8x1x16xf32, #tpu.memory_space<vmem>>, vector<1x1x16xf32>
    %310 = vector.shape_cast %309 : vector<1x1x16xf32> to vector<1x16xf32>
    %cst_94 = arith.constant dense<0.000000e+00> : vector<1x128xf32>
    %311 = tpu.matmul %310, %0, %cst_94 {dimension_numbers = #tpu.dot_dimension_numbers<[1], [0], [0], [1], [0, 0, 1, 1], [], []>} : vector<1x16xf32>, vector<16x128xf32>, vector<1x128xf32> -> vector<1x128xf32>
    %cst_95 = arith.constant dense<0.000000e+00> : vector<1x128xf32>
    %312 = tpu.matmul %257, %1, %cst_95 {dimension_numbers = #tpu.dot_dimension_numbers<[1], [0], [0], [1], [0, 0, 1, 1], [], []>} : vector<1x32xf32>, vector<32x128xf32>, vector<1x128xf32> -> vector<1x128xf32>
    %313 = arith.addf %311, %312 : vector<1x128xf32>
    %314 = arith.addf %313, %2 : vector<1x128xf32>
    %315 = arith.negf %314 : vector<1x128xf32>
    %316 = math.exp %315 : vector<1x128xf32>
    %cst_96 = arith.constant 1.000000e+00 : f32
    %317 = vector.broadcast %cst_96 : f32 to vector<1x128xf32>
    %318 = arith.addf %317, %316 : vector<1x128xf32>
    %319 = arith.divf %317, %318 : vector<1x128xf32>
    %320 = math.tanh %314 : vector<1x128xf32>
    %321 = vector.extract_strided_slice %319 {offsets = [0, 0], sizes = [1, 32], strides = [1, 1]} : vector<1x128xf32> to vector<1x32xf32>
    %322 = vector.extract_strided_slice %319 {offsets = [0, 32], sizes = [1, 32], strides = [1, 1]} : vector<1x128xf32> to vector<1x32xf32>
    %323 = vector.extract_strided_slice %319 {offsets = [0, 96], sizes = [1, 32], strides = [1, 1]} : vector<1x128xf32> to vector<1x32xf32>
    %324 = vector.extract_strided_slice %320 {offsets = [0, 64], sizes = [1, 32], strides = [1, 1]} : vector<1x128xf32> to vector<1x32xf32>
    %325 = arith.mulf %322, %255 : vector<1x32xf32>
    %326 = arith.mulf %321, %324 : vector<1x32xf32>
    %327 = arith.addf %325, %326 : vector<1x32xf32>
    %328 = math.tanh %327 : vector<1x32xf32>
    %329 = arith.mulf %323, %328 : vector<1x32xf32>
    %330 = arith.addf %329, %327 : vector<1x32xf32>
    %cst_97 = arith.constant dense<0.000000e+00> : vector<1x128xf32>
    %331 = tpu.matmul %330, %3, %cst_97 {dimension_numbers = #tpu.dot_dimension_numbers<[1], [0], [0], [1], [0, 0, 1, 1], [], []>} : vector<1x32xf32>, vector<32x128xf32>, vector<1x128xf32> -> vector<1x128xf32>
    %cst_98 = arith.constant dense<0.000000e+00> : vector<1x128xf32>
    %332 = tpu.matmul %277, %4, %cst_98 {dimension_numbers = #tpu.dot_dimension_numbers<[1], [0], [0], [1], [0, 0, 1, 1], [], []>} : vector<1x32xf32>, vector<32x128xf32>, vector<1x128xf32> -> vector<1x128xf32>
    %333 = arith.addf %331, %332 : vector<1x128xf32>
    %334 = arith.addf %333, %5 : vector<1x128xf32>
    %335 = arith.negf %334 : vector<1x128xf32>
    %336 = math.exp %335 : vector<1x128xf32>
    %cst_99 = arith.constant 1.000000e+00 : f32
    %337 = vector.broadcast %cst_99 : f32 to vector<1x128xf32>
    %338 = arith.addf %337, %336 : vector<1x128xf32>
    %339 = arith.divf %337, %338 : vector<1x128xf32>
    %340 = math.tanh %334 : vector<1x128xf32>
    %341 = vector.extract_strided_slice %339 {offsets = [0, 0], sizes = [1, 32], strides = [1, 1]} : vector<1x128xf32> to vector<1x32xf32>
    %342 = vector.extract_strided_slice %339 {offsets = [0, 32], sizes = [1, 32], strides = [1, 1]} : vector<1x128xf32> to vector<1x32xf32>
    %343 = vector.extract_strided_slice %339 {offsets = [0, 96], sizes = [1, 32], strides = [1, 1]} : vector<1x128xf32> to vector<1x32xf32>
    %344 = vector.extract_strided_slice %340 {offsets = [0, 64], sizes = [1, 32], strides = [1, 1]} : vector<1x128xf32> to vector<1x32xf32>
    %345 = arith.mulf %342, %275 : vector<1x32xf32>
    %346 = arith.mulf %341, %344 : vector<1x32xf32>
    %347 = arith.addf %345, %346 : vector<1x32xf32>
    %348 = math.tanh %347 : vector<1x32xf32>
    %349 = arith.mulf %343, %348 : vector<1x32xf32>
    %cst_100 = arith.constant dense<0.000000e+00> : vector<1x128xf32>
    %350 = tpu.matmul %310, %12, %cst_100 {dimension_numbers = #tpu.dot_dimension_numbers<[1], [0], [0], [1], [0, 0, 1, 1], [], []>} : vector<1x16xf32>, vector<16x128xf32>, vector<1x128xf32> -> vector<1x128xf32>
    %351 = arith.addf %350, %13 : vector<1x128xf32>
    %352 = vector.extract_strided_slice %351 {offsets = [0, 0], sizes = [1, 20], strides = [1, 1]} : vector<1x128xf32> to vector<1x20xf32>
    %cst_101 = arith.constant dense<0.000000e+00> : vector<1x32xf32>
    %353 = tpu.matmul %352, %307, %cst_101 {dimension_numbers = #tpu.dot_dimension_numbers<[1], [0], [0], [1], [0, 0, 1, 1], [], []>} : vector<1x20xf32>, vector<20x32xf32>, vector<1x32xf32> -> vector<1x32xf32>
    %cst_102 = arith.constant 0.00999999977 : f32
    %354 = vector.broadcast %cst_102 : f32 to vector<1x32xf32>
    %355 = arith.mulf %354, %349 : vector<1x32xf32>
    %356 = arith.addf %353, %355 : vector<1x32xf32>
    %cst_103 = arith.constant dense<0.000000e+00> : vector<1x128xf32>
    %357 = tpu.matmul %356, %6, %cst_103 {dimension_numbers = #tpu.dot_dimension_numbers<[1], [0], [0], [1], [0, 0, 1, 1], [], []>} : vector<1x32xf32>, vector<32x128xf32>, vector<1x128xf32> -> vector<1x128xf32>
    %358 = arith.addf %357, %7 : vector<1x128xf32>
    %cst_104 = arith.constant dense<0.000000e+00> : vector<1x128xf32>
    %359 = tpu.matmul %358, %8, %cst_104 {dimension_numbers = #tpu.dot_dimension_numbers<[1], [0], [0], [1], [0, 0, 1, 1], [], []>} : vector<1x128xf32>, vector<128x128xf32>, vector<1x128xf32> -> vector<1x128xf32>
    %360 = arith.addf %359, %9 : vector<1x128xf32>
    %cst_105 = arith.constant dense<0xFF800000> : vector<1xf32>
    %361 = vector.multi_reduction <maximumf>, %360, %cst_105 [1] : vector<1x128xf32> to vector<1xf32>
    %362 = vector.shape_cast %361 : vector<1xf32> to vector<1x1xf32>
    %363 = vector.broadcast %362 : vector<1x1xf32> to vector<1x128xf32>
    %364 = arith.subf %360, %363 : vector<1x128xf32>
    %365 = math.exp %364 : vector<1x128xf32>
    %cst_106 = arith.constant dense<0.000000e+00> : vector<1xf32>
    %366 = vector.multi_reduction <add>, %365, %cst_106 [1] : vector<1x128xf32> to vector<1xf32>
    %367 = vector.shape_cast %366 : vector<1xf32> to vector<1x1xf32>
    %368 = vector.broadcast %367 : vector<1x1xf32> to vector<1x128xf32>
    %369 = arith.divf %365, %368 : vector<1x128xf32>
    %cst_107 = arith.constant dense<0.000000e+00> : vector<1x128xf32>
    %370 = tpu.matmul %310, %10, %cst_107 {dimension_numbers = #tpu.dot_dimension_numbers<[1], [0], [0], [1], [0, 0, 1, 1], [], []>} : vector<1x16xf32>, vector<16x128xf32>, vector<1x128xf32> -> vector<1x128xf32>
    %371 = arith.addf %370, %11 : vector<1x128xf32>
    %372 = tpu.concatenate %329, %327, %349, %347 in 1 : vector<1x32xf32>, vector<1x32xf32>, vector<1x32xf32>, vector<1x32xf32> -> vector<1x128xf32>
    %373 = tpu.concatenate %369, %371, %372, %14 in 0 : vector<1x128xf32>, vector<1x128xf32>, vector<1x128xf32>, vector<5x128xf32> -> vector<8x128xf32>
    %374 = arith.index_cast %c4_i32 : i32 to index
    %c0_108 = arith.constant 0 : index
    %c0_109 = arith.constant 0 : index
    %375 = vector.load %arg3[%374, %c0_108, %c0_109] : memref<8x8x128xf32, #tpu.memory_space<vmem>>, vector<1x8x128xf32>
    %376 = vector.shape_cast %375 : vector<1x8x128xf32> to vector<8x128xf32>
    %377 = vector.shape_cast %373 : vector<8x128xf32> to vector<1x8x128xf32>
    tpu.vector_store %arg3[%374, %c0_108, %c0_109], %377 {strides = array<i32>} : memref<8x8x128xf32, #tpu.memory_space<vmem>>, vector<1x8x128xf32>,
    %378 = vector.extract_strided_slice %307 {offsets = [1, 0], sizes = [19, 32], strides = [1, 1]} : vector<20x32xf32> to vector<19x32xf32>
    %379 = tpu.concatenate %378, %329 in 0 : vector<19x32xf32>, vector<1x32xf32> -> vector<20x32xf32>
    %c5_i32 = arith.constant 5 : i32
    %380 = arith.index_cast %c5_i32 : i32 to index
    %c0_110 = arith.constant 0 : index
    %c0_111 = arith.constant 0 : index
    %381 = vector.load %arg0[%380, %c0_110, %c0_111] : memref<8x1x16xf32, #tpu.memory_space<vmem>>, vector<1x1x16xf32>
    %382 = vector.shape_cast %381 : vector<1x1x16xf32> to vector<1x16xf32>
    %cst_112 = arith.constant dense<0.000000e+00> : vector<1x128xf32>
    %383 = tpu.matmul %382, %0, %cst_112 {dimension_numbers = #tpu.dot_dimension_numbers<[1], [0], [0], [1], [0, 0, 1, 1], [], []>} : vector<1x16xf32>, vector<16x128xf32>, vector<1x128xf32> -> vector<1x128xf32>
    %cst_113 = arith.constant dense<0.000000e+00> : vector<1x128xf32>
    %384 = tpu.matmul %329, %1, %cst_113 {dimension_numbers = #tpu.dot_dimension_numbers<[1], [0], [0], [1], [0, 0, 1, 1], [], []>} : vector<1x32xf32>, vector<32x128xf32>, vector<1x128xf32> -> vector<1x128xf32>
    %385 = arith.addf %383, %384 : vector<1x128xf32>
    %386 = arith.addf %385, %2 : vector<1x128xf32>
    %387 = arith.negf %386 : vector<1x128xf32>
    %388 = math.exp %387 : vector<1x128xf32>
    %cst_114 = arith.constant 1.000000e+00 : f32
    %389 = vector.broadcast %cst_114 : f32 to vector<1x128xf32>
    %390 = arith.addf %389, %388 : vector<1x128xf32>
    %391 = arith.divf %389, %390 : vector<1x128xf32>
    %392 = math.tanh %386 : vector<1x128xf32>
    %393 = vector.extract_strided_slice %391 {offsets = [0, 0], sizes = [1, 32], strides = [1, 1]} : vector<1x128xf32> to vector<1x32xf32>
    %394 = vector.extract_strided_slice %391 {offsets = [0, 32], sizes = [1, 32], strides = [1, 1]} : vector<1x128xf32> to vector<1x32xf32>
    %395 = vector.extract_strided_slice %391 {offsets = [0, 96], sizes = [1, 32], strides = [1, 1]} : vector<1x128xf32> to vector<1x32xf32>
    %396 = vector.extract_strided_slice %392 {offsets = [0, 64], sizes = [1, 32], strides = [1, 1]} : vector<1x128xf32> to vector<1x32xf32>
    %397 = arith.mulf %394, %327 : vector<1x32xf32>
    %398 = arith.mulf %393, %396 : vector<1x32xf32>
    %399 = arith.addf %397, %398 : vector<1x32xf32>
    %400 = math.tanh %399 : vector<1x32xf32>
    %401 = arith.mulf %395, %400 : vector<1x32xf32>
    %402 = arith.addf %401, %399 : vector<1x32xf32>
    %cst_115 = arith.constant dense<0.000000e+00> : vector<1x128xf32>
    %403 = tpu.matmul %402, %3, %cst_115 {dimension_numbers = #tpu.dot_dimension_numbers<[1], [0], [0], [1], [0, 0, 1, 1], [], []>} : vector<1x32xf32>, vector<32x128xf32>, vector<1x128xf32> -> vector<1x128xf32>
    %cst_116 = arith.constant dense<0.000000e+00> : vector<1x128xf32>
    %404 = tpu.matmul %349, %4, %cst_116 {dimension_numbers = #tpu.dot_dimension_numbers<[1], [0], [0], [1], [0, 0, 1, 1], [], []>} : vector<1x32xf32>, vector<32x128xf32>, vector<1x128xf32> -> vector<1x128xf32>
    %405 = arith.addf %403, %404 : vector<1x128xf32>
    %406 = arith.addf %405, %5 : vector<1x128xf32>
    %407 = arith.negf %406 : vector<1x128xf32>
    %408 = math.exp %407 : vector<1x128xf32>
    %cst_117 = arith.constant 1.000000e+00 : f32
    %409 = vector.broadcast %cst_117 : f32 to vector<1x128xf32>
    %410 = arith.addf %409, %408 : vector<1x128xf32>
    %411 = arith.divf %409, %410 : vector<1x128xf32>
    %412 = math.tanh %406 : vector<1x128xf32>
    %413 = vector.extract_strided_slice %411 {offsets = [0, 0], sizes = [1, 32], strides = [1, 1]} : vector<1x128xf32> to vector<1x32xf32>
    %414 = vector.extract_strided_slice %411 {offsets = [0, 32], sizes = [1, 32], strides = [1, 1]} : vector<1x128xf32> to vector<1x32xf32>
    %415 = vector.extract_strided_slice %411 {offsets = [0, 96], sizes = [1, 32], strides = [1, 1]} : vector<1x128xf32> to vector<1x32xf32>
    %416 = vector.extract_strided_slice %412 {offsets = [0, 64], sizes = [1, 32], strides = [1, 1]} : vector<1x128xf32> to vector<1x32xf32>
    %417 = arith.mulf %414, %347 : vector<1x32xf32>
    %418 = arith.mulf %413, %416 : vector<1x32xf32>
    %419 = arith.addf %417, %418 : vector<1x32xf32>
    %420 = math.tanh %419 : vector<1x32xf32>
    %421 = arith.mulf %415, %420 : vector<1x32xf32>
    %cst_118 = arith.constant dense<0.000000e+00> : vector<1x128xf32>
    %422 = tpu.matmul %382, %12, %cst_118 {dimension_numbers = #tpu.dot_dimension_numbers<[1], [0], [0], [1], [0, 0, 1, 1], [], []>} : vector<1x16xf32>, vector<16x128xf32>, vector<1x128xf32> -> vector<1x128xf32>
    %423 = arith.addf %422, %13 : vector<1x128xf32>
    %424 = vector.extract_strided_slice %423 {offsets = [0, 0], sizes = [1, 20], strides = [1, 1]} : vector<1x128xf32> to vector<1x20xf32>
    %cst_119 = arith.constant dense<0.000000e+00> : vector<1x32xf32>
    %425 = tpu.matmul %424, %379, %cst_119 {dimension_numbers = #tpu.dot_dimension_numbers<[1], [0], [0], [1], [0, 0, 1, 1], [], []>} : vector<1x20xf32>, vector<20x32xf32>, vector<1x32xf32> -> vector<1x32xf32>
    %cst_120 = arith.constant 0.00999999977 : f32
    %426 = vector.broadcast %cst_120 : f32 to vector<1x32xf32>
    %427 = arith.mulf %426, %421 : vector<1x32xf32>
    %428 = arith.addf %425, %427 : vector<1x32xf32>
    %cst_121 = arith.constant dense<0.000000e+00> : vector<1x128xf32>
    %429 = tpu.matmul %428, %6, %cst_121 {dimension_numbers = #tpu.dot_dimension_numbers<[1], [0], [0], [1], [0, 0, 1, 1], [], []>} : vector<1x32xf32>, vector<32x128xf32>, vector<1x128xf32> -> vector<1x128xf32>
    %430 = arith.addf %429, %7 : vector<1x128xf32>
    %cst_122 = arith.constant dense<0.000000e+00> : vector<1x128xf32>
    %431 = tpu.matmul %430, %8, %cst_122 {dimension_numbers = #tpu.dot_dimension_numbers<[1], [0], [0], [1], [0, 0, 1, 1], [], []>} : vector<1x128xf32>, vector<128x128xf32>, vector<1x128xf32> -> vector<1x128xf32>
    %432 = arith.addf %431, %9 : vector<1x128xf32>
    %cst_123 = arith.constant dense<0xFF800000> : vector<1xf32>
    %433 = vector.multi_reduction <maximumf>, %432, %cst_123 [1] : vector<1x128xf32> to vector<1xf32>
    %434 = vector.shape_cast %433 : vector<1xf32> to vector<1x1xf32>
    %435 = vector.broadcast %434 : vector<1x1xf32> to vector<1x128xf32>
    %436 = arith.subf %432, %435 : vector<1x128xf32>
    %437 = math.exp %436 : vector<1x128xf32>
    %cst_124 = arith.constant dense<0.000000e+00> : vector<1xf32>
    %438 = vector.multi_reduction <add>, %437, %cst_124 [1] : vector<1x128xf32> to vector<1xf32>
    %439 = vector.shape_cast %438 : vector<1xf32> to vector<1x1xf32>
    %440 = vector.broadcast %439 : vector<1x1xf32> to vector<1x128xf32>
    %441 = arith.divf %437, %440 : vector<1x128xf32>
    %cst_125 = arith.constant dense<0.000000e+00> : vector<1x128xf32>
    %442 = tpu.matmul %382, %10, %cst_125 {dimension_numbers = #tpu.dot_dimension_numbers<[1], [0], [0], [1], [0, 0, 1, 1], [], []>} : vector<1x16xf32>, vector<16x128xf32>, vector<1x128xf32> -> vector<1x128xf32>
    %443 = arith.addf %442, %11 : vector<1x128xf32>
    %444 = tpu.concatenate %401, %399, %421, %419 in 1 : vector<1x32xf32>, vector<1x32xf32>, vector<1x32xf32>, vector<1x32xf32> -> vector<1x128xf32>
    %445 = tpu.concatenate %441, %443, %444, %14 in 0 : vector<1x128xf32>, vector<1x128xf32>, vector<1x128xf32>, vector<5x128xf32> -> vector<8x128xf32>
    %446 = arith.index_cast %c5_i32 : i32 to index
    %c0_126 = arith.constant 0 : index
    %c0_127 = arith.constant 0 : index
    %447 = vector.load %arg3[%446, %c0_126, %c0_127] : memref<8x8x128xf32, #tpu.memory_space<vmem>>, vector<1x8x128xf32>
    %448 = vector.shape_cast %447 : vector<1x8x128xf32> to vector<8x128xf32>
    %449 = vector.shape_cast %445 : vector<8x128xf32> to vector<1x8x128xf32>
    tpu.vector_store %arg3[%446, %c0_126, %c0_127], %449 {strides = array<i32>} : memref<8x8x128xf32, #tpu.memory_space<vmem>>, vector<1x8x128xf32>,
    %450 = vector.extract_strided_slice %379 {offsets = [1, 0], sizes = [19, 32], strides = [1, 1]} : vector<20x32xf32> to vector<19x32xf32>
    %451 = tpu.concatenate %450, %401 in 0 : vector<19x32xf32>, vector<1x32xf32> -> vector<20x32xf32>
    %c6_i32 = arith.constant 6 : i32
    %452 = arith.index_cast %c6_i32 : i32 to index
    %c0_128 = arith.constant 0 : index
    %c0_129 = arith.constant 0 : index
    %453 = vector.load %arg0[%452, %c0_128, %c0_129] : memref<8x1x16xf32, #tpu.memory_space<vmem>>, vector<1x1x16xf32>
    %454 = vector.shape_cast %453 : vector<1x1x16xf32> to vector<1x16xf32>
    %cst_130 = arith.constant dense<0.000000e+00> : vector<1x128xf32>
    %455 = tpu.matmul %454, %0, %cst_130 {dimension_numbers = #tpu.dot_dimension_numbers<[1], [0], [0], [1], [0, 0, 1, 1], [], []>} : vector<1x16xf32>, vector<16x128xf32>, vector<1x128xf32> -> vector<1x128xf32>
    %cst_131 = arith.constant dense<0.000000e+00> : vector<1x128xf32>
    %456 = tpu.matmul %401, %1, %cst_131 {dimension_numbers = #tpu.dot_dimension_numbers<[1], [0], [0], [1], [0, 0, 1, 1], [], []>} : vector<1x32xf32>, vector<32x128xf32>, vector<1x128xf32> -> vector<1x128xf32>
    %457 = arith.addf %455, %456 : vector<1x128xf32>
    %458 = arith.addf %457, %2 : vector<1x128xf32>
    %459 = arith.negf %458 : vector<1x128xf32>
    %460 = math.exp %459 : vector<1x128xf32>
    %cst_132 = arith.constant 1.000000e+00 : f32
    %461 = vector.broadcast %cst_132 : f32 to vector<1x128xf32>
    %462 = arith.addf %461, %460 : vector<1x128xf32>
    %463 = arith.divf %461, %462 : vector<1x128xf32>
    %464 = math.tanh %458 : vector<1x128xf32>
    %465 = vector.extract_strided_slice %463 {offsets = [0, 0], sizes = [1, 32], strides = [1, 1]} : vector<1x128xf32> to vector<1x32xf32>
    %466 = vector.extract_strided_slice %463 {offsets = [0, 32], sizes = [1, 32], strides = [1, 1]} : vector<1x128xf32> to vector<1x32xf32>
    %467 = vector.extract_strided_slice %463 {offsets = [0, 96], sizes = [1, 32], strides = [1, 1]} : vector<1x128xf32> to vector<1x32xf32>
    %468 = vector.extract_strided_slice %464 {offsets = [0, 64], sizes = [1, 32], strides = [1, 1]} : vector<1x128xf32> to vector<1x32xf32>
    %469 = arith.mulf %466, %399 : vector<1x32xf32>
    %470 = arith.mulf %465, %468 : vector<1x32xf32>
    %471 = arith.addf %469, %470 : vector<1x32xf32>
    %472 = math.tanh %471 : vector<1x32xf32>
    %473 = arith.mulf %467, %472 : vector<1x32xf32>
    %474 = arith.addf %473, %471 : vector<1x32xf32>
    %cst_133 = arith.constant dense<0.000000e+00> : vector<1x128xf32>
    %475 = tpu.matmul %474, %3, %cst_133 {dimension_numbers = #tpu.dot_dimension_numbers<[1], [0], [0], [1], [0, 0, 1, 1], [], []>} : vector<1x32xf32>, vector<32x128xf32>, vector<1x128xf32> -> vector<1x128xf32>
    %cst_134 = arith.constant dense<0.000000e+00> : vector<1x128xf32>
    %476 = tpu.matmul %421, %4, %cst_134 {dimension_numbers = #tpu.dot_dimension_numbers<[1], [0], [0], [1], [0, 0, 1, 1], [], []>} : vector<1x32xf32>, vector<32x128xf32>, vector<1x128xf32> -> vector<1x128xf32>
    %477 = arith.addf %475, %476 : vector<1x128xf32>
    %478 = arith.addf %477, %5 : vector<1x128xf32>
    %479 = arith.negf %478 : vector<1x128xf32>
    %480 = math.exp %479 : vector<1x128xf32>
    %cst_135 = arith.constant 1.000000e+00 : f32
    %481 = vector.broadcast %cst_135 : f32 to vector<1x128xf32>
    %482 = arith.addf %481, %480 : vector<1x128xf32>
    %483 = arith.divf %481, %482 : vector<1x128xf32>
    %484 = math.tanh %478 : vector<1x128xf32>
    %485 = vector.extract_strided_slice %483 {offsets = [0, 0], sizes = [1, 32], strides = [1, 1]} : vector<1x128xf32> to vector<1x32xf32>
    %486 = vector.extract_strided_slice %483 {offsets = [0, 32], sizes = [1, 32], strides = [1, 1]} : vector<1x128xf32> to vector<1x32xf32>
    %487 = vector.extract_strided_slice %483 {offsets = [0, 96], sizes = [1, 32], strides = [1, 1]} : vector<1x128xf32> to vector<1x32xf32>
    %488 = vector.extract_strided_slice %484 {offsets = [0, 64], sizes = [1, 32], strides = [1, 1]} : vector<1x128xf32> to vector<1x32xf32>
    %489 = arith.mulf %486, %419 : vector<1x32xf32>
    %490 = arith.mulf %485, %488 : vector<1x32xf32>
    %491 = arith.addf %489, %490 : vector<1x32xf32>
    %492 = math.tanh %491 : vector<1x32xf32>
    %493 = arith.mulf %487, %492 : vector<1x32xf32>
    %cst_136 = arith.constant dense<0.000000e+00> : vector<1x128xf32>
    %494 = tpu.matmul %454, %12, %cst_136 {dimension_numbers = #tpu.dot_dimension_numbers<[1], [0], [0], [1], [0, 0, 1, 1], [], []>} : vector<1x16xf32>, vector<16x128xf32>, vector<1x128xf32> -> vector<1x128xf32>
    %495 = arith.addf %494, %13 : vector<1x128xf32>
    %496 = vector.extract_strided_slice %495 {offsets = [0, 0], sizes = [1, 20], strides = [1, 1]} : vector<1x128xf32> to vector<1x20xf32>
    %cst_137 = arith.constant dense<0.000000e+00> : vector<1x32xf32>
    %497 = tpu.matmul %496, %451, %cst_137 {dimension_numbers = #tpu.dot_dimension_numbers<[1], [0], [0], [1], [0, 0, 1, 1], [], []>} : vector<1x20xf32>, vector<20x32xf32>, vector<1x32xf32> -> vector<1x32xf32>
    %cst_138 = arith.constant 0.00999999977 : f32
    %498 = vector.broadcast %cst_138 : f32 to vector<1x32xf32>
    %499 = arith.mulf %498, %493 : vector<1x32xf32>
    %500 = arith.addf %497, %499 : vector<1x32xf32>
    %cst_139 = arith.constant dense<0.000000e+00> : vector<1x128xf32>
    %501 = tpu.matmul %500, %6, %cst_139 {dimension_numbers = #tpu.dot_dimension_numbers<[1], [0], [0], [1], [0, 0, 1, 1], [], []>} : vector<1x32xf32>, vector<32x128xf32>, vector<1x128xf32> -> vector<1x128xf32>
    %502 = arith.addf %501, %7 : vector<1x128xf32>
    %cst_140 = arith.constant dense<0.000000e+00> : vector<1x128xf32>
    %503 = tpu.matmul %502, %8, %cst_140 {dimension_numbers = #tpu.dot_dimension_numbers<[1], [0], [0], [1], [0, 0, 1, 1], [], []>} : vector<1x128xf32>, vector<128x128xf32>, vector<1x128xf32> -> vector<1x128xf32>
    %504 = arith.addf %503, %9 : vector<1x128xf32>
    %cst_141 = arith.constant dense<0xFF800000> : vector<1xf32>
    %505 = vector.multi_reduction <maximumf>, %504, %cst_141 [1] : vector<1x128xf32> to vector<1xf32>
    %506 = vector.shape_cast %505 : vector<1xf32> to vector<1x1xf32>
    %507 = vector.broadcast %506 : vector<1x1xf32> to vector<1x128xf32>
    %508 = arith.subf %504, %507 : vector<1x128xf32>
    %509 = math.exp %508 : vector<1x128xf32>
    %cst_142 = arith.constant dense<0.000000e+00> : vector<1xf32>
    %510 = vector.multi_reduction <add>, %509, %cst_142 [1] : vector<1x128xf32> to vector<1xf32>
    %511 = vector.shape_cast %510 : vector<1xf32> to vector<1x1xf32>
    %512 = vector.broadcast %511 : vector<1x1xf32> to vector<1x128xf32>
    %513 = arith.divf %509, %512 : vector<1x128xf32>
    %cst_143 = arith.constant dense<0.000000e+00> : vector<1x128xf32>
    %514 = tpu.matmul %454, %10, %cst_143 {dimension_numbers = #tpu.dot_dimension_numbers<[1], [0], [0], [1], [0, 0, 1, 1], [], []>} : vector<1x16xf32>, vector<16x128xf32>, vector<1x128xf32> -> vector<1x128xf32>
    %515 = arith.addf %514, %11 : vector<1x128xf32>
    %516 = tpu.concatenate %473, %471, %493, %491 in 1 : vector<1x32xf32>, vector<1x32xf32>, vector<1x32xf32>, vector<1x32xf32> -> vector<1x128xf32>
    %517 = tpu.concatenate %513, %515, %516, %14 in 0 : vector<1x128xf32>, vector<1x128xf32>, vector<1x128xf32>, vector<5x128xf32> -> vector<8x128xf32>
    %518 = arith.index_cast %c6_i32 : i32 to index
    %c0_144 = arith.constant 0 : index
    %c0_145 = arith.constant 0 : index
    %519 = vector.load %arg3[%518, %c0_144, %c0_145] : memref<8x8x128xf32, #tpu.memory_space<vmem>>, vector<1x8x128xf32>
    %520 = vector.shape_cast %519 : vector<1x8x128xf32> to vector<8x128xf32>
    %521 = vector.shape_cast %517 : vector<8x128xf32> to vector<1x8x128xf32>
    tpu.vector_store %arg3[%518, %c0_144, %c0_145], %521 {strides = array<i32>} : memref<8x8x128xf32, #tpu.memory_space<vmem>>, vector<1x8x128xf32>,
    %522 = vector.extract_strided_slice %451 {offsets = [1, 0], sizes = [19, 32], strides = [1, 1]} : vector<20x32xf32> to vector<19x32xf32>
    %523 = tpu.concatenate %522, %473 in 0 : vector<19x32xf32>, vector<1x32xf32> -> vector<20x32xf32>
    %c7_i32 = arith.constant 7 : i32
    %524 = arith.index_cast %c7_i32 : i32 to index
    %c0_146 = arith.constant 0 : index
    %c0_147 = arith.constant 0 : index
    %525 = vector.load %arg0[%524, %c0_146, %c0_147] : memref<8x1x16xf32, #tpu.memory_space<vmem>>, vector<1x1x16xf32>
    %526 = vector.shape_cast %525 : vector<1x1x16xf32> to vector<1x16xf32>
    %cst_148 = arith.constant dense<0.000000e+00> : vector<1x128xf32>
    %527 = tpu.matmul %526, %0, %cst_148 {dimension_numbers = #tpu.dot_dimension_numbers<[1], [0], [0], [1], [0, 0, 1, 1], [], []>} : vector<1x16xf32>, vector<16x128xf32>, vector<1x128xf32> -> vector<1x128xf32>
    %cst_149 = arith.constant dense<0.000000e+00> : vector<1x128xf32>
    %528 = tpu.matmul %473, %1, %cst_149 {dimension_numbers = #tpu.dot_dimension_numbers<[1], [0], [0], [1], [0, 0, 1, 1], [], []>} : vector<1x32xf32>, vector<32x128xf32>, vector<1x128xf32> -> vector<1x128xf32>
    %529 = arith.addf %527, %528 : vector<1x128xf32>
    %530 = arith.addf %529, %2 : vector<1x128xf32>
    %531 = arith.negf %530 : vector<1x128xf32>
    %532 = math.exp %531 : vector<1x128xf32>
    %cst_150 = arith.constant 1.000000e+00 : f32
    %533 = vector.broadcast %cst_150 : f32 to vector<1x128xf32>
    %534 = arith.addf %533, %532 : vector<1x128xf32>
    %535 = arith.divf %533, %534 : vector<1x128xf32>
    %536 = math.tanh %530 : vector<1x128xf32>
    %537 = vector.extract_strided_slice %535 {offsets = [0, 0], sizes = [1, 32], strides = [1, 1]} : vector<1x128xf32> to vector<1x32xf32>
    %538 = vector.extract_strided_slice %535 {offsets = [0, 32], sizes = [1, 32], strides = [1, 1]} : vector<1x128xf32> to vector<1x32xf32>
    %539 = vector.extract_strided_slice %535 {offsets = [0, 96], sizes = [1, 32], strides = [1, 1]} : vector<1x128xf32> to vector<1x32xf32>
    %540 = vector.extract_strided_slice %536 {offsets = [0, 64], sizes = [1, 32], strides = [1, 1]} : vector<1x128xf32> to vector<1x32xf32>
    %541 = arith.mulf %538, %471 : vector<1x32xf32>
    %542 = arith.mulf %537, %540 : vector<1x32xf32>
    %543 = arith.addf %541, %542 : vector<1x32xf32>
    %544 = math.tanh %543 : vector<1x32xf32>
    %545 = arith.mulf %539, %544 : vector<1x32xf32>
    %546 = arith.addf %545, %543 : vector<1x32xf32>
    %cst_151 = arith.constant dense<0.000000e+00> : vector<1x128xf32>
    %547 = tpu.matmul %546, %3, %cst_151 {dimension_numbers = #tpu.dot_dimension_numbers<[1], [0], [0], [1], [0, 0, 1, 1], [], []>} : vector<1x32xf32>, vector<32x128xf32>, vector<1x128xf32> -> vector<1x128xf32>
    %cst_152 = arith.constant dense<0.000000e+00> : vector<1x128xf32>
    %548 = tpu.matmul %493, %4, %cst_152 {dimension_numbers = #tpu.dot_dimension_numbers<[1], [0], [0], [1], [0, 0, 1, 1], [], []>} : vector<1x32xf32>, vector<32x128xf32>, vector<1x128xf32> -> vector<1x128xf32>
    %549 = arith.addf %547, %548 : vector<1x128xf32>
    %550 = arith.addf %549, %5 : vector<1x128xf32>
    %551 = arith.negf %550 : vector<1x128xf32>
    %552 = math.exp %551 : vector<1x128xf32>
    %cst_153 = arith.constant 1.000000e+00 : f32
    %553 = vector.broadcast %cst_153 : f32 to vector<1x128xf32>
    %554 = arith.addf %553, %552 : vector<1x128xf32>
    %555 = arith.divf %553, %554 : vector<1x128xf32>
    %556 = math.tanh %550 : vector<1x128xf32>
    %557 = vector.extract_strided_slice %555 {offsets = [0, 0], sizes = [1, 32], strides = [1, 1]} : vector<1x128xf32> to vector<1x32xf32>
    %558 = vector.extract_strided_slice %555 {offsets = [0, 32], sizes = [1, 32], strides = [1, 1]} : vector<1x128xf32> to vector<1x32xf32>
    %559 = vector.extract_strided_slice %555 {offsets = [0, 96], sizes = [1, 32], strides = [1, 1]} : vector<1x128xf32> to vector<1x32xf32>
    %560 = vector.extract_strided_slice %556 {offsets = [0, 64], sizes = [1, 32], strides = [1, 1]} : vector<1x128xf32> to vector<1x32xf32>
    %561 = arith.mulf %558, %491 : vector<1x32xf32>
    %562 = arith.mulf %557, %560 : vector<1x32xf32>
    %563 = arith.addf %561, %562 : vector<1x32xf32>
    %564 = math.tanh %563 : vector<1x32xf32>
    %565 = arith.mulf %559, %564 : vector<1x32xf32>
    %cst_154 = arith.constant dense<0.000000e+00> : vector<1x128xf32>
    %566 = tpu.matmul %526, %12, %cst_154 {dimension_numbers = #tpu.dot_dimension_numbers<[1], [0], [0], [1], [0, 0, 1, 1], [], []>} : vector<1x16xf32>, vector<16x128xf32>, vector<1x128xf32> -> vector<1x128xf32>
    %567 = arith.addf %566, %13 : vector<1x128xf32>
    %568 = vector.extract_strided_slice %567 {offsets = [0, 0], sizes = [1, 20], strides = [1, 1]} : vector<1x128xf32> to vector<1x20xf32>
    %cst_155 = arith.constant dense<0.000000e+00> : vector<1x32xf32>
    %569 = tpu.matmul %568, %523, %cst_155 {dimension_numbers = #tpu.dot_dimension_numbers<[1], [0], [0], [1], [0, 0, 1, 1], [], []>} : vector<1x20xf32>, vector<20x32xf32>, vector<1x32xf32> -> vector<1x32xf32>
    %cst_156 = arith.constant 0.00999999977 : f32
    %570 = vector.broadcast %cst_156 : f32 to vector<1x32xf32>
    %571 = arith.mulf %570, %565 : vector<1x32xf32>
    %572 = arith.addf %569, %571 : vector<1x32xf32>
    %cst_157 = arith.constant dense<0.000000e+00> : vector<1x128xf32>
    %573 = tpu.matmul %572, %6, %cst_157 {dimension_numbers = #tpu.dot_dimension_numbers<[1], [0], [0], [1], [0, 0, 1, 1], [], []>} : vector<1x32xf32>, vector<32x128xf32>, vector<1x128xf32> -> vector<1x128xf32>
    %574 = arith.addf %573, %7 : vector<1x128xf32>
    %cst_158 = arith.constant dense<0.000000e+00> : vector<1x128xf32>
    %575 = tpu.matmul %574, %8, %cst_158 {dimension_numbers = #tpu.dot_dimension_numbers<[1], [0], [0], [1], [0, 0, 1, 1], [], []>} : vector<1x128xf32>, vector<128x128xf32>, vector<1x128xf32> -> vector<1x128xf32>
    %576 = arith.addf %575, %9 : vector<1x128xf32>
    %cst_159 = arith.constant dense<0xFF800000> : vector<1xf32>
    %577 = vector.multi_reduction <maximumf>, %576, %cst_159 [1] : vector<1x128xf32> to vector<1xf32>
    %578 = vector.shape_cast %577 : vector<1xf32> to vector<1x1xf32>
    %579 = vector.broadcast %578 : vector<1x1xf32> to vector<1x128xf32>
    %580 = arith.subf %576, %579 : vector<1x128xf32>
    %581 = math.exp %580 : vector<1x128xf32>
    %cst_160 = arith.constant dense<0.000000e+00> : vector<1xf32>
    %582 = vector.multi_reduction <add>, %581, %cst_160 [1] : vector<1x128xf32> to vector<1xf32>
    %583 = vector.shape_cast %582 : vector<1xf32> to vector<1x1xf32>
    %584 = vector.broadcast %583 : vector<1x1xf32> to vector<1x128xf32>
    %585 = arith.divf %581, %584 : vector<1x128xf32>
    %cst_161 = arith.constant dense<0.000000e+00> : vector<1x128xf32>
    %586 = tpu.matmul %526, %10, %cst_161 {dimension_numbers = #tpu.dot_dimension_numbers<[1], [0], [0], [1], [0, 0, 1, 1], [], []>} : vector<1x16xf32>, vector<16x128xf32>, vector<1x128xf32> -> vector<1x128xf32>
    %587 = arith.addf %586, %11 : vector<1x128xf32>
    %588 = tpu.concatenate %545, %543, %565, %563 in 1 : vector<1x32xf32>, vector<1x32xf32>, vector<1x32xf32>, vector<1x32xf32> -> vector<1x128xf32>
    %589 = tpu.concatenate %585, %587, %588, %14 in 0 : vector<1x128xf32>, vector<1x128xf32>, vector<1x128xf32>, vector<5x128xf32> -> vector<8x128xf32>
    %590 = arith.index_cast %c7_i32 : i32 to index
    %c0_162 = arith.constant 0 : index
    %c0_163 = arith.constant 0 : index
    %591 = vector.load %arg3[%590, %c0_162, %c0_163] : memref<8x8x128xf32, #tpu.memory_space<vmem>>, vector<1x8x128xf32>
    %592 = vector.shape_cast %591 : vector<1x8x128xf32> to vector<8x128xf32>
    %593 = vector.shape_cast %589 : vector<8x128xf32> to vector<1x8x128xf32>
    tpu.vector_store %arg3[%590, %c0_162, %c0_163], %593 {strides = array<i32>} : memref<8x8x128xf32, #tpu.memory_space<vmem>>, vector<1x8x128xf32>,
    %594 = vector.extract_strided_slice %523 {offsets = [1, 0], sizes = [19, 32], strides = [1, 1]} : vector<20x32xf32> to vector<19x32xf32>
    %595 = tpu.concatenate %594, %545 in 0 : vector<19x32xf32>, vector<1x32xf32> -> vector<20x32xf32>
    %c8_i32 = arith.constant 8 : i32
    %c0_164 = arith.constant 0 : index
    %c0_165 = arith.constant 0 : index
    %596 = vector.load %arg4[%c0_164, %c0_165] : memref<20x32xf32, #tpu.memory_space<vmem>>, vector<20x32xf32>
    tpu.vector_store %arg4[%c0_164, %c0_165], %595 {strides = array<i32>} : memref<20x32xf32, #tpu.memory_space<vmem>>, vector<20x32xf32>,
    return
  }
}

</mosaic_0001>

<bundles_post_ra>
// kernel: tpu_custom_call.1
= control target key start
LH: loop header
LB: loop body
LE: loop exit
PB: predicated region body
PF: predicated region fallthrough
CT: control target
= control target key end

     0   :  { %10 = vsyncpa [#allocation3], 0  ;;  %s9776_s0 = inlined_call_operand.hbm [shape: f32[8,1,16], index: 0, kind: input, shape index: {}]   ;;  %s9777_s1 = inlined_call_operand.hbm [shape: f32[32,32], index: 1, kind: input, shape index: {}]   ;;  %s9778_s2 = inlined_call_operand.hbm [shape: f32[352,128], index: 2, kind: input, shape index: {}]   ;;  %s9779_s3 = inlined_call_operand.hbm [shape: f32[8,8,128], index: 3, kind: output, shape index: {0}]   ;;  %s9780_s4 = inlined_call_operand.hbm [shape: f32[20,32], index: 4, kind: output, shape index: {1}]  }
   0x1   :  { %11 = vsyncpa [#allocation6], 0 }
   0x2   :  { %12 = vsyncpa [#allocation4], 0 }
   0x3   :  { %13 = vsyncpa [#allocation10], 0  ;;  %s8425_s15 = smov [#allocation5]   ;;  %s8307_s19 = scalar_lea.hbm %s9777_s1, 512 }
   0x4   :  { %s31_s16 = sshll.u32 %s8425_s15, 4  ;;  %p8308_p0 = scmp.ne.s32.totalorder %s9777_s1, %s8307_s19  ;;  %s32_s16 = int_to_ptr.vmem [resolvable:$true] %s31_s16 }
   0x5   :  { %p8311_p1 = scmp.lt.u32.totalorder %s8307_s19, %s9777_s1 }
   0x7   :  { %p8313_p2 = pnand %p8311_p1, %p8308_p0 }
   0x9   :  { %8316 = shalt.err (!%p8313_p2)
}
   0xa   :  { %s8317_s24 = scalar_lea.vmem %s32_s16, 512  ;;  %p8322_p4 = scmp.lt.s32.totalorder %s32_s16, %s32_s16 }
   0xb   :  { %p8318_p3 = scmp.ne.s32.totalorder %s32_s16, %s8317_s24  ;;  %p8323_p5 = scmp.lt.s32.totalorder %s8317_s24, %s8317_s24 }
   0xd   :  { %p8324_p6 = por %p8323_p5, %p8322_p4 }
   0xf   :  { %p8325_p7 = pnand %p8324_p6, %p8318_p3 }
  0x11   :  { %8328 = shalt.err (!%p8325_p7)
}
  0x12   :  { %s8426_s25 = smov 128   ;;  %s8427_s26 = smov 8  }
  0x13   :  { %37 = dma.hbm_to_vmem [thread:$0]  %s9777_s1, 512, %s32_s16, [#allocation6], %s8426_s25, %s8426_s25, %s8427_s26  }
  0x14   :  { %s8428_s29 = smov [#allocation2]   ;;  %s8329_s7 = scalar_lea.hbm %s9776_s0, 128 }
  0x15   :  { %s19_s30 = sshll.u32 %s8428_s29, 4  ;;  %p8330_p8 = scmp.ne.s32.totalorder %s9776_s0, %s8329_s7  ;;  %s20_s30 = int_to_ptr.vmem [resolvable:$true] %s19_s30 }
  0x16   :  { %p8333_p9 = scmp.lt.u32.totalorder %s8329_s7, %s9776_s0 }
  0x18   :  { %p8335_p10 = pnand %p8333_p9, %p8330_p8 }
  0x1a   :  { %8338 = shalt.err (!%p8335_p10)
}
  0x1b   :  { %s8339_s12 = scalar_lea.vmem %s20_s30, 128  ;;  %p8344_p12 = scmp.lt.s32.totalorder %s20_s30, %s20_s30 }
  0x1c   :  { %p8340_p11 = scmp.ne.s32.totalorder %s20_s30, %s8339_s12  ;;  %p8345_p13 = scmp.lt.s32.totalorder %s8339_s12, %s8339_s12 }
  0x1e   :  { %p8346_p0 = por %p8345_p13, %p8344_p12 }
  0x20   :  { %p8347_p1 = pnand %p8346_p0, %p8340_p11 }
  0x22   :  { %8350 = shalt.err (!%p8347_p1)
}
  0x23   :  { %s8429_s1 = smov 16   ;;  %s8430_s13 = smov 1  }
  0x24   :  { %25 = dma.hbm_to_vmem [thread:$0]  %s9776_s0, 128, %s20_s30, [#allocation3], %s8429_s1, %s8429_s1, %s8430_s13  }
  0x25   :  { %s8431_s16 = smov [#allocation7]   ;;  %s8351_s20 = scalar_lea.hbm %s9778_s2, 5632 }
  0x26   :  { %s43_s17 = sshll.u32 %s8431_s16, 4  ;;  %p8352_p2 = scmp.ne.s32.totalorder %s9778_s2, %s8351_s20  ;;  %s44_s17 = int_to_ptr.vmem [resolvable:$true] %s43_s17 }
  0x27   :  { %p8355_p3 = scmp.lt.u32.totalorder %s8351_s20, %s9778_s2 }
  0x29   :  { %p8357_p4 = pnand %p8355_p3, %p8352_p2 }
  0x2b   :  { %8360 = shalt.err (!%p8357_p4)
}
  0x2c   :  { %s8361_s27 = scalar_lea.vmem %s44_s17, 5632  ;;  %p8366_p6 = scmp.lt.s32.totalorder %s44_s17, %s44_s17 }
  0x2d   :  { %p8362_p5 = scmp.ne.s32.totalorder %s44_s17, %s8361_s27  ;;  %p8367_p7 = scmp.lt.s32.totalorder %s8361_s27, %s8361_s27 }
  0x2f   :  { %p8368_p8 = por %p8367_p7, %p8366_p6 }
  0x31   :  { %p8369_p9 = pnand %p8368_p8, %p8362_p5 }
  0x33   :  { %8372 = shalt.err (!%p8369_p9)
}
  0x34   :  { %49 = dma.hbm_to_vmem [thread:$0]  %s9778_s2, 5632, %s44_s17, [#allocation6], %s8426_s25, %s8426_s25, %s8427_s26  }
  0x35   :  { %8417 = dma.done.wait [#allocation3], 128  }
  0x36   :  { %8418 = vsyncadd [#allocation3], 4294967168 }
  0x37   :  { %8419 = dma.done.wait [#allocation6], 6144  }
  0x38   :  { %8420 = vsyncadd [#allocation6], 4294961152  ;;  %v9781_v0 = vmov 0.0|0.0   ;;  %vm8433_vm0 = vmmov 0   ;;  %v9783_v1 = vmov 0.0   ;;  %v61_v2 = vld [vmem:[#allocation7 + $0x10] sm:$0xff] }
  0x39   :  { %7646 = vmatprep.subr.bf16.mxu0 %v9781_v0  ;;  %6782 = vmatprep.mubr.msk.f32.mxu0 %vm8433_vm0, %v9783_v1  ;;  %v62_v3 = vld [vmem:[#allocation7 + $0x18] sm:$0xff]  ;;  %v63_v4 = vld [vmem:[#allocation7 + $0x20] sm:$0xff]  ;;  %v64_v6 = vld [vmem:[#allocation7 + $0x28] sm:$0xff]  ;;  %vm111_vm1 = vcmask 261120   ;;  %vm185_vm2 = vcmask 130048   ;;  %s8435_s2 = smov 64  }
  0x3a   :  { %7667 = vmatprep.subr.bf16.mxu1 %v9781_v0  ;;  %6818 = vmatprep.mubr.msk.f32.mxu1 %vm8433_vm0, %v9783_v1  ;;  %v8513_v5 = vpack.c.bf16 %v62_v3, %v61_v2  ;;  %v8516_v7 = vpack.c.bf16 %v64_v6, %v63_v4  ;;  %v59_v8 = vld [vmem:[#allocation7] sm:$0xff]  ;;  %v60_v9 = vld [vmem:[#allocation7 + $0x8] sm:$0xff]  ;;  %v8527_v12 = vld [vmem:[#allocation2] sm:$0x1]  ;;  %s8436_s29 = smov 32   ;;  %vm549_vm3 = vcmask 1043456  }
  0x3b   :  { %v103_v10 = vld [vmem:[#allocation5] sm:$0x1]  ;;  %v8520_v11 = vpack.c.bf16 %v60_v9, %v59_v8  ;;  %v8534_v15 = vld [vmem:[#allocation7 + $0x30] sm:$0x1]  ;;  %v104_v21 = vld [vmem:[#allocation5 + $0x1] sm:$0x1] }
  0x3c   :  { %7648 = vmatpush3.bf16.msra.mxu0 %v8513_v5  ;;  %v70_v32 = vld [vmem:[#allocation7 + $0x58] sm:$0xff]  ;;  %v71_v33 = vld [vmem:[#allocation7 + $0x60] sm:$0xff]  ;;  %v72_v34 = vld [vmem:[#allocation7 + $0x68] sm:$0xff]  ;;  %vm545_vm4 = vcmask 162816   ;;  %vm879_vm5 = vcmask 1046528   ;;  %vm874_vm6 = vcmask 1042432  }
  0x3d   :  { %7649 = vmatprep.subr.bf16.mxu0 %v9781_v0  ;;  %v8545_v35 = vpack.c.bf16 %v71_v33, %v70_v32  ;;  %v73_v36 = vld [vmem:[#allocation7 + $0x70] sm:$0xff]  ;;  %v66_v38 = vld [vmem:[#allocation7 + $0x38] sm:$0xff]  ;;  %v67_v39 = vld [vmem:[#allocation7 + $0x40] sm:$0xff]  ;;  %vm766_vm7 = vcmask 1040384   ;;  %s8437_s30 = smov 96   ;;  %vm861_vm8 = vcmask 523264  }
  0x3e   :  { %v8548_v37 = vpack.c.bf16 %v73_v36, %v72_v34  ;;  %v105_v40 = vld [vmem:[#allocation5 + $0x2] sm:$0x1]  ;;  %v8552_v41 = vpack.c.bf16 %v67_v39, %v66_v38  ;;  %v68_v43 = vld [vmem:[#allocation7 + $0x48] sm:$0xff]  ;;  %v69_v44 = vld [vmem:[#allocation7 + $0x50] sm:$0xff]  ;;  %vm863_vm9 = vcmask 785408   ;;  %vm872_vm10 = vcmask 1041408  }
  0x3f   :  { %v8558_v45 = vpack.c.bf16 %v69_v44, %v68_v43  ;;  %v106_v50 = vld [vmem:[#allocation5 + $0x3] sm:$0x1]  ;;  %v100_v54 = vld [vmem:[#allocation7 + $0x148] sm:$0xff]  ;;  %v101_v55 = vld [vmem:[#allocation7 + $0x150] sm:$0xff]  ;;  %vm6250_vm11 = vcmask 257024   ;;  %s8438_s5 = smov [#allocation9]  }
  0x40   :  { %7651 = vmatpush3.bf16.msra.mxu0 %v8516_v7  ;;  %v8573_v56 = vpack.c.bf16 %v101_v55, %v100_v54  ;;  %v8581_v57 = vld [vmem:[#allocation7 + $0x78] sm:$0x1]  ;;  %v8586_v9 = vld [vmem:[#allocation5 + $0x8] sm:$0xff]  ;;  %v83_v44 = vld [vmem:[#allocation7 + $0xc0] sm:$0xff]  ;;  %s6269_s6 = sshll.u32 %s8438_s5, 4  ;;  %s6270_s6 = int_to_ptr.vmem [resolvable:$true] %s6269_s6 }
  0x41   :  { %7652 = vmatprep.subr.bf16.mxu0 %v9781_v0  ;;  %v80_v39 = vld [vmem:[#allocation7 + $0xa8] sm:$0xff]  ;;  %v89_v55 = vld [vmem:[#allocation7 + $0xf0] sm:$0xff]  ;;  %s8373_s7 = scalar_lea.vmem %s6270_s6, 384  ;;  %p8378_p11 = scmp.lt.s32.totalorder %s6270_s6, %s6270_s6 }
  0x42   :  { %7669 = vmatpush3.bf16.msra.mxu1 %v8573_v56  ;;  %v88_v54 = vld [vmem:[#allocation7 + $0xe8] sm:$0xff]  ;;  %p8374_p10 = scmp.ne.s32.totalorder %s6270_s6, %s8373_s7  ;;  %p8379_p12 = scmp.lt.s32.totalorder %s8373_s7, %s8373_s7 }
  0x43   :  { %6783 = vmatmul.mubr.msk.f32.vlgmr.msra.gmra.mrb[0].mxu0 %vm111_vm1, %v103_v10  ;;  %7673 = vmatprep.subr.bf16.mxu1 %v9781_v0  ;;  %v8588_v10 = vld [vmem:[#allocation5 + $0x10] sm:$0xff] }
  0x44   :  { %7654 = vmatpush3.bf16.msra.mxu0 %v8520_v11  ;;  %6789 = vmatprep.mubr.msk.f32.mxu0 %vm8433_vm0, %v9783_v1  ;;  %p8380_p13 = por %p8379_p12, %p8378_p11 }
  0x45   :  { %7655 = vmatprep.subr.bf16.mxu0 %v9781_v0  ;;  %6819 = vmatmul.mubr.msk.f32.vlgmr.msra.gmra.mrb[0].mxu1 %vm185_vm2, %v8527_v12 }
  0x46   :  { %6838 = vmatprep.mubr.msk.f32.mxu1 %vm8433_vm0, %v9783_v1  ;;  %p8381_p0 = pnand %p8380_p13, %p8374_p10 }
  0x47   :  { %6790 = vmatmul.mubr.msk.f32.vlgmr.msra.gmra.mrb[2].mxu0 %vm185_vm2, %v8527_v12 }
  0x48   :  { %6800 = vmatprep.mubr.msk.f32.mxu0 %vm8433_vm0, %v9783_v1  ;;  %7657 = vmatpush3.bf16.msra.mxu0 %v8545_v35 }
  0x49   :  { %7658 = vmatprep.subr.bf16.mxu0 %v9781_v0 }
  0x4c   :  { %7660 = vmatpush3.bf16.msra.mxu0 %v8548_v37 }
  0x4d   :  { %7661 = vmatprep.subr.bf16.mxu0 %v9781_v0 }
  0x4f   :  { %6801 = vmatmul.mubr.msk.f32.vlgmr.msra.gmra.mrb[4].mxu0 %vm111_vm1, %v105_v40  ;;  %v81_v40 = vld [vmem:[#allocation7 + $0xb0] sm:$0xff] }
  0x50   :  { %7663 = vmatpush3.bf16.msra.mxu0 %v8552_v41  ;;  %6811 = vmatprep.mubr.msk.f32.mxu0 %vm8433_vm0, %v9783_v1  ;;  %v8622_v43 = vpack.c.bf16 %v81_v40, %v80_v39 }
  0x51   :  { %7664 = vmatprep.subr.bf16.mxu0 %v9781_v0 }
  0x54   :  { %7666 = vmatpush3.bf16.msra.mxu0 %v8558_v45 }
  0x55   :  { %7670 = vmatprep.subr.bf16.mxu0 %v9781_v0 }
 0x116   :  { %v181_v13 = vpop.f32.mrb[0].mxu0 }
 0x117   :  { %v6784_v14 = vpop.f32.mrb[1].mxu0 }
 0x118   :  { %v7671_v14 = vpack.c.bf16 %v8588_v10, %v8586_v9 }
 0x11a   :  { %v255_v16 = vpop.f32.mrb[2].mxu0 }
 0x11b   :  { %v256_v17 = vadd.f32 %v255_v16, %v181_v13  ;;  %v6791_v18 = vpop.f32.mrb[3].mxu0  ;;  %v536_v13 = vpop.f32.mrb[0].mxu1  ;;  %v8592_v16 = vld [vmem:[#allocation7 + $0x158] sm:$0x1] }
 0x11c   :  { %v537_v18 = vadd.f32 %v536_v13, %v8592_v16 }
 0x11d   :  { %v259_v19 = vadd.f32 %v256_v17, %v8534_v15  ;;  %v6820_v17 = vpop.f32.mrb[1].mxu1 }
 0x11e   :  { %v94_v17 = vld [vmem:[#allocation7 + $0x118] sm:$0xff] }
 0x11f   :  { %8141 = vtanh.f32 %v259_v19  ;;  %v6288_v22 = vmul.f32 -1.442695, %v259_v19  ;;  %v8596_v19 = vld [vmem:[#allocation5 + $0x18] sm:$0xf] }
 0x121   :  { %8143 = vpow2.f32 %v6288_v22 }
 0x122   :  { %v362_v51 = vpop.f32.mrb[4].mxu0 }
 0x123   :  { %v6802_v52 = vpop.f32.mrb[5].mxu0 }
 0x124   :  { %v87_v52 = vld [vmem:[#allocation7 + $0xe0] sm:$0xff] }
 0x129   :  { %v8142_v20 = vpop.eup %8141 }
 0x12a   :  { %273 = vrot.lane.b32.xlu0 %v8142_v20, %s8435_s2 }
 0x12b   :  { %v8144_v23 = vpop.eup %8143 }
 0x12c   :  { %v263_v24 = vadd.f32 1.0, %v8144_v23 }
 0x12e   :  { %268 = vrot.lane.b32.xlu0 %v104_v21, %s8436_s29  ;;  %8145 = vrcp.f32 %v263_v24  ;;  %v75_v24 = vld [vmem:[#allocation7 + $0x80] sm:$0xff] }
 0x138   :  { %v8146_v25 = vpop.eup %8145 }
 0x19c   :  { %v274_v26 = vpop.permute.xlu0 %273 }
 0x19d   :  { %v276_v27 = vmul.f32 %v8146_v25, %v274_v26  ;;  %v77_v26 = vld [vmem:[#allocation7 + $0x90] sm:$0xff] }
 0x19f   :  { %278 = vrot.lane.b32.xlu1 %v276_v27, %s8436_s29 }
 0x1a0   :  { %v269_v28 = vpop.permute.xlu0 %268 }
 0x1a1   :  { %v271_v29 = vmul.f32 %v8146_v25, %v269_v28  ;;  %v78_v28 = vld [vmem:[#allocation7 + $0x98] sm:$0xff] }
 0x211   :  { %v279_v30 = vpop.permute.xlu1 %278 }
 0x212   :  { %v8540_v31 = vadd.f32 %v279_v30, %v271_v29  ;;  %v8610_v29 = vpack.c.bf16 %v78_v28, %v77_v26 }
 0x214   :  { %8147 = vtanh.f32 %v8540_v31  ;;  %289 = vrot.lane.b32.xlu0 %v8540_v31, %s8435_s2 }
 0x21e   :  { %v8148_v42 = vpop.eup %8147 }
 0x21f   :  { %284 = vrot.lane.b32.xlu1 %v8148_v42, %s8435_s2  ;;  %v82_v42 = vld [vmem:[#allocation7 + $0xb8] sm:$0xff] }
 0x286   :  { %v290_v48 = vpop.permute.xlu0 %289 }
 0x291   :  { %v285_v46 = vpop.permute.xlu1 %284 }
 0x292   :  { %v8565_v47 = vmul.f32 %v8146_v25, %v285_v46  ;;  %v76_v25 = vld [vmem:[#allocation7 + $0x88] sm:$0xff]  ;;  %v8625_v46 = vpack.c.bf16 %v83_v44, %v82_v42 }
 0x293   :  { %v8607_v27 = vpack.c.bf16 %v76_v25, %v75_v24 }
 0x294   :  { %v292_v49 = vadd.f32 %v290_v48, %v8565_v47  ;;  %v84_v48 = vld [vmem:[#allocation7 + $0xc8] sm:$0xff] }
 0x295   :  { %7675 = vmatpush3.bf16.msra.mxu1 %v8607_v27 }
 0x296   :  { %367 = vrot.lane.b32.xlu1 %v292_v49, %s8436_s29  ;;  %7676 = vmatprep.subr.bf16.mxu1 %v9781_v0  ;;  %v85_v49 = vld [vmem:[#allocation7 + $0xd0] sm:$0xff] }
 0x299   :  { %7678 = vmatpush3.bf16.msra.mxu1 %v8610_v29 }
 0x29a   :  { %450 = vrot.lane.b32.xlu1 %v106_v50, %s8436_s29  ;;  %7703 = vmatprep.subr.bf16.mxu1 %v9781_v0  ;;  %v8629_v50 = vpack.c.bf16 %v85_v49, %v84_v48 }
 0x308   :  { %v368_v53 = vpop.permute.xlu1 %367 }
 0x309   :  { %6812 = vmatmul.mubr.msk.f32.vlgmr.msra.gmra.mrb[6].mxu0 %vm111_vm1, %v368_v53 }
 0x30a   :  { %6827 = vmatprep.mubr.msk.f32.mxu0 %vm8433_vm0, %v9783_v1  ;;  %7672 = vmatpush3.bf16.msra.mxu0 %v7671_v14 }
 0x30b   :  { %6825 = vmatprep.subr.mxu0 %v9783_v1 }
 0x30c   :  { %v451_v20 = vpop.permute.xlu1 %450 }
 0x30e   :  { %6826 = vmatpush3.msk.msra.mxu0 %vm549_vm3, %v8596_v19 }
 0x30f   :  { %6828 = vmatmul.mubr.msk.f32.vlgmr.msra.gmra.mrb[8].mxu0 %vm545_vm4, %v537_v18  ;;  %7679 = vmatprep.subr.bf16.mxu0 %v9781_v0  ;;  %v95_v18 = vld [vmem:[#allocation7 + $0x120] sm:$0xff] }
 0x310   :  { %6873 = vmatprep.mubr.msk.f32.mxu0 %vm8433_vm0, %v9783_v1  ;;  %7681 = vmatpush3.bf16.msra.mxu0 %v8622_v43 }
 0x311   :  { %7682 = vmatprep.subr.bf16.mxu0 %v9781_v0 }
 0x314   :  { %7684 = vmatpush3.bf16.msra.mxu0 %v8625_v46 }
 0x315   :  { %7685 = vmatprep.subr.bf16.mxu0 %v9781_v0 }
 0x318   :  { %7687 = vmatpush3.bf16.msra.mxu0 %v8629_v50 }
 0x319   :  { %7688 = vmatprep.subr.bf16.mxu0 %v9781_v0 }
 0x3dc   :  { %v437_v58 = vpop.f32.mrb[6].mxu0 }
 0x3dd   :  { %v438_v59 = vadd.f32 %v437_v58, %v362_v51  ;;  %v6813_v60 = vpop.f32.mrb[7].mxu0  ;;  %v86_v51 = vld [vmem:[#allocation7 + $0xd8] sm:$0xff]  ;;  %v8637_v58 = vpack.c.bf16 %v89_v55, %v88_v54 }
 0x3de   :  { %v8633_v53 = vpack.c.bf16 %v87_v52, %v86_v51  ;;  %v91_v60 = vld [vmem:[#allocation7 + $0x100] sm:$0xff] }
 0x3df   :  { %v441_v61 = vadd.f32 %v438_v59, %v8581_v57  ;;  %v90_v59 = vld [vmem:[#allocation7 + $0xf8] sm:$0xff] }
 0x3e0   :  { %7690 = vmatpush3.bf16.msra.mxu0 %v8633_v53 }
 0x3e1   :  { %8149 = vtanh.f32 %v441_v61  ;;  %v6291_v63 = vmul.f32 -1.442695, %v441_v61  ;;  %7691 = vmatprep.subr.bf16.mxu0 %v9781_v0  ;;  %v8641_v61 = vpack.c.bf16 %v91_v60, %v90_v59 }
 0x3e2   :  { %v619_v32 = vpop.f32.mrb[8].mxu0 }
 0x3e3   :  { %8151 = vpow2.f32 %v6291_v63  ;;  %v6829_v33 = vpop.f32.mrb[9].mxu0  ;;  %v93_v63 = vld [vmem:[#allocation7 + $0x110] sm:$0xff] }
 0x3e4   :  { %7693 = vmatpush3.bf16.msra.mxu0 %v8637_v58 }
 0x3e5   :  { %7694 = vmatprep.subr.bf16.mxu0 %v9781_v0 }
 0x3e8   :  { %7696 = vmatpush3.bf16.msra.mxu0 %v8641_v61 }
 0x3e9   :  { %7697 = vmatprep.subr.bf16.mxu0 %v9781_v0 }
 0x3eb   :  { %v8150_v62 = vpop.eup %8149 }
 0x3ec   :  { %455 = vrot.lane.b32.xlu0 %v8150_v62, %s8435_s2  ;;  %v92_v62 = vld [vmem:[#allocation7 + $0x108] sm:$0xff] }
 0x3ed   :  { %v8152_v2 = vpop.eup %8151 }
 0x3ee   :  { %v445_v3 = vadd.f32 1.0, %v8152_v2  ;;  %v8645_v2 = vpack.c.bf16 %v93_v63, %v92_v62  ;;  %v880_v63 = vrot.slane %v8586_v9, 1 }
 0x3f0   :  { %8153 = vrcp.f32 %v445_v3  ;;  %7699 = vmatpush3.bf16.msra.mxu0 %v8645_v2  ;;  %v97_v3 = vld [vmem:[#allocation7 + $0x130] sm:$0xff] }
 0x3f1   :  { %7700 = vmatprep.subr.bf16.mxu0 %v9781_v0 }
 0x3fa   :  { %v8154_v4 = vpop.eup %8153 }
 0x3fb   :  { %v453_v21 = vmul.f32 %v8154_v4, %v451_v20  ;;  %v8683_v20 = vpack.c.bf16 %v95_v18, %v94_v17 }
 0x3fd   :  { %7702 = vmatpush3.bf16.msra.mxu0 %v8683_v20 }
 0x3fe   :  { %7727 = vmatprep.subr.bf16.mxu0 %v9781_v0 }
 0x45e   :  { %v456_v6 = vpop.permute.xlu0 %455 }
 0x45f   :  { %v458_v8 = vmul.f32 %v8154_v4, %v456_v6 }
 0x461   :  { %460 = vrot.lane.b32.xlu0 %v458_v8, %s8436_s29 }
 0x4d3   :  { %v461_v22 = vpop.permute.xlu0 %460 }
 0x4d4   :  { %v8604_v23 = vadd.f32 %v461_v22, %v453_v21  ;;  %v8687_v21 = vld [vmem:[#allocation7 + $0xa0] sm:$0x1] }
 0x4d6   :  { %8155 = vtanh.f32 %v8604_v23 }
 0x4e0   :  { %v8156_v30 = vpop.eup %8155 }
 0x4e1   :  { %466 = vrot.lane.b32.xlu1 %v8156_v30, %s8435_s2 }
 0x4e5   :  { %849 = vrot.lane.b32.xlu1 %v8565_v47, %s8436_s29 }
 0x553   :  { %v467_v34 = vpop.permute.xlu1 %466 }
 0x554   :  { %v8618_v36 = vmul.f32 %v8154_v4, %v467_v34  ;;  %v98_v4 = vld [vmem:[#allocation7 + $0x138] sm:$0xff] }
 0x555   :  { %v8650_v8 = vpack.c.bf16 %v98_v4, %v97_v3  ;;  %v881_v3 = vrot.slane %v8588_v10, 1 }
 0x556   :  { %v540_v38 = vmul.f32 0.01, %v8618_v36 }
 0x557   :  { %v8665_v14 = vpop.permute.xlu1 %849  ;;  %v8718_v4 = vsel %vm879_vm5, %v880_v63, %v881_v3 }
 0x558   :  { %542 = vrot.lane.b32.xlu0 %v540_v38, %s8436_s29 }
 0x5ca   :  { %v543_v6 = vpop.permute.xlu0 %542 }
 0x5cb   :  { %v620_v13 = vadd.f32 %v619_v32, %v543_v6 }
 0x5cd   :  { %6839 = vmatmul.mubr.msk.f32.vlgmr.msra.gmra.mrb[2].mxu1 %vm111_vm1, %v620_v13  ;;  %v888_v13 = vrot.slane %v8565_v47, 5  ;;  %v883_v47 = vrot.slane %v8596_v19, 1 }
 0x5ce   :  { %7705 = vmatpush3.bf16.msra.mxu1 %v8650_v8  ;;  %6880 = vmatprep.mubr.msk.f32.mxu1 %vm8433_vm0, %v9783_v1 }
 0x5cf   :  { %7706 = vmatprep.subr.bf16.mxu1 %v9781_v0 }
 0x5d1   :  { %6881 = vmatmul.mubr.msk.f32.vlgmr.msra.gmra.mrb[4].mxu1 %vm185_vm2, %v8527_v12  ;;  %v8672_v12 = vld [vmem:[#allocation2 + $0x1] sm:$0x1] }
 0x5d2   :  { %7708 = vmatpush3.bf16.msra.mxu1 %v8513_v5  ;;  %6891 = vmatprep.mubr.msk.f32.mxu1 %vm8433_vm0, %v9783_v1 }
 0x5d3   :  { %7709 = vmatprep.subr.bf16.mxu1 %v9781_v0 }
 0x5d6   :  { %7711 = vmatpush3.bf16.msra.mxu1 %v8516_v7 }
 0x5d7   :  { %7712 = vmatprep.subr.bf16.mxu1 %v9781_v0 }
 0x5d9   :  { %6892 = vmatmul.mubr.msk.f32.vlgmr.msra.gmra.mrb[6].mxu1 %vm111_vm1, %v8665_v14 }
 0x5da   :  { %7714 = vmatpush3.bf16.msra.mxu1 %v8520_v11  ;;  %6898 = vmatprep.mubr.msk.f32.mxu1 %vm8433_vm0, %v9783_v1 }
 0x5db   :  { %7715 = vmatprep.subr.bf16.mxu1 %v9781_v0 }
 0x5dd   :  { %6899 = vmatmul.mubr.msk.f32.vlgmr.msra.gmra.mrb[8].mxu1 %vm185_vm2, %v8672_v12 }
 0x5de   :  { %7717 = vmatpush3.bf16.msra.mxu1 %v8545_v35  ;;  %6909 = vmatprep.mubr.msk.f32.mxu1 %vm8433_vm0, %v9783_v1 }
 0x5df   :  { %7718 = vmatprep.subr.bf16.mxu1 %v9781_v0 }
 0x5e2   :  { %7720 = vmatpush3.bf16.msra.mxu1 %v8548_v37 }
 0x5e3   :  { %7721 = vmatprep.subr.bf16.mxu1 %v9781_v0 }
 0x6a0   :  { %v692_v22 = vpop.f32.mrb[2].mxu1 }
 0x6a1   :  { %v693_v24 = vadd.f32 %v692_v22, %v8687_v21  ;;  %v6840_v25 = vpop.f32.mrb[3].mxu1 }
 0x6a3   :  { %6874 = vmatmul.mubr.f32.vlgmr.msra.gmra.mrb[10].mxu0 %v693_v24  ;;  %v8738_v24 = vsel %vm879_vm5, %v881_v3, %v883_v47 }
 0x6a4   :  { %v8690_v26 = vpop.f32.mrb[4].mxu1  ;;  %7729 = vmatpush3.bf16.msra.mxu0 %v8573_v56  ;;  %6927 = vmatprep.mubr.msk.f32.mxu0 %vm8433_vm0, %v9783_v1  ;;  %v7731_v25 = vpack.c.bf16 %v8738_v24, %v8718_v4 }
 0x6a5   :  { %v6882_v28 = vpop.f32.mrb[5].mxu1  ;;  %7733 = vmatprep.subr.bf16.mxu0 %v9781_v0 }
 0x6a7   :  { %6928 = vmatmul.mubr.msk.f32.vlgmr.msra.gmra.mrb[12].mxu0 %vm185_vm2, %v8672_v12 }
 0x6a8   :  { %7735 = vmatpush3.bf16.msra.mxu0 %v8607_v27  ;;  %6947 = vmatprep.mubr.msk.f32.mxu0 %vm8433_vm0, %v9783_v1 }
 0x6a9   :  { %7736 = vmatprep.subr.bf16.mxu0 %v9781_v0 }
 0x6ac   :  { %v963_v30 = vpop.f32.mrb[6].mxu1  ;;  %7738 = vmatpush3.bf16.msra.mxu0 %v8610_v29 }
 0x6ad   :  { %v6893_v32 = vpop.f32.mrb[7].mxu1  ;;  %7763 = vmatprep.subr.bf16.mxu0 %v9781_v0 }
 0x6b0   :  { %v1036_v33 = vpop.f32.mrb[8].mxu1 }
 0x6b1   :  { %v1037_v34 = vadd.f32 %v1036_v33, %v963_v30  ;;  %v6900_v38 = vpop.f32.mrb[9].mxu1 }
 0x6b3   :  { %v1040_v39 = vadd.f32 %v1037_v34, %v8534_v15 }
 0x6b5   :  { %8157 = vtanh.f32 %v1040_v39  ;;  %v6299_v42 = vmul.f32 -1.442695, %v1040_v39 }
 0x6b7   :  { %8159 = vpow2.f32 %v6299_v42 }
 0x6bf   :  { %v8158_v40 = vpop.eup %8157 }
 0x6c0   :  { %1050 = vrot.lane.b32.xlu0 %v8158_v40, %s8435_s2 }
 0x6c1   :  { %v8160_v44 = vpop.eup %8159 }
 0x6c2   :  { %v1044_v48 = vadd.f32 1.0, %v8160_v44 }
 0x6c4   :  { %8161 = vrcp.f32 %v1044_v48 }
 0x6ce   :  { %v8162_v49 = vpop.eup %8161 }
 0x6cf   :  { %v1048_v59 = vmul.f32 %v8162_v49, %v8540_v31 }
 0x732   :  { %v1051_v51 = vpop.permute.xlu0 %1050 }
 0x733   :  { %v1053_v52 = vmul.f32 %v8162_v49, %v1051_v51 }
 0x735   :  { %1055 = vrot.lane.b32.xlu1 %v1053_v52, %s8436_s29 }
 0x776   :  { %v8707_v54 = vpop.f32.mrb[10].mxu0 }
 0x777   :  { %v6875_v55 = vpop.f32.mrb[11].mxu0 }
 0x7a7   :  { %v1056_v60 = vpop.permute.xlu1 %1055 }
 0x7a8   :  { %v8710_v62 = vadd.f32 %v1056_v60, %v1048_v59  ;;  %v1310_v59 = vpop.f32.mrb[12].mxu0 }
 0x7a9   :  { %v1311_v60 = vadd.f32 %v1310_v59, %v8592_v16  ;;  %v6929_v63 = vpop.f32.mrb[13].mxu0 }
 0x7aa   :  { %8163 = vtanh.f32 %v8710_v62  ;;  %1066 = vrot.lane.b32.xlu1 %v8710_v62, %s8435_s2 }
 0x7b4   :  { %v8164_v6 = vpop.eup %8163 }
 0x7b5   :  { %1061 = vrot.lane.b32.xlu0 %v8164_v6, %s8435_s2 }
 0x7b9   :  { %1070 = vrot.lane.b32.xlu0 %v8618_v36, %s8436_s29 }
 0x7bd   :  { %889 = vrot.lane.b32.xlu0 %v888_v13, %s8436_s29 }
 0x81c   :  { %v1067_v9 = vpop.permute.xlu1 %1066 }
 0x827   :  { %v1062_v17 = vpop.permute.xlu0 %1061 }
 0x828   :  { %v8725_v18 = vmul.f32 %v8162_v49, %v1062_v17 }
 0x82a   :  { %v1069_v10 = vadd.f32 %v1067_v9, %v8725_v18 }
 0x82b   :  { %v1071_v22 = vpop.permute.xlu0 %1070 }
 0x82c   :  { %1145 = vrot.lane.b32.xlu1 %v1069_v10, %s8436_s29  ;;  %6910 = vmatmul.mubr.msk.f32.vlgmr.msra.gmra.mrb[10].mxu1 %vm111_vm1, %v1071_v22 }
 0x82d   :  { %7723 = vmatpush3.bf16.msra.mxu1 %v8552_v41  ;;  %6920 = vmatprep.mubr.msk.f32.mxu1 %vm8433_vm0, %v9783_v1 }
 0x82e   :  { %7724 = vmatprep.subr.bf16.mxu1 %v9781_v0 }
 0x82f   :  { %v890_v30 = vpop.permute.xlu0 %889 }
 0x830   :  { %v8747_v32 = vsel %vm874_vm6, %v883_v47, %v890_v30 }
 0x831   :  { %7726 = vmatpush3.bf16.msra.mxu1 %v8558_v45 }
 0x832   :  { %7730 = vmatprep.subr.bf16.mxu1 %v9781_v0 }
 0x89e   :  { %v1146_v28 = vpop.permute.xlu1 %1145 }
 0x89f   :  { %6921 = vmatmul.mubr.msk.f32.vlgmr.msra.gmra.mrb[12].mxu1 %vm111_vm1, %v1146_v28 }
 0x8a0   :  { %7732 = vmatpush3.bf16.msra.mxu1 %v7731_v25  ;;  %6936 = vmatprep.mubr.msk.f32.mxu1 %vm8433_vm0, %v9783_v1 }
 0x8a1   :  { %6934 = vmatprep.subr.mxu1 %v9783_v1 }
 0x8a4   :  { %6935 = vmatpush3.msk.msra.mxu1 %vm549_vm3, %v8747_v32 }
 0x8a5   :  { %7739 = vmatprep.subr.bf16.mxu1 %v9781_v0  ;;  %6937 = vmatmul.mubr.msk.f32.vlgmr.msra.gmra.mrb[14].mxu1 %vm545_vm4, %v1311_v60 }
 0x8a6   :  { %7741 = vmatpush3.bf16.msra.mxu1 %v8622_v43  ;;  %6982 = vmatprep.mubr.msk.f32.mxu1 %vm8433_vm0, %v9783_v1 }
 0x8a7   :  { %7742 = vmatprep.subr.bf16.mxu1 %v9781_v0 }
 0x8aa   :  { %7744 = vmatpush3.bf16.msra.mxu1 %v8625_v46 }
 0x8ab   :  { %7745 = vmatprep.subr.bf16.mxu1 %v9781_v0 }
 0x8ae   :  { %7747 = vmatpush3.bf16.msra.mxu1 %v8629_v50 }
 0x8af   :  { %7748 = vmatprep.subr.bf16.mxu1 %v9781_v0 }
 0x8b2   :  { %7750 = vmatpush3.bf16.msra.mxu1 %v8633_v53 }
 0x8b3   :  { %7751 = vmatprep.subr.bf16.mxu1 %v9781_v0 }
 0x8b6   :  { %7753 = vmatpush3.bf16.msra.mxu1 %v8637_v58 }
 0x8b7   :  { %7754 = vmatprep.subr.bf16.mxu1 %v9781_v0 }
 0x8ba   :  { %7756 = vmatpush3.bf16.msra.mxu1 %v8641_v61 }
 0x8bb   :  { %7757 = vmatprep.subr.bf16.mxu1 %v9781_v0 }
 0x8be   :  { %7759 = vmatpush3.bf16.msra.mxu1 %v8645_v2 }
 0x8bf   :  { %7760 = vmatprep.subr.bf16.mxu1 %v9781_v0 }
 0x8c2   :  { %7762 = vmatpush3.bf16.msra.mxu1 %v8683_v20 }
 0x8c3   :  { %7787 = vmatprep.subr.bf16.mxu1 %v9781_v0 }
 0x8ff   :  { %v1140_v19 = vpop.f32.mrb[10].mxu1 }
 0x900   :  { %v6911_v33 = vpop.f32.mrb[11].mxu1 }
 0x972   :  { %v1215_v34 = vpop.f32.mrb[12].mxu1 }
 0x973   :  { %v1216_v38 = vadd.f32 %v1215_v34, %v1140_v19  ;;  %v6922_v39 = vpop.f32.mrb[13].mxu1 }
 0x975   :  { %v1219_v40 = vadd.f32 %v1216_v38, %v8581_v57 }
 0x977   :  { %8165 = vtanh.f32 %v1219_v40  ;;  %v6302_v44 = vmul.f32 -1.442695, %v1219_v40 }
 0x978   :  { %v1391_v9 = vpop.f32.mrb[14].mxu1 }
 0x979   :  { %8167 = vpow2.f32 %v6302_v44  ;;  %v6938_v10 = vpop.f32.mrb[15].mxu1 }
 0x981   :  { %v8166_v42 = vpop.eup %8165 }
 0x982   :  { %1229 = vrot.lane.b32.xlu1 %v8166_v42, %s8435_s2 }
 0x983   :  { %v8168_v48 = vpop.eup %8167 }
 0x984   :  { %v1223_v49 = vadd.f32 1.0, %v8168_v48 }
 0x986   :  { %8169 = vrcp.f32 %v1223_v49 }
 0x990   :  { %v8170_v51 = vpop.eup %8169 }
 0x991   :  { %v1227_v3 = vmul.f32 %v8170_v51, %v8604_v23 }
 0x9f4   :  { %v1230_v52 = vpop.permute.xlu1 %1229 }
 0x9f5   :  { %v1232_v55 = vmul.f32 %v8170_v51, %v1230_v52 }
 0x9f7   :  { %1234 = vrot.lane.b32.xlu0 %v1232_v55, %s8436_s29 }
 0xa69   :  { %v1235_v6 = vpop.permute.xlu0 %1234 }
 0xa6a   :  { %v8776_v13 = vadd.f32 %v1235_v6, %v1227_v3 }
 0xa6c   :  { %8171 = vtanh.f32 %v8776_v13 }
 0xa76   :  { %v8172_v17 = vpop.eup %8171 }
 0xa77   :  { %1240 = vrot.lane.b32.xlu1 %v8172_v17, %s8435_s2 }
 0xa7b   :  { %1620 = vrot.lane.b32.xlu1 %v8725_v18, %s8436_s29 }
 0xae9   :  { %v1241_v22 = vpop.permute.xlu1 %1240 }
 0xaea   :  { %v8782_v47 = vmul.f32 %v8170_v51, %v1241_v22 }
 0xaec   :  { %v1314_v25 = vmul.f32 0.01, %v8782_v47 }
 0xaed   :  { %v8799_v19 = vpop.permute.xlu1 %1620 }
 0xaee   :  { %1316 = vrot.lane.b32.xlu0 %v1314_v25, %s8436_s29 }
 0xb60   :  { %v1317_v28 = vpop.permute.xlu0 %1316 }
 0xb61   :  { %v1392_v30 = vadd.f32 %v1391_v9, %v1317_v28 }
 0xb63   :  { %6948 = vmatmul.mubr.msk.f32.vlgmr.msra.gmra.mrb[14].mxu0 %vm111_vm1, %v1392_v30  ;;  %v1653_v30 = vrot.slane %v8725_v18, 5  ;;  %v1646_v18 = vrot.slane %v8738_v24, 1 }
 0xb64   :  { %7765 = vmatpush3.bf16.msra.mxu0 %v8650_v8  ;;  %6989 = vmatprep.mubr.msk.f32.mxu0 %vm8433_vm0, %v9783_v1 }
 0xb65   :  { %7766 = vmatprep.subr.bf16.mxu0 %v9781_v0 }
 0xb67   :  { %6990 = vmatmul.mubr.msk.f32.vlgmr.msra.gmra.mrb[16].mxu0 %vm185_vm2, %v8672_v12  ;;  %v8806_v12 = vld [vmem:[#allocation2 + $0x2] sm:$0x1] }
 0xb68   :  { %7768 = vmatpush3.bf16.msra.mxu0 %v8513_v5  ;;  %7000 = vmatprep.mubr.msk.f32.mxu0 %vm8433_vm0, %v9783_v1 }
 0xb69   :  { %7769 = vmatprep.subr.bf16.mxu0 %v9781_v0 }
 0xb6c   :  { %7771 = vmatpush3.bf16.msra.mxu0 %v8516_v7 }
 0xb6d   :  { %7772 = vmatprep.subr.bf16.mxu0 %v9781_v0 }
 0xb6f   :  { %7001 = vmatmul.mubr.msk.f32.vlgmr.msra.gmra.mrb[18].mxu0 %vm111_vm1, %v8799_v19 }
 0xb70   :  { %7774 = vmatpush3.bf16.msra.mxu0 %v8520_v11  ;;  %7007 = vmatprep.mubr.msk.f32.mxu0 %vm8433_vm0, %v9783_v1 }
 0xb71   :  { %7775 = vmatprep.subr.bf16.mxu0 %v9781_v0 }
 0xb73   :  { %7008 = vmatmul.mubr.msk.f32.vlgmr.msra.gmra.mrb[20].mxu0 %vm185_vm2, %v8806_v12 }
 0xb74   :  { %7777 = vmatpush3.bf16.msra.mxu0 %v8545_v35  ;;  %7018 = vmatprep.mubr.msk.f32.mxu0 %vm8433_vm0, %v9783_v1 }
 0xb75   :  { %7778 = vmatprep.subr.bf16.mxu0 %v9781_v0 }
 0xb78   :  { %7780 = vmatpush3.bf16.msra.mxu0 %v8548_v37 }
 0xb79   :  { %7781 = vmatprep.subr.bf16.mxu0 %v9781_v0 }
 0xc36   :  { %v1464_v33 = vpop.f32.mrb[14].mxu0 }
 0xc37   :  { %v1465_v34 = vadd.f32 %v1464_v33, %v8687_v21  ;;  %v6949_v38 = vpop.f32.mrb[15].mxu0 }
 0xc39   :  { %6983 = vmatmul.mubr.f32.vlgmr.msra.gmra.mrb[16].mxu1 %v1465_v34 }
 0xc3a   :  { %v8818_v39 = vpop.f32.mrb[16].mxu0  ;;  %7789 = vmatpush3.bf16.msra.mxu1 %v8573_v56  ;;  %7036 = vmatprep.mubr.msk.f32.mxu1 %vm8433_vm0, %v9783_v1 }
 0xc3b   :  { %9797 = vst [vmem:[#allocation15_spill] sm:$0xff] %v8818_v39  ;;  %v6991_v40 = vpop.f32.mrb[17].mxu0  ;;  %7793 = vmatprep.subr.bf16.mxu1 %v9781_v0 }
 0xc3d   :  { %7037 = vmatmul.mubr.msk.f32.vlgmr.msra.gmra.mrb[18].mxu1 %vm185_vm2, %v8806_v12 }
 0xc3e   :  { %7795 = vmatpush3.bf16.msra.mxu1 %v8607_v27  ;;  %7056 = vmatprep.mubr.msk.f32.mxu1 %vm8433_vm0, %v9783_v1 }
 0xc3f   :  { %7796 = vmatprep.subr.bf16.mxu1 %v9781_v0 }
 0xc42   :  { %v1728_v42 = vpop.f32.mrb[18].mxu0  ;;  %7798 = vmatpush3.bf16.msra.mxu1 %v8610_v29 }
 0xc43   :  { %v7002_v44 = vpop.f32.mrb[19].mxu0  ;;  %7823 = vmatprep.subr.bf16.mxu1 %v9781_v0 }
 0xc44   :  { %v1648_v44 = vrot.slane %v8747_v32, 1 }
 0xc46   :  { %v1801_v48 = vpop.f32.mrb[20].mxu0 }
 0xc47   :  { %v1802_v49 = vadd.f32 %v1801_v48, %v1728_v42  ;;  %v7009_v51 = vpop.f32.mrb[21].mxu0  ;;  %v1645_v48 = vrot.slane %v8718_v4, 1 }
 0xc49   :  { %v1805_v52 = vadd.f32 %v1802_v49, %v8534_v15  ;;  %v8863_v49 = vsel %vm879_vm5, %v1646_v18, %v1648_v44  ;;  %v8866_v51 = vsel %vm879_vm5, %v1645_v48, %v1646_v18 }
 0xc4b   :  { %8173 = vtanh.f32 %v1805_v52  ;;  %v6310_v59 = vmul.f32 -1.442695, %v1805_v52 }
 0xc4d   :  { %8175 = vpow2.f32 %v6310_v59 }
 0xc55   :  { %v8174_v55 = vpop.eup %8173 }
 0xc56   :  { %1815 = vrot.lane.b32.xlu0 %v8174_v55, %s8435_s2  ;;  %v7791_v55 = vpack.c.bf16 %v8863_v49, %v8866_v51 }
 0xc57   :  { %v8176_v60 = vpop.eup %8175 }
 0xc58   :  { %v1809_v63 = vadd.f32 1.0, %v8176_v60 }
 0xc5a   :  { %8177 = vrcp.f32 %v1809_v63 }
 0xc64   :  { %v8178_v3 = vpop.eup %8177 }
 0xc65   :  { %v1813_v22 = vmul.f32 %v8178_v3, %v8710_v62 }
 0xcc8   :  { %v1816_v6 = vpop.permute.xlu0 %1815 }
 0xcc9   :  { %v1818_v17 = vmul.f32 %v8178_v3, %v1816_v6 }
 0xccb   :  { %1820 = vrot.lane.b32.xlu1 %v1818_v17, %s8436_s29 }
 0xd0c   :  { %v8835_v9 = vpop.f32.mrb[16].mxu1 }
 0xd0d   :  { %v6984_v10 = vpop.f32.mrb[17].mxu1 }
 0xd3d   :  { %v1821_v15 = vpop.permute.xlu1 %1820 }
 0xd3e   :  { %v8838_v25 = vadd.f32 %v1821_v15, %v1813_v22 }
 0xd40   :  { %9798 = vst [vmem:[#allocation16_spill] sm:$0xff] %v8838_v25  ;;  %8179 = vtanh.f32 %v8838_v25  ;;  %1831 = vrot.lane.b32.xlu1 %v8838_v25, %s8435_s2 }
 0xd4a   :  { %v8180_v28 = vpop.eup %8179 }
 0xd4b   :  { %1826 = vrot.lane.b32.xlu0 %v8180_v28, %s8435_s2 }
 0xd4f   :  { %1835 = vrot.lane.b32.xlu0 %v8782_v47, %s8436_s29 }
 0xd53   :  { %1654 = vrot.lane.b32.xlu0 %v1653_v30, %s8436_s29 }
 0xdb2   :  { %v1832_v38 = vpop.permute.xlu1 %1831 }
 0xdbd   :  { %v1827_v33 = vpop.permute.xlu0 %1826 }
 0xdbe   :  { %v8848_v34 = vmul.f32 %v8178_v3, %v1827_v33 }
 0xdc0   :  { %v1834_v40 = vadd.f32 %v1832_v38, %v8848_v34  ;;  %v2075_v38 = vpop.f32.mrb[18].mxu1 }
 0xdc1   :  { %v1836_v42 = vpop.permute.xlu0 %1835 }
 0xdc2   :  { %1910 = vrot.lane.b32.xlu1 %v1834_v40, %s8436_s29  ;;  %7019 = vmatmul.mubr.msk.f32.vlgmr.msra.gmra.mrb[22].mxu0 %vm111_vm1, %v1836_v42  ;;  %v2076_v40 = vadd.f32 %v2075_v38, %v8592_v16  ;;  %v7038_v42 = vpop.f32.mrb[19].mxu1 }
 0xdc3   :  { %7783 = vmatpush3.bf16.msra.mxu0 %v8552_v41  ;;  %7029 = vmatprep.mubr.msk.f32.mxu0 %vm8433_vm0, %v9783_v1 }
 0xdc4   :  { %7784 = vmatprep.subr.bf16.mxu0 %v9781_v0 }
 0xdc5   :  { %v1655_v59 = vpop.permute.xlu0 %1654 }
 0xdc6   :  { %v8875_v4 = vsel %vm874_vm6, %v1648_v44, %v1655_v59 }
 0xdc7   :  { %7786 = vmatpush3.bf16.msra.mxu0 %v8558_v45 }
 0xdc8   :  { %7790 = vmatprep.subr.bf16.mxu0 %v9781_v0 }
 0xe34   :  { %v1911_v52 = vpop.permute.xlu1 %1910 }
 0xe35   :  { %7030 = vmatmul.mubr.msk.f32.vlgmr.msra.gmra.mrb[24].mxu0 %vm111_vm1, %v1911_v52 }
 0xe36   :  { %7792 = vmatpush3.bf16.msra.mxu0 %v7791_v55  ;;  %7045 = vmatprep.mubr.msk.f32.mxu0 %vm8433_vm0, %v9783_v1 }
 0xe37   :  { %7043 = vmatprep.subr.mxu0 %v9783_v1 }
 0xe3a   :  { %7044 = vmatpush3.msk.msra.mxu0 %vm549_vm3, %v8875_v4 }
 0xe3b   :  { %7799 = vmatprep.subr.bf16.mxu0 %v9781_v0  ;;  %7046 = vmatmul.mubr.msk.f32.vlgmr.msra.gmra.mrb[26].mxu0 %vm545_vm4, %v2076_v40 }
 0xe3c   :  { %7801 = vmatpush3.bf16.msra.mxu0 %v8622_v43  ;;  %7091 = vmatprep.mubr.msk.f32.mxu0 %vm8433_vm0, %v9783_v1 }
 0xe3d   :  { %7802 = vmatprep.subr.bf16.mxu0 %v9781_v0 }
 0xe40   :  { %7804 = vmatpush3.bf16.msra.mxu0 %v8625_v46 }
 0xe41   :  { %7805 = vmatprep.subr.bf16.mxu0 %v9781_v0 }
 0xe44   :  { %7807 = vmatpush3.bf16.msra.mxu0 %v8629_v50 }
 0xe45   :  { %7808 = vmatprep.subr.bf16.mxu0 %v9781_v0 }
 0xe48   :  { %7810 = vmatpush3.bf16.msra.mxu0 %v8633_v53 }
 0xe49   :  { %7811 = vmatprep.subr.bf16.mxu0 %v9781_v0 }
 0xe4c   :  { %7813 = vmatpush3.bf16.msra.mxu0 %v8637_v58 }
 0xe4d   :  { %7814 = vmatprep.subr.bf16.mxu0 %v9781_v0 }
 0xe50   :  { %7816 = vmatpush3.bf16.msra.mxu0 %v8641_v61 }
 0xe51   :  { %7817 = vmatprep.subr.bf16.mxu0 %v9781_v0 }
 0xe54   :  { %7819 = vmatpush3.bf16.msra.mxu0 %v8645_v2 }
 0xe55   :  { %7820 = vmatprep.subr.bf16.mxu0 %v9781_v0 }
 0xe58   :  { %7822 = vmatpush3.bf16.msra.mxu0 %v8683_v20 }
 0xe59   :  { %7847 = vmatprep.subr.bf16.mxu0 %v9781_v0 }
 0xe95   :  { %v1905_v24 = vpop.f32.mrb[22].mxu0 }
 0xe96   :  { %v7020_v32 = vpop.f32.mrb[23].mxu0 }
 0xf08   :  { %v1980_v60 = vpop.f32.mrb[24].mxu0 }
 0xf09   :  { %v1981_v63 = vadd.f32 %v1980_v60, %v1905_v24  ;;  %v7031_v3 = vpop.f32.mrb[25].mxu0 }
 0xf0b   :  { %v1984_v6 = vadd.f32 %v1981_v63, %v8581_v57 }
 0xf0d   :  { %8181 = vtanh.f32 %v1984_v6  ;;  %v6313_v10 = vmul.f32 -1.442695, %v1984_v6 }
 0xf0e   :  { %v2156_v55 = vpop.f32.mrb[26].mxu0 }
 0xf0f   :  { %8183 = vpow2.f32 %v6313_v10  ;;  %v7047_v59 = vpop.f32.mrb[27].mxu0 }
 0xf17   :  { %v8182_v17 = vpop.eup %8181 }
 0xf18   :  { %1994 = vrot.lane.b32.xlu1 %v8182_v17, %s8435_s2 }
 0xf19   :  { %v8184_v22 = vpop.eup %8183 }
 0xf1a   :  { %v1988_v15 = vadd.f32 1.0, %v8184_v22 }
 0xf1c   :  { %8185 = vrcp.f32 %v1988_v15 }
 0xf26   :  { %v8186_v28 = vpop.eup %8185 }
 0xf27   :  { %v1992_v18 = vmul.f32 %v8186_v28, %v8776_v13 }
 0xf8a   :  { %v1995_v30 = vpop.permute.xlu1 %1994 }
 0xf8b   :  { %v1997_v33 = vmul.f32 %v8186_v28, %v1995_v30 }
 0xf8d   :  { %1999 = vrot.lane.b32.xlu0 %v1997_v33, %s8436_s29 }
 0xfff   :  { %v2000_v44 = vpop.permute.xlu0 %1999 }
0x1000   :  { %v8904_v48 = vadd.f32 %v2000_v44, %v1992_v18  ;;  %v8960_v18 = vld [vmem:[#allocation7 + $0x30] sm:$0x1] }
0x1002   :  { %8187 = vtanh.f32 %v8904_v48 }
0x100c   :  { %v8188_v52 = vpop.eup %8187 }
0x100d   :  { %2005 = vrot.lane.b32.xlu1 %v8188_v52, %s8435_s2 }
0x1011   :  { %2385 = vrot.lane.b32.xlu1 %v8848_v34, %s8436_s29 }
0x107f   :  { %v2006_v24 = vpop.permute.xlu1 %2005 }
0x1080   :  { %v8910_v32 = vmul.f32 %v8186_v28, %v2006_v24 }
0x1082   :  { %v2079_v60 = vmul.f32 0.01, %v8910_v32 }
0x1083   :  { %v8927_v6 = vpop.permute.xlu1 %2385 }
0x1084   :  { %2081 = vrot.lane.b32.xlu0 %v2079_v60, %s8436_s29  ;;  %9799 = vst [vmem:[#allocation17_spill] sm:$0xff] %v8927_v6 }
0x10f6   :  { %v2082_v63 = vpop.permute.xlu0 %2081 }
0x10f7   :  { %v2157_v3 = vadd.f32 %v2156_v55, %v2082_v63 }
0x10f9   :  { %7057 = vmatmul.mubr.msk.f32.vlgmr.msra.gmra.mrb[20].mxu1 %vm111_vm1, %v2157_v3 }
0x10fa   :  { %7825 = vmatpush3.bf16.msra.mxu1 %v8650_v8  ;;  %7098 = vmatprep.mubr.msk.f32.mxu1 %vm8433_vm0, %v9783_v1 }
0x10fb   :  { %7826 = vmatprep.subr.bf16.mxu1 %v9781_v0 }
0x10fd   :  { %7099 = vmatmul.mubr.msk.f32.vlgmr.msra.gmra.mrb[22].mxu1 %vm185_vm2, %v8806_v12  ;;  %v8934_v12 = vld [vmem:[#allocation2 + $0x3] sm:$0x1] }
0x10fe   :  { %7828 = vmatpush3.bf16.msra.mxu1 %v8513_v5  ;;  %7109 = vmatprep.mubr.msk.f32.mxu1 %vm8433_vm0, %v9783_v1 }
0x10ff   :  { %7829 = vmatprep.subr.bf16.mxu1 %v9781_v0 }
0x1102   :  { %7831 = vmatpush3.bf16.msra.mxu1 %v8516_v7 }
0x1103   :  { %7832 = vmatprep.subr.bf16.mxu1 %v9781_v0 }
0x1105   :  { %7110 = vmatmul.mubr.msk.f32.vlgmr.msra.gmra.mrb[24].mxu1 %vm111_vm1, %v8927_v6 }
0x1106   :  { %7834 = vmatpush3.bf16.msra.mxu1 %v8520_v11  ;;  %7116 = vmatprep.mubr.msk.f32.mxu1 %vm8433_vm0, %v9783_v1 }
0x1107   :  { %7835 = vmatprep.subr.bf16.mxu1 %v9781_v0 }
0x1109   :  { %7117 = vmatmul.mubr.msk.f32.vlgmr.msra.gmra.mrb[26].mxu1 %vm185_vm2, %v8934_v12 }
0x110a   :  { %7837 = vmatpush3.bf16.msra.mxu1 %v8545_v35  ;;  %7127 = vmatprep.mubr.msk.f32.mxu1 %vm8433_vm0, %v9783_v1 }
0x110b   :  { %7838 = vmatprep.subr.bf16.mxu1 %v9781_v0 }
0x110e   :  { %7840 = vmatpush3.bf16.msra.mxu1 %v8548_v37 }
0x110f   :  { %7841 = vmatprep.subr.bf16.mxu1 %v9781_v0 }
0x11cc   :  { %v2229_v17 = vpop.f32.mrb[20].mxu1 }
0x11cd   :  { %v2230_v10 = vadd.f32 %v2229_v17, %v8687_v21  ;;  %v7058_v22 = vpop.f32.mrb[21].mxu1 }
0x11cf   :  { %7092 = vmatmul.mubr.f32.vlgmr.msra.gmra.mrb[28].mxu0 %v2230_v10 }
0x11d0   :  { %v8946_v15 = vpop.f32.mrb[22].mxu1  ;;  %7849 = vmatpush3.bf16.msra.mxu0 %v8573_v56  ;;  %7145 = vmatprep.mubr.msk.f32.mxu0 %vm8433_vm0, %v9783_v1 }
0x11d1   :  { %9800 = vst [vmem:[#allocation18_spill] sm:$0xff] %v8946_v15  ;;  %v7100_v28 = vpop.f32.mrb[23].mxu1  ;;  %7853 = vmatprep.subr.bf16.mxu0 %v9781_v0 }
0x11d3   :  { %7146 = vmatmul.mubr.msk.f32.vlgmr.msra.gmra.mrb[30].mxu0 %vm185_vm2, %v8934_v12 }
0x11d4   :  { %7855 = vmatpush3.bf16.msra.mxu0 %v8607_v27  ;;  %7165 = vmatprep.mubr.msk.f32.mxu0 %vm8433_vm0, %v9783_v1 }
0x11d5   :  { %7856 = vmatprep.subr.bf16.mxu0 %v9781_v0 }
0x11d8   :  { %v2493_v30 = vpop.f32.mrb[24].mxu1  ;;  %7858 = vmatpush3.bf16.msra.mxu0 %v8610_v29 }
0x11d9   :  { %v7111_v33 = vpop.f32.mrb[25].mxu1  ;;  %7883 = vmatprep.subr.bf16.mxu0 %v9781_v0 }
0x11dc   :  { %v2566_v38 = vpop.f32.mrb[26].mxu1 }
0x11dd   :  { %v2567_v40 = vadd.f32 %v2566_v38, %v2493_v30  ;;  %v7118_v42 = vpop.f32.mrb[27].mxu1  ;;  %v2418_v38 = vrot.slane %v8848_v34, 5  ;;  %v2413_v34 = vrot.slane %v8875_v4, 1 }
0x11df   :  { %v2570_v44 = vadd.f32 %v8960_v18, %v2567_v40 }
0x11e1   :  { %8189 = vtanh.f32 %v2570_v44  ;;  %v6321_v55 = vmul.f32 -1.442695, %v2570_v44 }
0x11e3   :  { %8191 = vpow2.f32 %v6321_v55 }
0x11eb   :  { %v8190_v52 = vpop.eup %8189 }
0x11ec   :  { %2580 = vrot.lane.b32.xlu0 %v8190_v52, %s8435_s2 }
0x11ed   :  { %v8192_v59 = vpop.eup %8191 }
0x11ee   :  { %v2574_v24 = vadd.f32 1.0, %v8192_v59  ;;  %v2411_v59 = vrot.slane %v8863_v49, 1 }
0x11f0   :  { %8193 = vrcp.f32 %v2574_v24  ;;  %v2410_v24 = vrot.slane %v8866_v51, 1 }
0x11fa   :  { %v8194_v60 = vpop.eup %8193 }
0x11fb   :  { %v2578_v22 = vmul.f32 %v8194_v60, %v8838_v25 }
0x125e   :  { %v2581_v63 = vpop.permute.xlu0 %2580 }
0x125f   :  { %v2583_v3 = vmul.f32 %v8194_v60, %v2581_v63  ;;  %v8996_v63 = vsel %vm879_vm5, %v2410_v24, %v2411_v59 }
0x1261   :  { %2585 = vrot.lane.b32.xlu1 %v2583_v3, %s8436_s29 }
0x12a2   :  { %v8965_v17 = vpop.f32.mrb[28].mxu0 }
0x12a3   :  { %v7093_v10 = vpop.f32.mrb[29].mxu0 }
0x12d3   :  { %v2586_v28 = vpop.permute.xlu1 %2585 }
0x12d4   :  { %v8968_v30 = vadd.f32 %v2586_v28, %v2578_v22 }
0x12d6   :  { %9801 = vst [vmem:[#allocation19_spill] sm:$0xff] %v8968_v30  ;;  %8195 = vtanh.f32 %v8968_v30  ;;  %2596 = vrot.lane.b32.xlu1 %v8968_v30, %s8435_s2 }
0x12e0   :  { %v8196_v33 = vpop.eup %8195 }
0x12e1   :  { %2591 = vrot.lane.b32.xlu0 %v8196_v33, %s8435_s2 }
0x12e5   :  { %2600 = vrot.lane.b32.xlu0 %v8910_v32, %s8436_s29 }
0x12e9   :  { %2419 = vrot.lane.b32.xlu0 %v2418_v38, %s8436_s29 }
0x1348   :  { %v2597_v44 = vpop.permute.xlu1 %2596 }
0x1353   :  { %v2592_v40 = vpop.permute.xlu0 %2591 }
0x1354   :  { %v8978_v42 = vmul.f32 %v8194_v60, %v2592_v40  ;;  %v8993_v60 = vsel %vm879_vm5, %v2411_v59, %v2413_v34 }
0x1355   :  { %v7851_v10 = vpack.c.bf16 %v8993_v60, %v8996_v63 }
0x1356   :  { %v2599_v52 = vadd.f32 %v2597_v44, %v8978_v42 }
0x1357   :  { %v2601_v55 = vpop.permute.xlu0 %2600 }
0x1358   :  { %2675 = vrot.lane.b32.xlu1 %v2599_v52, %s8436_s29  ;;  %7128 = vmatmul.mubr.msk.f32.vlgmr.msra.gmra.mrb[28].mxu1 %vm111_vm1, %v2601_v55 }
0x1359   :  { %7843 = vmatpush3.bf16.msra.mxu1 %v8552_v41  ;;  %7138 = vmatprep.mubr.msk.f32.mxu1 %vm8433_vm0, %v9783_v1 }
0x135a   :  { %7844 = vmatprep.subr.bf16.mxu1 %v9781_v0 }
0x135b   :  { %v2420_v22 = vpop.permute.xlu0 %2419 }
0x135c   :  { %v9005_v49 = vsel %vm874_vm6, %v2413_v34, %v2420_v22 }
0x135d   :  { %7846 = vmatpush3.bf16.msra.mxu1 %v8558_v45 }
0x135e   :  { %7850 = vmatprep.subr.bf16.mxu1 %v9781_v0 }
0x13ca   :  { %v2676_v3 = vpop.permute.xlu1 %2675 }
0x13cb   :  { %7139 = vmatmul.mubr.msk.f32.vlgmr.msra.gmra.mrb[30].mxu1 %vm111_vm1, %v2676_v3 }
0x13cc   :  { %7852 = vmatpush3.bf16.msra.mxu1 %v7851_v10  ;;  %7154 = vmatprep.mubr.msk.f32.mxu1 %vm8433_vm0, %v9783_v1  ;;  %v2840_v10 = vpop.f32.mrb[30].mxu0 }
0x13cd   :  { %7152 = vmatprep.subr.mxu1 %v9783_v1  ;;  %v2841_v22 = vadd.f32 %v2840_v10, %v8592_v16 }
0x13d0   :  { %7153 = vmatpush3.msk.msra.mxu1 %vm549_vm3, %v9005_v49 }
0x13d1   :  { %7859 = vmatprep.subr.bf16.mxu1 %v9781_v0  ;;  %7155 = vmatmul.mubr.msk.f32.vlgmr.msra.gmra.mrb[32].mxu1 %vm545_vm4, %v2841_v22 }
0x13d2   :  { %7861 = vmatpush3.bf16.msra.mxu1 %v8622_v43  ;;  %7200 = vmatprep.mubr.msk.f32.mxu1 %vm8433_vm0, %v9783_v1 }
0x13d3   :  { %7862 = vmatprep.subr.bf16.mxu1 %v9781_v0 }
0x13d6   :  { %7864 = vmatpush3.bf16.msra.mxu1 %v8625_v46 }
0x13d7   :  { %7865 = vmatprep.subr.bf16.mxu1 %v9781_v0 }
0x13da   :  { %7867 = vmatpush3.bf16.msra.mxu1 %v8629_v50 }
0x13db   :  { %7868 = vmatprep.subr.bf16.mxu1 %v9781_v0 }
0x13de   :  { %7870 = vmatpush3.bf16.msra.mxu1 %v8633_v53 }
0x13df   :  { %7871 = vmatprep.subr.bf16.mxu1 %v9781_v0 }
0x13e2   :  { %7873 = vmatpush3.bf16.msra.mxu1 %v8637_v58 }
0x13e3   :  { %7874 = vmatprep.subr.bf16.mxu1 %v9781_v0 }
0x13e6   :  { %7876 = vmatpush3.bf16.msra.mxu1 %v8641_v61 }
0x13e7   :  { %7877 = vmatprep.subr.bf16.mxu1 %v9781_v0 }
0x13ea   :  { %7879 = vmatpush3.bf16.msra.mxu1 %v8645_v2 }
0x13eb   :  { %7880 = vmatprep.subr.bf16.mxu1 %v9781_v0 }
0x13ee   :  { %7882 = vmatpush3.bf16.msra.mxu1 %v8683_v20 }
0x13ef   :  { %7907 = vmatprep.subr.bf16.mxu1 %v9781_v0 }
0x142b   :  { %v2670_v51 = vpop.f32.mrb[28].mxu1 }
0x142c   :  { %v7129_v4 = vpop.f32.mrb[29].mxu1 }
0x149e   :  { %v2745_v28 = vpop.f32.mrb[30].mxu1 }
0x149f   :  { %v2746_v33 = vadd.f32 %v2745_v28, %v2670_v51  ;;  %v7140_v38 = vpop.f32.mrb[31].mxu1  ;;  %v7147_v51 = vpop.f32.mrb[31].mxu0 }
0x14a1   :  { %v2749_v40 = vadd.f32 %v2746_v33, %v8581_v57 }
0x14a3   :  { %8197 = vtanh.f32 %v2749_v40  ;;  %v6324_v52 = vmul.f32 -1.442695, %v2749_v40 }
0x14a4   :  { %v2921_v33 = vpop.f32.mrb[32].mxu1 }
0x14a5   :  { %8199 = vpow2.f32 %v6324_v52  ;;  %v7156_v38 = vpop.f32.mrb[33].mxu1 }
0x14ad   :  { %v8198_v44 = vpop.eup %8197 }
0x14ae   :  { %2759 = vrot.lane.b32.xlu1 %v8198_v44, %s8435_s2 }
0x14af   :  { %v8200_v55 = vpop.eup %8199 }
0x14b0   :  { %v2753_v34 = vadd.f32 1.0, %v8200_v55 }
0x14b2   :  { %8201 = vrcp.f32 %v2753_v34 }
0x14bc   :  { %v8202_v59 = vpop.eup %8201 }
0x14bd   :  { %v2757_v57 = vmul.f32 %v8202_v59, %v8904_v48 }
0x1520   :  { %v2760_v24 = vpop.permute.xlu1 %2759 }
0x1521   :  { %v2762_v3 = vmul.f32 %v8202_v59, %v2760_v24 }
0x1523   :  { %2764 = vrot.lane.b32.xlu0 %v2762_v3, %s8436_s29 }
0x1595   :  { %v2765_v16 = vpop.permute.xlu0 %2764 }
0x1596   :  { %v9034_v4 = vadd.f32 %v2765_v16, %v2757_v57 }
0x1598   :  { %8203 = vtanh.f32 %v9034_v4 }
0x15a2   :  { %v8204_v28 = vpop.eup %8203 }
0x15a3   :  { %2770 = vrot.lane.b32.xlu1 %v8204_v28, %s8435_s2 }
0x15a7   :  { %3150 = vrot.lane.b32.xlu1 %v8978_v42, %s8436_s29 }
0x1615   :  { %v2771_v40 = vpop.permute.xlu1 %2770 }
0x1616   :  { %v9040_v44 = vmul.f32 %v8202_v59, %v2771_v40 }
0x1618   :  { %v2844_v52 = vmul.f32 0.01, %v9040_v44 }
0x1619   :  { %v9057_v59 = vpop.permute.xlu1 %3150 }
0x161a   :  { %2846 = vrot.lane.b32.xlu0 %v2844_v52, %s8436_s29  ;;  %9802 = vst [vmem:[#allocation20_spill] sm:$0xff] %v9057_v59 }
0x168c   :  { %v2847_v55 = vpop.permute.xlu0 %2846 }
0x168d   :  { %v2922_v34 = vadd.f32 %v2921_v33, %v2847_v55 }
0x168f   :  { %7166 = vmatmul.mubr.msk.f32.vlgmr.msra.gmra.mrb[32].mxu0 %vm111_vm1, %v2922_v34 }
0x1690   :  { %7885 = vmatpush3.bf16.msra.mxu0 %v8650_v8  ;;  %7207 = vmatprep.mubr.msk.f32.mxu0 %vm8433_vm0, %v9783_v1 }
0x1691   :  { %7886 = vmatprep.subr.bf16.mxu0 %v9781_v0 }
0x1693   :  { %7208 = vmatmul.mubr.msk.f32.vlgmr.msra.gmra.mrb[34].mxu0 %vm185_vm2, %v8934_v12  ;;  %v9064_v12 = vld [vmem:[#allocation2 + $0x4] sm:$0x1] }
0x1694   :  { %7888 = vmatpush3.bf16.msra.mxu0 %v8513_v5  ;;  %7218 = vmatprep.mubr.msk.f32.mxu0 %vm8433_vm0, %v9783_v1 }
0x1695   :  { %7889 = vmatprep.subr.bf16.mxu0 %v9781_v0 }
0x1698   :  { %7891 = vmatpush3.bf16.msra.mxu0 %v8516_v7 }
0x1699   :  { %7892 = vmatprep.subr.bf16.mxu0 %v9781_v0 }
0x169b   :  { %7219 = vmatmul.mubr.msk.f32.vlgmr.msra.gmra.mrb[36].mxu0 %vm111_vm1, %v9057_v59 }
0x169c   :  { %7894 = vmatpush3.bf16.msra.mxu0 %v8520_v11  ;;  %7225 = vmatprep.mubr.msk.f32.mxu0 %vm8433_vm0, %v9783_v1 }
0x169d   :  { %7895 = vmatprep.subr.bf16.mxu0 %v9781_v0 }
0x169f   :  { %7226 = vmatmul.mubr.msk.f32.vlgmr.msra.gmra.mrb[38].mxu0 %vm185_vm2, %v9064_v12 }
0x16a0   :  { %7897 = vmatpush3.bf16.msra.mxu0 %v8545_v35  ;;  %7236 = vmatprep.mubr.msk.f32.mxu0 %vm8433_vm0, %v9783_v1 }
0x16a1   :  { %7898 = vmatprep.subr.bf16.mxu0 %v9781_v0 }
0x16a4   :  { %7900 = vmatpush3.bf16.msra.mxu0 %v8548_v37 }
0x16a5   :  { %7901 = vmatprep.subr.bf16.mxu0 %v9781_v0 }
0x1762   :  { %v2994_v24 = vpop.f32.mrb[32].mxu0 }
0x1763   :  { %v2995_v3 = vadd.f32 %v2994_v24, %v8687_v21  ;;  %v7167_v10 = vpop.f32.mrb[33].mxu0 }
0x1765   :  { %7201 = vmatmul.mubr.f32.vlgmr.msra.gmra.mrb[34].mxu1 %v2995_v3 }
0x1766   :  { %v9076_v22 = vpop.f32.mrb[34].mxu0  ;;  %7909 = vmatpush3.bf16.msra.mxu1 %v8573_v56  ;;  %7254 = vmatprep.mubr.msk.f32.mxu1 %vm8433_vm0, %v9783_v1 }
0x1767   :  { %9803 = vst [vmem:[#allocation21_spill] sm:$0xff] %v9076_v22  ;;  %v7209_v51 = vpop.f32.mrb[35].mxu0  ;;  %7913 = vmatprep.subr.bf16.mxu1 %v9781_v0 }
0x1769   :  { %7255 = vmatmul.mubr.msk.f32.vlgmr.msra.gmra.mrb[36].mxu1 %vm185_vm2, %v9064_v12 }
0x176a   :  { %7915 = vmatpush3.bf16.msra.mxu1 %v8607_v27  ;;  %7274 = vmatprep.mubr.msk.f32.mxu1 %vm8433_vm0, %v9783_v1 }
0x176b   :  { %7916 = vmatprep.subr.bf16.mxu1 %v9781_v0 }
0x176e   :  { %v3258_v21 = vpop.f32.mrb[36].mxu0  ;;  %7918 = vmatpush3.bf16.msra.mxu1 %v8610_v29 }
0x176f   :  { %v7220_v57 = vpop.f32.mrb[37].mxu0  ;;  %7943 = vmatprep.subr.bf16.mxu1 %v9781_v0 }
0x1772   :  { %v3331_v16 = vpop.f32.mrb[38].mxu0 }
0x1773   :  { %v3332_v28 = vadd.f32 %v3331_v16, %v3258_v21  ;;  %v7227_v33 = vpop.f32.mrb[39].mxu0 }
0x1775   :  { %v3335_v38 = vadd.f32 %v8960_v18, %v3332_v28 }
0x1777   :  { %8205 = vtanh.f32 %v3335_v38  ;;  %v6332_v52 = vmul.f32 -1.442695, %v3335_v38  ;;  %v3183_v38 = vrot.slane %v8978_v42, 5  ;;  %v3178_v42 = vrot.slane %v9005_v49, 1 }
0x1779   :  { %8207 = vpow2.f32 %v6332_v52 }
0x1781   :  { %v8206_v40 = vpop.eup %8205 }
0x1782   :  { %3345 = vrot.lane.b32.xlu0 %v8206_v40, %s8435_s2 }
0x1783   :  { %v8208_v55 = vpop.eup %8207 }
0x1784   :  { %v3339_v34 = vadd.f32 1.0, %v8208_v55 }
0x1786   :  { %8209 = vrcp.f32 %v3339_v34 }
0x1790   :  { %v8210_v24 = vpop.eup %8209 }
0x1791   :  { %v3343_v57 = vmul.f32 %v8210_v24, %v8968_v30 }
0x17f4   :  { %v3346_v3 = vpop.permute.xlu0 %3345 }
0x17f5   :  { %v3348_v10 = vmul.f32 %v8210_v24, %v3346_v3 }
0x17f7   :  { %3350 = vrot.lane.b32.xlu1 %v3348_v10, %s8436_s29 }
0x1838   :  { %v9093_v51 = vpop.f32.mrb[34].mxu1 }
0x1839   :  { %v7202_v21 = vpop.f32.mrb[35].mxu1 }
0x183a   :  { %v3175_v21 = vrot.slane %v8996_v63, 1 }
0x1869   :  { %v3351_v16 = vpop.permute.xlu1 %3350 }
0x186a   :  { %v9096_v28 = vadd.f32 %v3351_v16, %v3343_v57 }
0x186c   :  { %9804 = vst [vmem:[#allocation22_spill] sm:$0xff] %v9096_v28  ;;  %8211 = vtanh.f32 %v9096_v28  ;;  %3361 = vrot.lane.b32.xlu1 %v9096_v28, %s8435_s2 }
0x1876   :  { %v8212_v33 = vpop.eup %8211 }
0x1877   :  { %3356 = vrot.lane.b32.xlu0 %v8212_v33, %s8435_s2 }
0x187b   :  { %3365 = vrot.lane.b32.xlu0 %v9040_v44, %s8436_s29 }
0x187f   :  { %3184 = vrot.lane.b32.xlu0 %v3183_v38, %s8436_s29 }
0x18de   :  { %v3362_v55 = vpop.permute.xlu1 %3361 }
0x18e9   :  { %v3357_v40 = vpop.permute.xlu0 %3356 }
0x18ea   :  { %v9106_v52 = vmul.f32 %v8210_v24, %v3357_v40  ;;  %v3176_v24 = vrot.slane %v8993_v60, 1 }
0x18ec   :  { %v3364_v34 = vadd.f32 %v3362_v55, %v9106_v52  ;;  %v9120_v10 = vsel %vm879_vm5, %v3176_v24, %v3178_v42  ;;  %v9124_v57 = vsel %vm879_vm5, %v3175_v21, %v3176_v24 }
0x18ed   :  { %v3366_v3 = vpop.permute.xlu0 %3365  ;;  %v7911_v33 = vpack.c.bf16 %v9120_v10, %v9124_v57 }
0x18ee   :  { %3440 = vrot.lane.b32.xlu1 %v3364_v34, %s8436_s29  ;;  %7237 = vmatmul.mubr.msk.f32.vlgmr.msra.gmra.mrb[40].mxu0 %vm111_vm1, %v3366_v3  ;;  %v9138_v3 = vld [vmem:[#allocation7 + $0x78] sm:$0x1] }
0x18ef   :  { %7903 = vmatpush3.bf16.msra.mxu0 %v8552_v41  ;;  %7247 = vmatprep.mubr.msk.f32.mxu0 %vm8433_vm0, %v9783_v1 }
0x18f0   :  { %7904 = vmatprep.subr.bf16.mxu0 %v9781_v0 }
0x18f1   :  { %v3185_v38 = vpop.permute.xlu0 %3184 }
0x18f2   :  { %v9133_v60 = vsel %vm874_vm6, %v3178_v42, %v3185_v38 }
0x18f3   :  { %7906 = vmatpush3.bf16.msra.mxu0 %v8558_v45 }
0x18f4   :  { %7910 = vmatprep.subr.bf16.mxu0 %v9781_v0 }
0x1960   :  { %v3441_v16 = vpop.permute.xlu1 %3440 }
0x1961   :  { %7248 = vmatmul.mubr.msk.f32.vlgmr.msra.gmra.mrb[42].mxu0 %vm111_vm1, %v3441_v16 }
0x1962   :  { %7912 = vmatpush3.bf16.msra.mxu0 %v7911_v33  ;;  %7263 = vmatprep.mubr.msk.f32.mxu0 %vm8433_vm0, %v9783_v1 }
0x1963   :  { %7261 = vmatprep.subr.mxu0 %v9783_v1 }
0x1966   :  { %7262 = vmatpush3.msk.msra.mxu0 %vm549_vm3, %v9133_v60 }
0x1967   :  { %7919 = vmatprep.subr.bf16.mxu0 %v9781_v0 }
0x19c1   :  { %v3435_v63 = vpop.f32.mrb[40].mxu0 }
0x19c2   :  { %v7238_v49 = vpop.f32.mrb[41].mxu0 }
0x19c3   :  { %v9143_v49 = vld [vmem:[#allocation7 + $0x158] sm:$0x1] }
0x1a34   :  { %v3510_v40 = vpop.f32.mrb[42].mxu0 }
0x1a35   :  { %v3511_v55 = vadd.f32 %v3510_v40, %v3435_v63  ;;  %v7249_v34 = vpop.f32.mrb[43].mxu0  ;;  %v3605_v63 = vpop.f32.mrb[36].mxu1 }
0x1a36   :  { %v3606_v40 = vadd.f32 %v9143_v49, %v3605_v63  ;;  %v9805_v34 = vmov 0.0  }
0x1a37   :  { %v3514_v24 = vadd.f32 %v9138_v3, %v3511_v55  ;;  %v7256_v55 = vpop.f32.mrb[37].mxu1 }
0x1a38   :  { %7264 = vmatmul.mubr.msk.f32.vlgmr.msra.gmra.mrb[44].mxu0 %vm545_vm4, %v3606_v40 }
0x1a39   :  { %8213 = vtanh.f32 %v3514_v24  ;;  %v6335_v42 = vmul.f32 -1.442695, %v3514_v24  ;;  %7921 = vmatpush3.bf16.msra.mxu0 %v8622_v43  ;;  %7309 = vmatprep.mubr.msk.f32.mxu0 %vm8433_vm0, %v9805_v34  ;;  %v9806_v24 = vmov 0.0|0.0  }
0x1a3a   :  { %7922 = vmatprep.subr.bf16.mxu0 %v9806_v24 }
0x1a3b   :  { %8215 = vpow2.f32 %v6335_v42 }
0x1a3d   :  { %7924 = vmatpush3.bf16.msra.mxu0 %v8625_v46 }
0x1a3e   :  { %7925 = vmatprep.subr.bf16.mxu0 %v9806_v24 }
0x1a41   :  { %7927 = vmatpush3.bf16.msra.mxu0 %v8629_v50 }
0x1a42   :  { %7928 = vmatprep.subr.bf16.mxu0 %v9806_v24 }
0x1a43   :  { %v8214_v21 = vpop.eup %8213 }
0x1a44   :  { %3524 = vrot.lane.b32.xlu1 %v8214_v21, %s8435_s2 }
0x1a45   :  { %v8216_v16 = vpop.eup %8215  ;;  %7930 = vmatpush3.bf16.msra.mxu0 %v8633_v53 }
0x1a46   :  { %v3518_v33 = vadd.f32 1.0, %v8216_v16  ;;  %7931 = vmatprep.subr.bf16.mxu0 %v9806_v24 }
0x1a48   :  { %8217 = vrcp.f32 %v3518_v33 }
0x1a49   :  { %7933 = vmatpush3.bf16.msra.mxu0 %v8637_v58 }
0x1a4a   :  { %7934 = vmatprep.subr.bf16.mxu0 %v9806_v24 }
0x1a4d   :  { %7936 = vmatpush3.bf16.msra.mxu0 %v8641_v61 }
0x1a4e   :  { %7937 = vmatprep.subr.bf16.mxu0 %v9806_v24 }
0x1a51   :  { %7939 = vmatpush3.bf16.msra.mxu0 %v8645_v2 }
0x1a52   :  { %v8218_v38 = vpop.eup %8217  ;;  %7940 = vmatprep.subr.bf16.mxu0 %v9806_v24 }
0x1a55   :  { %7942 = vmatpush3.bf16.msra.mxu0 %v8683_v20 }
0x1a56   :  { %7967 = vmatprep.subr.bf16.mxu0 %v9806_v24 }
0x1ab6   :  { %v3525_v0 = vpop.permute.xlu1 %3524 }
0x1ab7   :  { %v3527_v1 = vmul.f32 %v8218_v38, %v3525_v0  ;;  %v3522_v0 = vmul.f32 %v8218_v38, %v9034_v4 }
0x1ab9   :  { %3529 = vrot.lane.b32.xlu0 %v3527_v1, %s8436_s29 }
0x1b0b   :  { %v3686_v16 = vpop.f32.mrb[44].mxu0 }
0x1b0c   :  { %v7265_v33 = vpop.f32.mrb[45].mxu0 }
0x1b2b   :  { %v3530_v1 = vpop.permute.xlu0 %3529 }
0x1b2c   :  { %v9166_v21 = vadd.f32 %v3530_v1, %v3522_v0  ;;  %v9207_v1 = vld [vmem:[#allocation7 + $0xa0] sm:$0x1] }
0x1b2e   :  { %9807 = vst [vmem:[#allocation23_spill] sm:$0xff] %v9166_v21  ;;  %8219 = vtanh.f32 %v9166_v21 }
0x1b38   :  { %v8220_v42 = vpop.eup %8219 }
0x1b39   :  { %3535 = vrot.lane.b32.xlu1 %v8220_v42, %s8435_s2 }
0x1b3d   :  { %3915 = vrot.lane.b32.xlu1 %v9106_v52, %s8436_s29 }
0x1bab   :  { %v3536_v63 = vpop.permute.xlu1 %3535 }
0x1bac   :  { %v9172_v40 = vmul.f32 %v8218_v38, %v3536_v63 }
0x1bae   :  { %9808 = vst [vmem:[#allocation24_spill] sm:$0xff] %v9172_v40  ;;  %v3609_v55 = vmul.f32 0.01, %v9172_v40 }
0x1bb0   :  { %3611 = vrot.lane.b32.xlu0 %v3609_v55, %s8436_s29 }
0x1c22   :  { %v3612_v22 = vpop.permute.xlu0 %3611 }
0x1c23   :  { %v3687_v0 = vadd.f32 %v3686_v16, %v3612_v22  ;;  %v9189_v22 = vpop.permute.xlu1 %3915 }
0x1c24   :  { %9809 = vst [vmem:[#allocation25_spill] sm:$0xff] %v9189_v22 }
0x1c25   :  { %7275 = vmatmul.mubr.msk.f32.vlgmr.msra.gmra.mrb[38].mxu1 %vm111_vm1, %v3687_v0 }
0x1c26   :  { %7945 = vmatpush3.bf16.msra.mxu1 %v8650_v8  ;;  %7316 = vmatprep.mubr.msk.f32.mxu1 %vm8433_vm0, %v9805_v34 }
0x1c27   :  { %7946 = vmatprep.subr.bf16.mxu1 %v9806_v24 }
0x1c29   :  { %7317 = vmatmul.mubr.msk.f32.vlgmr.msra.gmra.mrb[40].mxu1 %vm185_vm2, %v9064_v12  ;;  %v9196_v12 = vld [vmem:[#allocation2 + $0x5] sm:$0x1] }
0x1c2a   :  { %7948 = vmatpush3.bf16.msra.mxu1 %v8513_v5  ;;  %7327 = vmatprep.mubr.msk.f32.mxu1 %vm8433_vm0, %v9805_v34 }
0x1c2b   :  { %7949 = vmatprep.subr.bf16.mxu1 %v9806_v24 }
0x1c2e   :  { %7951 = vmatpush3.bf16.msra.mxu1 %v8516_v7 }
0x1c2f   :  { %7952 = vmatprep.subr.bf16.mxu1 %v9806_v24 }
0x1c31   :  { %7328 = vmatmul.mubr.msk.f32.vlgmr.msra.gmra.mrb[42].mxu1 %vm111_vm1, %v9189_v22 }
0x1c32   :  { %7954 = vmatpush3.bf16.msra.mxu1 %v8520_v11  ;;  %7334 = vmatprep.mubr.msk.f32.mxu1 %vm8433_vm0, %v9805_v34 }
0x1c33   :  { %7955 = vmatprep.subr.bf16.mxu1 %v9806_v24 }
0x1c35   :  { %7335 = vmatmul.mubr.msk.f32.vlgmr.msra.gmra.mrb[44].mxu1 %vm185_vm2, %v9196_v12 }
0x1c36   :  { %7957 = vmatpush3.bf16.msra.mxu1 %v8545_v35  ;;  %7345 = vmatprep.mubr.msk.f32.mxu1 %vm8433_vm0, %v9805_v34 }
0x1c37   :  { %7958 = vmatprep.subr.bf16.mxu1 %v9806_v24 }
0x1c3a   :  { %7960 = vmatpush3.bf16.msra.mxu1 %v8548_v37 }
0x1c3b   :  { %7961 = vmatprep.subr.bf16.mxu1 %v9806_v24 }
0x1cf8   :  { %v3759_v38 = vpop.f32.mrb[38].mxu1 }
0x1cf9   :  { %v3760_v42 = vadd.f32 %v9207_v1, %v3759_v38  ;;  %v7276_v16 = vpop.f32.mrb[39].mxu1 }
0x1cfb   :  { %7310 = vmatmul.mubr.f32.vlgmr.msra.gmra.mrb[46].mxu0 %v3760_v42 }
0x1cfc   :  { %v9210_v33 = vpop.f32.mrb[40].mxu1  ;;  %7969 = vmatpush3.bf16.msra.mxu0 %v8573_v56  ;;  %7363 = vmatprep.mubr.msk.f32.mxu0 %vm8433_vm0, %v9805_v34 }
0x1cfd   :  { %9810 = vst [vmem:[#allocation26_spill] sm:$0xff] %v9210_v33  ;;  %v7318_v63 = vpop.f32.mrb[41].mxu1  ;;  %7973 = vmatprep.subr.bf16.mxu0 %v9806_v24 }
0x1cff   :  { %7364 = vmatmul.mubr.msk.f32.vlgmr.msra.gmra.mrb[48].mxu0 %vm185_vm2, %v9196_v12 }
0x1d00   :  { %7975 = vmatpush3.bf16.msra.mxu0 %v8607_v27  ;;  %7383 = vmatprep.mubr.msk.f32.mxu0 %vm8433_vm0, %v9805_v34 }
0x1d01   :  { %7976 = vmatprep.subr.bf16.mxu0 %v9806_v24 }
0x1d04   :  { %v4023_v55 = vpop.f32.mrb[42].mxu1  ;;  %7978 = vmatpush3.bf16.msra.mxu0 %v8610_v29 }
0x1d05   :  { %v7329_v0 = vpop.f32.mrb[43].mxu1  ;;  %8003 = vmatprep.subr.bf16.mxu0 %v9806_v24 }
0x1d08   :  { %v4096_v38 = vpop.f32.mrb[44].mxu1 }
0x1d09   :  { %v4097_v42 = vadd.f32 %v4096_v38, %v4023_v55  ;;  %v7336_v16 = vpop.f32.mrb[45].mxu1 }
0x1d0b   :  { %v4100_v63 = vadd.f32 %v8960_v18, %v4097_v42 }
0x1d0d   :  { %8221 = vtanh.f32 %v4100_v63  ;;  %v6343_v33 = vmul.f32 -1.442695, %v4100_v63 }
0x1d0f   :  { %8223 = vpow2.f32 %v6343_v33 }
0x1d17   :  { %v8222_v22 = vpop.eup %8221 }
0x1d18   :  { %4110 = vrot.lane.b32.xlu0 %v8222_v22, %s8435_s2 }
0x1d19   :  { %v8224_v59 = vpop.eup %8223 }
0x1d1a   :  { %v4104_v30 = vadd.f32 1.0, %v8224_v59 }
0x1d1c   :  { %8225 = vrcp.f32 %v4104_v30 }
0x1d26   :  { %v8226_v15 = vpop.eup %8225 }
0x1d27   :  { %v4108_v38 = vmul.f32 %v8226_v15, %v9096_v28 }
0x1d8a   :  { %v4111_v6 = vpop.permute.xlu0 %4110 }
0x1d8b   :  { %v4113_v25 = vmul.f32 %v8226_v15, %v4111_v6 }
0x1d8d   :  { %4115 = vrot.lane.b32.xlu1 %v4113_v25, %s8436_s29  ;;  %v3948_v25 = vrot.slane %v9106_v52, 5  ;;  %v3941_v52 = vrot.slane %v9120_v10, 1 }
0x1dce   :  { %v9227_v0 = vpop.f32.mrb[46].mxu0 }
0x1dcf   :  { %v7311_v55 = vpop.f32.mrb[47].mxu0 }
0x1dff   :  { %v4116_v42 = vpop.permute.xlu1 %4115 }
0x1e00   :  { %v9230_v16 = vadd.f32 %v4116_v42, %v4108_v38  ;;  %v3940_v38 = vrot.slane %v9124_v57, 1 }
0x1e02   :  { %9811 = vst [vmem:[#allocation27_spill] sm:$0xff] %v9230_v16  ;;  %8227 = vtanh.f32 %v9230_v16  ;;  %4126 = vrot.lane.b32.xlu1 %v9230_v16, %s8435_s2  ;;  %v9258_v42 = vsel %vm879_vm5, %v3940_v38, %v3941_v52 }
0x1e0c   :  { %v8228_v59 = vpop.eup %8227 }
0x1e0d   :  { %4121 = vrot.lane.b32.xlu0 %v8228_v59, %s8435_s2 }
0x1e11   :  { %4130 = vrot.lane.b32.xlu0 %v9172_v40, %s8436_s29 }
0x1e15   :  { %3949 = vrot.lane.b32.xlu0 %v3948_v25, %s8436_s29 }
0x1e74   :  { %v4127_v22 = vpop.permute.xlu1 %4126 }
0x1e7f   :  { %v4122_v6 = vpop.permute.xlu0 %4121 }
0x1e80   :  { %v9240_v30 = vmul.f32 %v8226_v15, %v4122_v6  ;;  %v3943_v15 = vrot.slane %v9133_v60, 1 }
0x1e82   :  { %v4129_v33 = vadd.f32 %v4127_v22, %v9240_v30  ;;  %v9254_v55 = vsel %vm879_vm5, %v3941_v52, %v3943_v15 }
0x1e83   :  { %v4131_v63 = vpop.permute.xlu0 %4130  ;;  %v7971_v25 = vpack.c.bf16 %v9254_v55, %v9258_v42 }
0x1e84   :  { %4205 = vrot.lane.b32.xlu1 %v4129_v33, %s8436_s29  ;;  %7346 = vmatmul.mubr.msk.f32.vlgmr.msra.gmra.mrb[46].mxu1 %vm111_vm1, %v4131_v63 }
0x1e85   :  { %7963 = vmatpush3.bf16.msra.mxu1 %v8552_v41  ;;  %7356 = vmatprep.mubr.msk.f32.mxu1 %vm8433_vm0, %v9805_v34 }
0x1e86   :  { %7964 = vmatprep.subr.bf16.mxu1 %v9806_v24 }
0x1e87   :  { %v3950_v6 = vpop.permute.xlu0 %3949 }
0x1e88   :  { %v9267_v10 = vsel %vm874_vm6, %v3943_v15, %v3950_v6 }
0x1e89   :  { %7966 = vmatpush3.bf16.msra.mxu1 %v8558_v45 }
0x1e8a   :  { %7970 = vmatprep.subr.bf16.mxu1 %v9806_v24 }
0x1ef6   :  { %v4206_v59 = vpop.permute.xlu1 %4205 }
0x1ef7   :  { %7357 = vmatmul.mubr.msk.f32.vlgmr.msra.gmra.mrb[48].mxu1 %vm111_vm1, %v4206_v59 }
0x1ef8   :  { %7972 = vmatpush3.bf16.msra.mxu1 %v7971_v25  ;;  %7372 = vmatprep.mubr.msk.f32.mxu1 %vm8433_vm0, %v9805_v34 }
0x1ef9   :  { %7370 = vmatprep.subr.mxu1 %v9805_v34 }
0x1efc   :  { %7371 = vmatpush3.msk.msra.mxu1 %vm549_vm3, %v9267_v10 }
0x1efd   :  { %7979 = vmatprep.subr.bf16.mxu1 %v9806_v24 }
0x1f57   :  { %v4200_v57 = vpop.f32.mrb[46].mxu1 }
0x1f58   :  { %v7347_v60 = vpop.f32.mrb[47].mxu1 }
0x1f59   :  { %v4370_v60 = vpop.f32.mrb[48].mxu0 }
0x1fca   :  { %v4275_v22 = vpop.f32.mrb[48].mxu1 }
0x1fcb   :  { %v4276_v33 = vadd.f32 %v4275_v22, %v4200_v57  ;;  %v7358_v63 = vpop.f32.mrb[49].mxu1  ;;  %v4371_v57 = vadd.f32 %v9143_v49, %v4370_v60  ;;  %v7365_v22 = vpop.f32.mrb[49].mxu0 }
0x1fcd   :  { %v4279_v52 = vadd.f32 %v9138_v3, %v4276_v33  ;;  %7373 = vmatmul.mubr.msk.f32.vlgmr.msra.gmra.mrb[50].mxu1 %vm545_vm4, %v4371_v57 }
0x1fce   :  { %7981 = vmatpush3.bf16.msra.mxu1 %v8622_v43  ;;  %7418 = vmatprep.mubr.msk.f32.mxu1 %vm8433_vm0, %v9805_v34 }
0x1fcf   :  { %8229 = vtanh.f32 %v4279_v52  ;;  %v6346_v59 = vmul.f32 -1.442695, %v4279_v52  ;;  %7982 = vmatprep.subr.bf16.mxu1 %v9806_v24 }
0x1fd1   :  { %8231 = vpow2.f32 %v6346_v59 }
0x1fd2   :  { %7984 = vmatpush3.bf16.msra.mxu1 %v8625_v46 }
0x1fd3   :  { %7985 = vmatprep.subr.bf16.mxu1 %v9806_v24 }
0x1fd6   :  { %7987 = vmatpush3.bf16.msra.mxu1 %v8629_v50 }
0x1fd7   :  { %7988 = vmatprep.subr.bf16.mxu1 %v9806_v24 }
0x1fd9   :  { %v8230_v38 = vpop.eup %8229 }
0x1fda   :  { %4289 = vrot.lane.b32.xlu1 %v8230_v38, %s8435_s2  ;;  %7990 = vmatpush3.bf16.msra.mxu1 %v8633_v53 }
0x1fdb   :  { %v8232_v15 = vpop.eup %8231  ;;  %7991 = vmatprep.subr.bf16.mxu1 %v9806_v24 }
0x1fdc   :  { %v4283_v25 = vadd.f32 1.0, %v8232_v15 }
0x1fde   :  { %8233 = vrcp.f32 %v4283_v25  ;;  %7993 = vmatpush3.bf16.msra.mxu1 %v8637_v58 }
0x1fdf   :  { %7994 = vmatprep.subr.bf16.mxu1 %v9806_v24 }
0x1fe2   :  { %7996 = vmatpush3.bf16.msra.mxu1 %v8641_v61 }
0x1fe3   :  { %7997 = vmatprep.subr.bf16.mxu1 %v9806_v24 }
0x1fe6   :  { %7999 = vmatpush3.bf16.msra.mxu1 %v8645_v2 }
0x1fe7   :  { %8000 = vmatprep.subr.bf16.mxu1 %v9806_v24 }
0x1fe8   :  { %v8234_v6 = vpop.eup %8233 }
0x1fea   :  { %8002 = vmatpush3.bf16.msra.mxu1 %v8683_v20 }
0x1feb   :  { %8027 = vmatprep.subr.bf16.mxu1 %v9806_v24 }
0x204c   :  { %v4290_v28 = vpop.permute.xlu1 %4289 }
0x204d   :  { %v4292_v40 = vmul.f32 %v8234_v6, %v4290_v28  ;;  %v4287_v28 = vmul.f32 %v8234_v6, %v9166_v21 }
0x204f   :  { %4294 = vrot.lane.b32.xlu0 %v4292_v40, %s8436_s29 }
0x20a0   :  { %v4451_v52 = vpop.f32.mrb[50].mxu1 }
0x20a1   :  { %v7374_v38 = vpop.f32.mrb[51].mxu1 }
0x20c1   :  { %v4295_v40 = vpop.permute.xlu0 %4294 }
0x20c2   :  { %v9296_v33 = vadd.f32 %v4295_v40, %v4287_v28 }
0x20c4   :  { %8235 = vtanh.f32 %v9296_v33 }
0x20ce   :  { %v8236_v63 = vpop.eup %8235 }
0x20cf   :  { %4300 = vrot.lane.b32.xlu1 %v8236_v63, %s8435_s2 }
0x20d3   :  { %4680 = vrot.lane.b32.xlu1 %v9240_v30, %s8436_s29 }
0x2141   :  { %v4301_v59 = vpop.permute.xlu1 %4300 }
0x2142   :  { %v9302_v15 = vmul.f32 %v8234_v6, %v4301_v59 }
0x2144   :  { %v4374_v25 = vmul.f32 0.01, %v9302_v15 }
0x2145   :  { %v9319_v6 = vpop.permute.xlu1 %4680 }
0x2146   :  { %4376 = vrot.lane.b32.xlu0 %v4374_v25, %s8436_s29  ;;  %9812 = vst [vmem:[#allocation28_spill] sm:$0xff] %v9319_v6 }
0x21b8   :  { %v4377_v60 = vpop.permute.xlu0 %4376 }
0x21b9   :  { %v4452_v57 = vadd.f32 %v4451_v52, %v4377_v60 }
0x21bb   :  { %7384 = vmatmul.mubr.msk.f32.vlgmr.msra.gmra.mrb[50].mxu0 %vm111_vm1, %v4452_v57 }
0x21bc   :  { %8005 = vmatpush3.bf16.msra.mxu0 %v8650_v8  ;;  %7425 = vmatprep.mubr.msk.f32.mxu0 %vm8433_vm0, %v9805_v34 }
0x21bd   :  { %8006 = vmatprep.subr.bf16.mxu0 %v9806_v24 }
0x21bf   :  { %7426 = vmatmul.mubr.msk.f32.vlgmr.msra.gmra.mrb[52].mxu0 %vm185_vm2, %v9196_v12  ;;  %v9326_v12 = vld [vmem:[#allocation2 + $0x6] sm:$0x1] }
0x21c0   :  { %8008 = vmatpush3.bf16.msra.mxu0 %v8513_v5  ;;  %7436 = vmatprep.mubr.msk.f32.mxu0 %vm8433_vm0, %v9805_v34 }
0x21c1   :  { %8009 = vmatprep.subr.bf16.mxu0 %v9806_v24 }
0x21c4   :  { %8011 = vmatpush3.bf16.msra.mxu0 %v8516_v7 }
0x21c5   :  { %8012 = vmatprep.subr.bf16.mxu0 %v9806_v24 }
0x21c7   :  { %7437 = vmatmul.mubr.msk.f32.vlgmr.msra.gmra.mrb[54].mxu0 %vm111_vm1, %v9319_v6 }
0x21c8   :  { %8014 = vmatpush3.bf16.msra.mxu0 %v8520_v11  ;;  %7443 = vmatprep.mubr.msk.f32.mxu0 %vm8433_vm0, %v9805_v34 }
0x21c9   :  { %8015 = vmatprep.subr.bf16.mxu0 %v9806_v24 }
0x21cb   :  { %7444 = vmatmul.mubr.msk.f32.vlgmr.msra.gmra.mrb[56].mxu0 %vm185_vm2, %v9326_v12 }
0x21cc   :  { %8017 = vmatpush3.bf16.msra.mxu0 %v8545_v35  ;;  %7454 = vmatprep.mubr.msk.f32.mxu0 %vm8433_vm0, %v9805_v34 }
0x21cd   :  { %8018 = vmatprep.subr.bf16.mxu0 %v9806_v24 }
0x21d0   :  { %8020 = vmatpush3.bf16.msra.mxu0 %v8548_v37 }
0x21d1   :  { %8021 = vmatprep.subr.bf16.mxu0 %v9806_v24 }
0x228e   :  { %v4524_v22 = vpop.f32.mrb[50].mxu0 }
0x228f   :  { %v4525_v28 = vadd.f32 %v9207_v1, %v4524_v22  ;;  %v7385_v40 = vpop.f32.mrb[51].mxu0 }
0x2291   :  { %7419 = vmatmul.mubr.f32.vlgmr.msra.gmra.mrb[52].mxu1 %v4525_v28 }
0x2292   :  { %v9338_v63 = vpop.f32.mrb[52].mxu0  ;;  %8029 = vmatpush3.bf16.msra.mxu1 %v8573_v56  ;;  %7472 = vmatprep.mubr.msk.f32.mxu1 %vm8433_vm0, %v9805_v34 }
0x2293   :  { %9813 = vst [vmem:[#allocation29_spill] sm:$0xff] %v9338_v63  ;;  %v7427_v52 = vpop.f32.mrb[53].mxu0  ;;  %8033 = vmatprep.subr.bf16.mxu1 %v9806_v24 }
0x2295   :  { %7473 = vmatmul.mubr.msk.f32.vlgmr.msra.gmra.mrb[54].mxu1 %vm185_vm2, %v9326_v12 }
0x2296   :  { %8035 = vmatpush3.bf16.msra.mxu1 %v8607_v27  ;;  %7492 = vmatprep.mubr.msk.f32.mxu1 %vm8433_vm0, %v9805_v34 }
0x2297   :  { %8036 = vmatprep.subr.bf16.mxu1 %v9806_v24 }
0x229a   :  { %v4788_v38 = vpop.f32.mrb[54].mxu0  ;;  %8038 = vmatpush3.bf16.msra.mxu1 %v8610_v29 }
0x229b   :  { %v7438_v59 = vpop.f32.mrb[55].mxu0  ;;  %8063 = vmatprep.subr.bf16.mxu1 %v9806_v24 }
0x229e   :  { %v4861_v25 = vpop.f32.mrb[56].mxu0 }
0x229f   :  { %v4862_v60 = vadd.f32 %v4861_v25, %v4788_v38  ;;  %v7445_v57 = vpop.f32.mrb[57].mxu0 }
0x22a1   :  { %v4865_v22 = vadd.f32 %v8960_v18, %v4862_v60 }
0x22a3   :  { %8237 = vtanh.f32 %v4865_v22  ;;  %v6354_v40 = vmul.f32 -1.442695, %v4865_v22  ;;  %v4706_v22 = vrot.slane %v9254_v55, 1 }
0x22a5   :  { %8239 = vpow2.f32 %v6354_v40 }
0x22ad   :  { %v8238_v28 = vpop.eup %8237 }
0x22ae   :  { %4875 = vrot.lane.b32.xlu0 %v8238_v28, %s8435_s2 }
0x22af   :  { %v8240_v52 = vpop.eup %8239 }
0x22b0   :  { %v4869_v6 = vadd.f32 1.0, %v8240_v52 }
0x22b2   :  { %8241 = vrcp.f32 %v4869_v6 }
0x22bc   :  { %v8242_v63 = vpop.eup %8241 }
0x22bd   :  { %v4873_v25 = vmul.f32 %v8242_v63, %v9230_v16 }
0x2320   :  { %v4876_v21 = vpop.permute.xlu0 %4875 }
0x2321   :  { %v4878_v39 = vmul.f32 %v8242_v63, %v4876_v21  ;;  %v4708_v21 = vrot.slane %v9267_v10, 1 }
0x2323   :  { %4880 = vrot.lane.b32.xlu1 %v4878_v39, %s8436_s29  ;;  %v4713_v39 = vrot.slane %v9240_v30, 5  ;;  %v4709_v52 = vsel %vm879_vm5, %v4706_v22, %v4708_v21 }
0x2324   :  { %v5471_v10 = vrot.slane %v4709_v52, 1 }
0x2364   :  { %v9355_v59 = vpop.f32.mrb[52].mxu1 }
0x2365   :  { %v7420_v38 = vpop.f32.mrb[53].mxu1 }
0x2366   :  { %v4705_v38 = vrot.slane %v9258_v42, 1 }
0x2368   :  { %v4707_v30 = vsel %vm879_vm5, %v4705_v38, %v4706_v22 }
0x2395   :  { %v4881_v18 = vpop.permute.xlu1 %4880 }
0x2396   :  { %v9358_v60 = vadd.f32 %v4881_v18, %v4873_v25 }
0x2398   :  { %8243 = vtanh.f32 %v9358_v60  ;;  %4891 = vrot.lane.b32.xlu1 %v9358_v60, %s8435_s2 }
0x23a2   :  { %v8244_v57 = vpop.eup %8243 }
0x23a3   :  { %4886 = vrot.lane.b32.xlu0 %v8244_v57, %s8435_s2 }
0x23a7   :  { %4895 = vrot.lane.b32.xlu0 %v9302_v15, %s8436_s29 }
0x23ab   :  { %4714 = vrot.lane.b32.xlu0 %v4713_v39, %s8436_s29 }
0x240a   :  { %v4892_v40 = vpop.permute.xlu1 %4891 }
0x2415   :  { %v4887_v6 = vpop.permute.xlu0 %4886 }
0x2416   :  { %v9370_v28 = vmul.f32 %v8242_v63, %v4887_v6  ;;  %v5470_v63 = vrot.slane %v4707_v30, 1 }
0x2418   :  { %v4894_v25 = vadd.f32 %v4892_v40, %v9370_v28  ;;  %v9388_v39 = vsel %vm879_vm5, %v5470_v63, %v5471_v10 }
0x2419   :  { %v4896_v18 = vpop.permute.xlu0 %4895  ;;  %v6235_v40 = vrot.slane %v9388_v39, 1 }
0x241a   :  { %4970 = vrot.lane.b32.xlu1 %v4894_v25, %s8436_s29  ;;  %7455 = vmatmul.mubr.msk.f32.vlgmr.msra.gmra.mrb[58].mxu0 %vm111_vm1, %v4896_v18  ;;  %v8031_v25 = vpack.c.bf16 %v4709_v52, %v4707_v30 }
0x241b   :  { %8023 = vmatpush3.bf16.msra.mxu0 %v8552_v41  ;;  %7465 = vmatprep.mubr.msk.f32.mxu0 %vm8433_vm0, %v9805_v34 }
0x241c   :  { %8024 = vmatprep.subr.bf16.mxu0 %v9806_v24 }
0x241d   :  { %v4715_v55 = vpop.permute.xlu0 %4714 }
0x241e   :  { %v9383_v42 = vsel %vm874_vm6, %v4708_v21, %v4715_v55 }
0x241f   :  { %v9795_v57 = vrot.slane %v9383_v42, 1  ;;  %8026 = vmatpush3.bf16.msra.mxu0 %v8558_v45 }
0x2420   :  { %8030 = vmatprep.subr.bf16.mxu0 %v9806_v24 }
0x2421   :  { %v9394_v6 = vsel %vm879_vm5, %v5471_v10, %v9795_v57 }
0x2422   :  { %v9794_v22 = vrot.slane %v9394_v6, 1 }
0x2424   :  { %v6237_v21 = vsel %vm879_vm5, %v6235_v40, %v9794_v22 }
0x2425   :  { %6248 = vst.msk [vmem:[#allocation9] sm:$0xff] %vm111_vm1, %v6237_v21 }
0x248c   :  { %v4971_v38 = vpop.permute.xlu1 %4970 }
0x248d   :  { %7466 = vmatmul.mubr.msk.f32.vlgmr.msra.gmra.mrb[60].mxu0 %vm111_vm1, %v4971_v38 }
0x248e   :  { %8032 = vmatpush3.bf16.msra.mxu0 %v8031_v25  ;;  %7481 = vmatprep.mubr.msk.f32.mxu0 %vm8433_vm0, %v9805_v34 }
0x248f   :  { %7479 = vmatprep.subr.mxu0 %v9805_v34 }
0x2492   :  { %7480 = vmatpush3.msk.msra.mxu0 %vm549_vm3, %v9383_v42 }
0x2493   :  { %8039 = vmatprep.subr.bf16.mxu0 %v9806_v24 }
0x24ed   :  { %v4965_v18 = vpop.f32.mrb[58].mxu0 }
0x24ee   :  { %v7456_v10 = vpop.f32.mrb[59].mxu0 }
0x24ef   :  { %v5135_v10 = vpop.f32.mrb[54].mxu1 }
0x2560   :  { %v5040_v55 = vpop.f32.mrb[60].mxu0 }
0x2561   :  { %v5041_v63 = vadd.f32 %v5040_v55, %v4965_v18  ;;  %v7467_v40 = vpop.f32.mrb[61].mxu0  ;;  %v5136_v18 = vadd.f32 %v9143_v49, %v5135_v10  ;;  %v7474_v55 = vpop.f32.mrb[55].mxu1 }
0x2563   :  { %v5044_v52 = vadd.f32 %v9138_v3, %v5041_v63  ;;  %7482 = vmatmul.mubr.msk.f32.vlgmr.msra.gmra.mrb[62].mxu0 %vm545_vm4, %v5136_v18 }
0x2564   :  { %8041 = vmatpush3.bf16.msra.mxu0 %v8622_v43  ;;  %7527 = vmatprep.mubr.msk.f32.mxu0 %vm8433_vm0, %v9805_v34 }
0x2565   :  { %8245 = vtanh.f32 %v5044_v52  ;;  %v6357_v21 = vmul.f32 -1.442695, %v5044_v52  ;;  %8042 = vmatprep.subr.bf16.mxu0 %v9806_v24 }
0x2567   :  { %8247 = vpow2.f32 %v6357_v21 }
0x2568   :  { %8044 = vmatpush3.bf16.msra.mxu0 %v8625_v46 }
0x2569   :  { %8045 = vmatprep.subr.bf16.mxu0 %v9806_v24 }
0x256c   :  { %8047 = vmatpush3.bf16.msra.mxu0 %v8629_v50 }
0x256d   :  { %8048 = vmatprep.subr.bf16.mxu0 %v9806_v24 }
0x256f   :  { %v8246_v30 = vpop.eup %8245 }
0x2570   :  { %5054 = vrot.lane.b32.xlu1 %v8246_v30, %s8435_s2  ;;  %8050 = vmatpush3.bf16.msra.mxu0 %v8633_v53 }
0x2571   :  { %v8248_v38 = vpop.eup %8247  ;;  %8051 = vmatprep.subr.bf16.mxu0 %v9806_v24 }
0x2572   :  { %v5048_v25 = vadd.f32 1.0, %v8248_v38 }
0x2574   :  { %8249 = vrcp.f32 %v5048_v25  ;;  %8053 = vmatpush3.bf16.msra.mxu0 %v8637_v58 }
0x2575   :  { %8054 = vmatprep.subr.bf16.mxu0 %v9806_v24 }
0x2578   :  { %8056 = vmatpush3.bf16.msra.mxu0 %v8641_v61 }
0x2579   :  { %8057 = vmatprep.subr.bf16.mxu0 %v9806_v24 }
0x257c   :  { %8059 = vmatpush3.bf16.msra.mxu0 %v8645_v2 }
0x257d   :  { %8060 = vmatprep.subr.bf16.mxu0 %v9806_v24 }
0x257e   :  { %v8250_v22 = vpop.eup %8249 }
0x2580   :  { %8062 = vmatpush3.bf16.msra.mxu0 %v8683_v20 }
0x2581   :  { %8087 = vmatprep.subr.bf16.mxu0 %v9806_v24 }
0x25e2   :  { %v5055_v57 = vpop.permute.xlu1 %5054 }
0x25e3   :  { %v5057_v16 = vmul.f32 %v8250_v22, %v5055_v57 }
0x25e5   :  { %5059 = vrot.lane.b32.xlu0 %v5057_v16, %s8436_s29  ;;  %v5052_v16 = vmul.f32 %v8250_v22, %v9296_v33 }
0x2636   :  { %v5216_v52 = vpop.f32.mrb[62].mxu0 }
0x2637   :  { %v7483_v30 = vpop.f32.mrb[63].mxu0 }
0x2657   :  { %v5060_v57 = vpop.permute.xlu0 %5059 }
0x2658   :  { %v9433_v63 = vadd.f32 %v5060_v57, %v5052_v16 }
0x265a   :  { %8251 = vtanh.f32 %v9433_v63 }
0x2664   :  { %v8252_v40 = vpop.eup %8251 }
0x2665   :  { %5065 = vrot.lane.b32.xlu1 %v8252_v40, %s8435_s2  ;;  %v8305_v40 = vld [vmem:[#allocation7 + $0x30] sm:$0x1] }
0x2669   :  { %5445 = vrot.lane.b32.xlu1 %v9370_v28, %s8436_s29 }
0x26d7   :  { %v5066_v21 = vpop.permute.xlu1 %5065 }
0x26d8   :  { %v9439_v38 = vmul.f32 %v8250_v22, %v5066_v21 }
0x26da   :  { %v5139_v25 = vmul.f32 0.01, %v9439_v38 }
0x26db   :  { %v9456_v22 = vpop.permute.xlu1 %5445 }
0x26dc   :  { %5141 = vrot.lane.b32.xlu0 %v5139_v25, %s8436_s29 }
0x274e   :  { %v5142_v10 = vpop.permute.xlu0 %5141 }
0x274f   :  { %v5217_v18 = vadd.f32 %v5216_v52, %v5142_v10 }
0x2751   :  { %7493 = vmatmul.mubr.msk.f32.vlgmr.msra.gmra.mrb[56].mxu1 %vm111_vm1, %v5217_v18 }
0x2752   :  { %8065 = vmatpush3.bf16.msra.mxu1 %v8650_v8  ;;  %7534 = vmatprep.mubr.msk.f32.mxu1 %vm8433_vm0, %v9805_v34 }
0x2753   :  { %8066 = vmatprep.subr.bf16.mxu1 %v9806_v24 }
0x2755   :  { %7535 = vmatmul.mubr.msk.f32.vlgmr.msra.gmra.mrb[58].mxu1 %vm185_vm2, %v9326_v12 }
0x2756   :  { %8068 = vmatpush3.bf16.msra.mxu1 %v8513_v5  ;;  %7545 = vmatprep.mubr.msk.f32.mxu1 %vm8433_vm0, %v9805_v34  ;;  %v9463_v5 = vld [vmem:[#allocation2 + $0x7] sm:$0x1] }
0x2757   :  { %8069 = vmatprep.subr.bf16.mxu1 %v9806_v24 }
0x275a   :  { %8071 = vmatpush3.bf16.msra.mxu1 %v8516_v7 }
0x275b   :  { %8072 = vmatprep.subr.bf16.mxu1 %v9806_v24 }
0x275d   :  { %7546 = vmatmul.mubr.msk.f32.vlgmr.msra.gmra.mrb[60].mxu1 %vm111_vm1, %v9456_v22 }
0x275e   :  { %8074 = vmatpush3.bf16.msra.mxu1 %v8520_v11  ;;  %7552 = vmatprep.mubr.msk.f32.mxu1 %vm8433_vm0, %v9805_v34 }
0x275f   :  { %8075 = vmatprep.subr.bf16.mxu1 %v9806_v24 }
0x2761   :  { %7553 = vmatmul.mubr.msk.f32.vlgmr.msra.gmra.mrb[62].mxu1 %vm185_vm2, %v9463_v5 }
0x2762   :  { %8077 = vmatpush3.bf16.msra.mxu1 %v8545_v35  ;;  %7563 = vmatprep.mubr.msk.f32.mxu1 %vm8433_vm0, %v9805_v34 }
0x2763   :  { %8078 = vmatprep.subr.bf16.mxu1 %v9806_v24 }
0x2766   :  { %8080 = vmatpush3.bf16.msra.mxu1 %v8548_v37 }
0x2767   :  { %8081 = vmatprep.subr.bf16.mxu1 %v9806_v24 }
0x2824   :  { %v5289_v7 = vpop.f32.mrb[56].mxu1 }
0x2825   :  { %v5290_v11 = vadd.f32 %v9207_v1, %v5289_v7  ;;  %v7494_v12 = vpop.f32.mrb[57].mxu1 }
0x2827   :  { %7528 = vmatmul.mubr.f32.vlgmr.msra.gmra.mrb[64].mxu0 %v5290_v11 }
0x2828   :  { %v9475_v55 = vpop.f32.mrb[58].mxu1  ;;  %8089 = vmatpush3.bf16.msra.mxu0 %v8573_v56  ;;  %7581 = vmatprep.mubr.msk.f32.mxu0 %vm8433_vm0, %v9805_v34 }
0x2829   :  { %v7536_v35 = vpop.f32.mrb[59].mxu1  ;;  %8093 = vmatprep.subr.bf16.mxu0 %v9806_v24 }
0x282b   :  { %7582 = vmatmul.mubr.msk.f32.vlgmr.msra.gmra.mrb[66].mxu0 %vm185_vm2, %v9463_v5 }
0x282c   :  { %8095 = vmatpush3.bf16.msra.mxu0 %v8607_v27  ;;  %7601 = vmatprep.mubr.msk.f32.mxu0 %vm8433_vm0, %v9805_v34 }
0x282d   :  { %8096 = vmatprep.subr.bf16.mxu0 %v9806_v24 }
0x2830   :  { %v5553_v37 = vpop.f32.mrb[60].mxu1  ;;  %8098 = vmatpush3.bf16.msra.mxu0 %v8610_v29 }
0x2831   :  { %v7547_v56 = vpop.f32.mrb[61].mxu1  ;;  %8123 = vmatprep.subr.bf16.mxu0 %v9806_v24 }
0x2834   :  { %v5626_v1 = vpop.f32.mrb[62].mxu1 }
0x2835   :  { %v5627_v16 = vadd.f32 %v5626_v1, %v5553_v37  ;;  %v7554_v57 = vpop.f32.mrb[63].mxu1  ;;  %v5478_v1 = vrot.slane %v9370_v28, 5 }
0x2837   :  { %v5630_v52 = vadd.f32 %v8305_v40, %v5627_v16 }
0x2839   :  { %8253 = vtanh.f32 %v5630_v52  ;;  %v6365_v27 = vmul.f32 -1.442695, %v5630_v52 }
0x283b   :  { %8255 = vpow2.f32 %v6365_v27  ;;  %v9814_v27 = vrot.slane %v9383_v42, 1  ;;  %v8091_v42 = vpack.c.bf16 %v9394_v6, %v9388_v39 }
0x2843   :  { %v8254_v30 = vpop.eup %8253 }
0x2844   :  { %5640 = vrot.lane.b32.xlu0 %v8254_v30, %s8435_s2 }
0x2845   :  { %v8256_v21 = vpop.eup %8255 }
0x2846   :  { %v5634_v25 = vadd.f32 1.0, %v8256_v21 }
0x2848   :  { %8257 = vrcp.f32 %v5634_v25 }
0x2852   :  { %v8258_v10 = vpop.eup %8257 }
0x2853   :  { %v5638_v12 = vmul.f32 %v8258_v10, %v9358_v60 }
0x28b6   :  { %v5641_v18 = vpop.permute.xlu0 %5640 }
0x28b7   :  { %v5643_v29 = vmul.f32 %v8258_v10, %v5641_v18 }
0x28b9   :  { %5645 = vrot.lane.b32.xlu1 %v5643_v29, %s8436_s29 }
0x28fa   :  { %v9491_v7 = vpop.f32.mrb[64].mxu0 }
0x28fb   :  { %v7529_v11 = vpop.f32.mrb[65].mxu0 }
0x292b   :  { %v5646_v35 = vpop.permute.xlu1 %5645 }
0x292c   :  { %v9494_v37 = vadd.f32 %v5646_v35, %v5638_v12 }
0x292e   :  { %8259 = vtanh.f32 %v9494_v37  ;;  %5656 = vrot.lane.b32.xlu1 %v9494_v37, %s8435_s2 }
0x2938   :  { %v8260_v56 = vpop.eup %8259 }
0x2939   :  { %5651 = vrot.lane.b32.xlu0 %v8260_v56, %s8435_s2 }
0x293d   :  { %5660 = vrot.lane.b32.xlu0 %v9439_v38, %s8436_s29 }
0x2941   :  { %5479 = vrot.lane.b32.xlu0 %v5478_v1, %s8436_s29 }
0x29a0   :  { %v5657_v40 = vpop.permute.xlu1 %5656 }
0x29ab   :  { %v5652_v16 = vpop.permute.xlu0 %5651 }
0x29ac   :  { %v9504_v57 = vmul.f32 %v8258_v10, %v5652_v16 }
0x29ae   :  { %v5659_v52 = vadd.f32 %v5657_v40, %v9504_v57 }
0x29af   :  { %v5661_v30 = vpop.permute.xlu0 %5660 }
0x29b0   :  { %5735 = vrot.lane.b32.xlu1 %v5659_v52, %s8436_s29  ;;  %7564 = vmatmul.mubr.msk.f32.vlgmr.msra.gmra.mrb[64].mxu1 %vm111_vm1, %v5661_v30 }
0x29b1   :  { %8083 = vmatpush3.bf16.msra.mxu1 %v8552_v41  ;;  %7574 = vmatprep.mubr.msk.f32.mxu1 %vm8433_vm0, %v9805_v34  ;;  %v9815_v41 = vrot.slane %v9394_v6, 1 }
0x29b2   :  { %8084 = vmatprep.subr.bf16.mxu1 %v9806_v24 }
0x29b3   :  { %v5480_v28 = vpop.permute.xlu0 %5479 }
0x29b4   :  { %v9516_v21 = vsel %vm874_vm6, %v9814_v27, %v5480_v28  ;;  %v5900_v28 = vpop.f32.mrb[66].mxu0 }
0x29b5   :  { %v6238_v25 = vrot.slane %v9516_v21, 1  ;;  %8086 = vmatpush3.bf16.msra.mxu1 %v8558_v45  ;;  %v5901_v27 = vadd.f32 %v9143_v49, %v5900_v28 }
0x29b6   :  { %8090 = vmatprep.subr.bf16.mxu1 %v9806_v24 }
0x29b7   :  { %v6239_v10 = vsel %vm879_vm5, %v9815_v41, %v6238_v25  ;;  %v7583_v41 = vpop.f32.mrb[67].mxu0 }
0x29b8   :  { %6249 = vst.msk [vmem:[#allocation9 + $0x8] sm:$0xff] %vm111_vm1, %v6239_v10 }
0x2a22   :  { %v5736_v18 = vpop.permute.xlu1 %5735 }
0x2a23   :  { %7575 = vmatmul.mubr.msk.f32.vlgmr.msra.gmra.mrb[66].mxu1 %vm111_vm1, %v5736_v18 }
0x2a24   :  { %8092 = vmatpush3.bf16.msra.mxu1 %v8091_v42  ;;  %7590 = vmatprep.mubr.msk.f32.mxu1 %vm8433_vm0, %v9805_v34 }
0x2a25   :  { %7588 = vmatprep.subr.mxu1 %v9805_v34 }
0x2a28   :  { %7589 = vmatpush3.msk.msra.mxu1 %vm549_vm3, %v9516_v21 }
0x2a29   :  { %8099 = vmatprep.subr.bf16.mxu1 %v9806_v24  ;;  %7591 = vmatmul.mubr.msk.f32.vlgmr.msra.gmra.mrb[68].mxu1 %vm545_vm4, %v5901_v27 }
0x2a2a   :  { %8101 = vmatpush3.bf16.msra.mxu1 %v8622_v43  ;;  %7636 = vmatprep.mubr.msk.f32.mxu1 %vm8433_vm0, %v9805_v34 }
0x2a2b   :  { %8102 = vmatprep.subr.bf16.mxu1 %v9806_v24 }
0x2a2e   :  { %8104 = vmatpush3.bf16.msra.mxu1 %v8625_v46 }
0x2a2f   :  { %8105 = vmatprep.subr.bf16.mxu1 %v9806_v24 }
0x2a32   :  { %8107 = vmatpush3.bf16.msra.mxu1 %v8629_v50 }
0x2a33   :  { %8108 = vmatprep.subr.bf16.mxu1 %v9806_v24 }
0x2a36   :  { %8110 = vmatpush3.bf16.msra.mxu1 %v8633_v53 }
0x2a37   :  { %8111 = vmatprep.subr.bf16.mxu1 %v9806_v24 }
0x2a3a   :  { %8113 = vmatpush3.bf16.msra.mxu1 %v8637_v58  ;;  %v9563_v58 = vld [vmem:[#allocation7 + $0x128] sm:$0x1] }
0x2a3b   :  { %8114 = vmatprep.subr.bf16.mxu1 %v9806_v24  ;;  %v9609_v28 = vadd.f32 %v9491_v7, %v9563_v58 }
0x2a3d   :  { %v5363_v27 = vsel %vm766_vm7, %v9609_v28, -inf }
0x2a3e   :  { %8116 = vmatpush3.bf16.msra.mxu1 %v8641_v61  ;;  %v763_v61 = vadd.f32 %v8707_v54, %v9563_v58 }
0x2a3f   :  { %8117 = vmatprep.subr.bf16.mxu1 %v9806_v24 }
0x2a42   :  { %8119 = vmatpush3.bf16.msra.mxu1 %v8645_v2  ;;  %v767_v2 = vsel %vm766_vm7, %v763_v61, -inf }
0x2a43   :  { %8120 = vmatprep.subr.bf16.mxu1 %v9806_v24 }
0x2a46   :  { %8122 = vmatpush3.bf16.msra.mxu1 %v8683_v20  ;;  %v1535_v20 = vadd.f32 %v8835_v9, %v9563_v58  ;;  %v9583_v9 = vadd.f32 %v9355_v59, %v9563_v58 }
0x2a83   :  { %v5730_v45 = vpop.f32.mrb[64].mxu1 }
0x2a84   :  { %v7565_v29 = vpop.f32.mrb[65].mxu1 }
0x2af6   :  { %v5805_v11 = vpop.f32.mrb[66].mxu1 }
0x2af7   :  { %v5806_v12 = vadd.f32 %v5805_v11, %v5730_v45  ;;  %v7576_v35 = vpop.f32.mrb[67].mxu1 }
0x2af9   :  { %v5809_v39 = vadd.f32 %v9138_v3, %v5806_v12  ;;  %v1538_v3 = vsel %vm766_vm7, %v1535_v20, -inf }
0x2afb   :  { %8261 = vtanh.f32 %v5809_v39  ;;  %v6368_v56 = vmul.f32 -1.442695, %v5809_v39 }
0x2afc   :  { %v5981_v49 = vpop.f32.mrb[68].mxu1 }
0x2afd   :  { %8263 = vpow2.f32 %v6368_v56  ;;  %v7592_v24 = vpop.f32.mrb[69].mxu1 }
0x2b05   :  { %v8262_v6 = vpop.eup %8261 }
0x2b06   :  { %5819 = vrot.lane.b32.xlu1 %v8262_v6, %s8435_s2 }
0x2b07   :  { %v8264_v1 = vpop.eup %8263 }
0x2b08   :  { %v5813_v16 = vadd.f32 1.0, %v8264_v1 }
0x2b0a   :  { %8265 = vrcp.f32 %v5813_v16 }
0x2b14   :  { %v8266_v40 = vpop.eup %8265 }
0x2b15   :  { %v5817_v43 = vmul.f32 %v8266_v40, %v9433_v63 }
0x2b78   :  { %v5820_v52 = vpop.permute.xlu1 %5819 }
0x2b79   :  { %v5822_v30 = vmul.f32 %v8266_v40, %v5820_v52 }
0x2b7b   :  { %5824 = vrot.lane.b32.xlu0 %v5822_v30, %s8436_s29 }
0x2bed   :  { %v5825_v46 = vpop.permute.xlu0 %5824 }
0x2bee   :  { %v9559_v50 = vadd.f32 %v5825_v46, %v5817_v43  ;;  %v9622_v43 = vld [vmem:[#allocation7 + $0x140] sm:$0x1]  ;;  %v860_v46 = vsel %vm111_vm1, %v8665_v14, %v8540_v31 }
0x2bf0   :  { %8267 = vtanh.f32 %v9559_v50 }
0x2bfa   :  { %v8268_v53 = vpop.eup %8267 }
0x2bfb   :  { %5830 = vrot.lane.b32.xlu1 %v8268_v53, %s8435_s2 }
0x2c1f   :  { %768 = vmax.xlane.f32.xlu1 %v767_v2 }
0x2c30   :  { %857 = vrot.lane.b32.xlu1 %v8604_v23, %s8435_s2  ;;  %v2300_v23 = vadd.f32 %v8965_v17, %v9563_v58 }
0x2c32   :  { %v2303_v42 = vsel %vm766_vm7, %v2300_v23, -inf }
0x2c54   :  { %1539 = vmax.xlane.f32.xlu1 %v1538_v3 }
0x2c65   :  { %1628 = vrot.lane.b32.xlu1 %v8776_v13, %s8435_s2  ;;  %v4598_v13 = vsel %vm766_vm7, %v9583_v9, -inf }
0x2c6d   :  { %v5831_v10 = vpop.permute.xlu1 %5830 }
0x2c6e   :  { %v9575_v54 = vmul.f32 %v8266_v40, %v5831_v10 }
0x2c70   :  { %v5904_v18 = vmul.f32 0.01, %v9575_v54 }
0x2c72   :  { %5906 = vrot.lane.b32.xlu0 %v5904_v18, %s8436_s29  ;;  %v9816_v18 = vld [vmem:[#allocation15_spill] sm:$0xff] }
0x2c89   :  { %2304 = vmax.xlane.f32.xlu1 %v2303_v42 }
0x2c8d   :  { %4599 = vmax.xlane.f32.xlu1 %v4598_v13 }
0x2c9e   :  { %2389 = vrot.lane.b32.xlu1 %v8910_v32, %s8437_s30 }
0x2cac   :  { %v769_v45 = vpop.xlane.xlu1 %768 }
0x2cad   :  { %v770_v29 = vsub.f32 %v763_v61, %v769_v45 }
0x2caf   :  { %v771_v11 = vmul.f32 1.442695, %v770_v29 }
0x2cb0   :  { %v858_v59 = vpop.permute.xlu1 %857 }
0x2cb1   :  { %8269 = vpow2.f32 %v771_v11 }
0x2cbb   :  { %v8270_v17 = vpop.eup %8269 }
0x2cbc   :  { %v773_v12 = vsel %vm766_vm7, %v8270_v17, 0.0 }
0x2cbd   :  { %774 = vadd.xlane.f32.xlu0 %v773_v12 }
0x2cd3   :  { %853 = vrot.lane.b32.xlu0 %v8618_v36, %s8437_s30 }
0x2ce1   :  { %v1540_v35 = vpop.xlane.xlu1 %1539 }
0x2ce2   :  { %v1541_v39 = vsub.f32 %v1535_v20, %v1540_v35 }
0x2ce4   :  { %v1542_v6 = vmul.f32 1.442695, %v1541_v39  ;;  %v5907_v56 = vpop.permute.xlu0 %5906 }
0x2ce5   :  { %v5982_v1 = vadd.f32 %v5981_v49, %v5907_v56  ;;  %v1629_v16 = vpop.permute.xlu1 %1628 }
0x2ce6   :  { %8271 = vpow2.f32 %v1542_v6 }
0x2ce7   :  { %7602 = vmatmul.mubr.msk.f32.vlgmr.msra.gmra.mrb[68].mxu0 %vm111_vm1, %v5982_v1 }
0x2ce8   :  { %8125 = vmatpush3.bf16.msra.mxu0 %v8650_v8  ;;  %7643 = vmatprep.mubr.msk.f32.mxu0 %vm8433_vm0, %v9805_v34  ;;  %v3065_v8 = vadd.f32 %v9093_v51, %v9563_v58  ;;  %v3830_v34 = vadd.f32 %v9227_v0, %v9563_v58 }
0x2ceb   :  { %7644 = vmatmul.mubr.msk.f32.vlgmr.msra.gmra.mrb[70].mxu0 %vm185_vm2, %v9463_v5  ;;  %v3068_v5 = vsel %vm766_vm7, %v3065_v8, -inf }
0x2cf0   :  { %v8272_v32 = vpop.eup %8271 }
0x2cf1   :  { %v1544_v36 = vsel %vm766_vm7, %v8272_v32, 0.0 }
0x2cf2   :  { %1545 = vadd.xlane.f32.xlu0 %v1544_v36  ;;  %v8306_v36 = vld [vmem:[#allocation7 + $0xa0] sm:$0x1] }
0x2d08   :  { %1624 = vrot.lane.b32.xlu0 %v8782_v47, %s8437_s30  ;;  %v3833_v47 = vsel %vm766_vm7, %v3830_v34, -inf }
0x2d16   :  { %v2305_v40 = vpop.xlane.xlu1 %2304 }
0x2d17   :  { %v2306_v52 = vsub.f32 %v2300_v23, %v2305_v40  ;;  %v1616_v23 = vadd.f32 %v9816_v18, %v9622_v43 }
0x2d19   :  { %v2307_v30 = vmul.f32 1.442695, %v2306_v52  ;;  %v1635_v45 = vrot.slane %v1616_v23, 7 }
0x2d1b   :  { %8273 = vpow2.f32 %v2307_v30  ;;  %v9646_v30 = vpop.xlane.xlu1 %4599 }
0x2d25   :  { %v9614_v41 = vpop.eup %8273 }
0x2d26   :  { %v2309_v51 = vsel %vm766_vm7, %v9614_v41, 0.0 }
0x2d27   :  { %3069 = vmax.xlane.f32.xlu0 %v3068_v5 }
0x2d2b   :  { %3834 = vmax.xlane.f32.xlu0 %v3833_v47 }
0x2d2f   :  { %5364 = vmax.xlane.f32.xlu0 %v5363_v27  ;;  %v2390_v27 = vpop.permute.xlu1 %2389 }
0x2d33   :  { %2310 = vadd.xlane.f32.xlu0 %v2309_v51 }
0x2d49   :  { %2393 = vrot.lane.b32.xlu0 %v8904_v48, %s8435_s2  ;;  %v845_v48 = vadd.f32 %v8690_v26, %v9622_v43  ;;  %v1631_v26 = vsel %vm111_vm1, %v8799_v19, %v8710_v62 }
0x2d4a   :  { %v775_v0 = vpop.xlane.xlu0 %774 }
0x2d4b   :  { %8275 = vrcp.f32 %v775_v0  ;;  %v866_v2 = vrot.slane %v845_v48, 7  ;;  %v9817_v0 = vld [vmem:[#allocation16_spill] sm:$0xff] }
0x2d4d   :  { %3154 = vrot.lane.b32.xlu0 %v9040_v44, %s8437_s30 }
0x2d4e   :  { %v854_v7 = vpop.permute.xlu0 %853 }
0x2d4f   :  { %v862_v53 = vsel %vm861_vm8, %v860_v46, %v854_v7  ;;  %v9818_v7 = vld [vmem:[#allocation17_spill] sm:$0xff] }
0x2d50   :  { %v864_v61 = vsel %vm863_vm9, %v862_v53, %v858_v59  ;;  %v2396_v46 = vsel %vm111_vm1, %v9818_v7, %v9817_v0  ;;  %v9819_v53 = vld [vmem:[#allocation18_spill] sm:$0xff] }
0x2d51   :  { %3158 = vrot.lane.b32.xlu0 %v9034_v4, %s8435_s2  ;;  %v869_v3 = vrot.slane %v864_v61, 6  ;;  %v2381_v48 = vadd.f32 %v9819_v53, %v9622_v43  ;;  %v2397_v61 = vsel %vm861_vm8, %v2396_v46, %v2390_v27  ;;  %v5441_v46 = vadd.f32 %v9475_v55, %v9622_v43 }
0x2d52   :  { %v4601_v55 = vsub.f32 %v9583_v9, %v9646_v30  ;;  %v9826_v30 = vld [vmem:[#allocation22_spill] sm:$0xff] }
0x2d55   :  { %v8276_v44 = vpop.eup %8275 }
0x2d56   :  { %v777_v20 = vmul.f32 %v8276_v44, %v8270_v17 }
0x2d58   :  { %v871_v49 = vsel %vm766_vm7, %v777_v20, %v866_v2  ;;  %v2400_v20 = vrot.slane %v2381_v48, 7 }
0x2d59   :  { %v873_v31 = vsel %vm872_vm10, %v871_v49, %v869_v3 }
0x2d5a   :  { %v875_v14 = vsel %vm874_vm6, %v873_v31, 0.0 }
0x2d5b   :  { %876 = vst [vmem:[#allocation8] sm:$0xff] %v875_v14 }
0x2d7f   :  { %v1546_v24 = vpop.xlane.xlu0 %1545 }
0x2d80   :  { %8277 = vrcp.f32 %v1546_v24 }
0x2d83   :  { %v1625_v4 = vpop.permute.xlu0 %1624 }
0x2d84   :  { %v1632_v10 = vsel %vm861_vm8, %v1631_v26, %v1625_v4  ;;  %v9820_v4 = vld [vmem:[#allocation23_spill] sm:$0xff] }
0x2d85   :  { %v1633_v42 = vsel %vm863_vm9, %v1632_v10, %v1629_v16 }
0x2d86   :  { %v1638_v11 = vrot.slane %v1633_v42, 6 }
0x2d8a   :  { %v8278_v13 = vpop.eup %8277 }
0x2d8b   :  { %v1548_v29 = vmul.f32 %v8278_v13, %v8272_v32 }
0x2d8d   :  { %v1640_v17 = vsel %vm766_vm7, %v1548_v29, %v1635_v45  ;;  %v9821_v29 = vld [vmem:[#allocation19_spill] sm:$0xff] }
0x2d8e   :  { %v1641_v12 = vsel %vm872_vm10, %v1640_v17, %v1638_v11  ;;  %v9822_v11 = vld [vmem:[#allocation20_spill] sm:$0xff] }
0x2d8f   :  { %v1642_v59 = vsel %vm874_vm6, %v1641_v12, 0.0  ;;  %v3161_v17 = vsel %vm111_vm1, %v9822_v11, %v9821_v29  ;;  %v9823_v12 = vld [vmem:[#allocation21_spill] sm:$0xff] }
0x2d90   :  { %1644 = vst [vmem:[#allocation8 + $0x8] sm:$0xff] %v1642_v59  ;;  %v3146_v59 = vadd.f32 %v9823_v12, %v9622_v43 }
0x2db4   :  { %v3070_v35 = vpop.xlane.xlu0 %3069 }
0x2db5   :  { %v3071_v62 = vsub.f32 %v3065_v8, %v3070_v35 }
0x2db7   :  { %v3072_v19 = vmul.f32 1.442695, %v3071_v62  ;;  %v3165_v62 = vrot.slane %v3146_v59, 7 }
0x2db8   :  { %v3835_v39 = vpop.xlane.xlu0 %3834 }
0x2db9   :  { %8279 = vpow2.f32 %v3072_v19  ;;  %v3836_v6 = vsub.f32 %v3830_v34, %v3835_v39  ;;  %v9824_v19 = vld [vmem:[#allocation26_spill] sm:$0xff] }
0x2dba   :  { %v6054_v56 = vpop.f32.mrb[68].mxu0  ;;  %v3911_v39 = vadd.f32 %v9824_v19, %v9622_v43 }
0x2dbb   :  { %v3837_v1 = vmul.f32 1.442695, %v3836_v6  ;;  %v6055_v16 = vadd.f32 %v8306_v36, %v6054_v56  ;;  %v7603_v40 = vpop.f32.mrb[69].mxu0 }
0x2dbc   :  { %v5365_v32 = vpop.xlane.xlu0 %5364  ;;  %v3930_v40 = vrot.slane %v3911_v39, 7 }
0x2dbd   :  { %8281 = vpow2.f32 %v3837_v1  ;;  %7637 = vmatmul.mubr.f32.vlgmr.msra.gmra.mrb[70].mxu1 %v6055_v16  ;;  %v5366_v26 = vsub.f32 %v9609_v28, %v5365_v32 }
0x2dbf   :  { %v5367_v10 = vmul.f32 1.442695, %v5366_v26 }
0x2dc0   :  { %v2311_v52 = vpop.xlane.xlu0 %2310 }
0x2dc1   :  { %8283 = vrcp.f32 %v2311_v52 }
0x2dc2   :  { %8285 = vpow2.f32 %v5367_v10 }
0x2dc3   :  { %v8280_v5 = vpop.eup %8279 }
0x2dc4   :  { %v3074_v47 = vsel %vm766_vm7, %v8280_v5, 0.0  ;;  %v2394_v51 = vpop.permute.xlu0 %2393 }
0x2dc5   :  { %3075 = vadd.xlane.f32.xlu1 %v3074_v47  ;;  %v2398_v44 = vsel %vm863_vm9, %v2397_v61, %v2394_v51  ;;  %v5460_v61 = vrot.slane %v5441_v46, 7 }
0x2dc6   :  { %v2403_v49 = vrot.slane %v2398_v44, 6 }
0x2dc7   :  { %v8282_v8 = vpop.eup %8281 }
0x2dc8   :  { %v3839_v34 = vsel %vm766_vm7, %v8282_v8, 0.0  ;;  %v3155_v42 = vpop.permute.xlu0 %3154 }
0x2dc9   :  { %3840 = vadd.xlane.f32.xlu0 %v3839_v34  ;;  %v3162_v35 = vsel %vm861_vm8, %v3161_v17, %v3155_v42 }
0x2dcb   :  { %v8284_v2 = vpop.eup %8283 }
0x2dcc   :  { %v2313_v3 = vmul.f32 %v8284_v2, %v9614_v41  ;;  %v8286_v18 = vpop.eup %8285  ;;  %v6243_v41 = vrot.slane %v9504_v57, 5  ;;  %v3159_v13 = vpop.permute.xlu0 %3158 }
0x2dcd   :  { %v5369_v23 = vsel %vm766_vm7, %v8286_v18, 0.0 }
0x2dce   :  { %v2405_v31 = vsel %vm766_vm7, %v2313_v3, %v2400_v20  ;;  %v9825_v3 = vld [vmem:[#allocation24_spill] sm:$0xff] }
0x2dcf   :  { %v2406_v14 = vsel %vm872_vm10, %v2405_v31, %v2403_v49  ;;  %v4602_v49 = vmul.f32 1.442695, %v4601_v55 }
0x2dd0   :  { %v2407_v24 = vsel %vm874_vm6, %v2406_v14, 0.0 }
0x2dd1   :  { %2409 = vst [vmem:[#allocation8 + $0x10] sm:$0xff] %v2407_v24  ;;  %v9827_v24 = vld [vmem:[#allocation25_spill] sm:$0xff] }
0x2ddf   :  { %3923 = vrot.lane.b32.xlu0 %v9820_v4, %s8435_s2  ;;  %v3926_v4 = vsel %vm111_vm1, %v9827_v24, %v9826_v30 }
0x2dfe   :  { %5370 = vadd.xlane.f32.xlu0 %v5369_v23 }
0x2e14   :  { %6210 = vrot.lane.b32.xlu0 %v9504_v57, %s8436_s29 }
0x2e18   :  { %5453 = vrot.lane.b32.xlu0 %v9433_v63, %s8435_s2  ;;  %v3163_v63 = vsel %vm863_vm9, %v3162_v35, %v3159_v13 }
0x2e19   :  { %v3168_v56 = vrot.slane %v3163_v63, 6 }
0x2e1c   :  { %6244 = vrot.lane.b32.xlu0 %v6243_v41, %s8436_s29  ;;  %v6205_v41 = vpop.f32.mrb[70].mxu0 }
0x2e1d   :  { %v7645_v42 = vpop.f32.mrb[71].mxu0 }
0x2e52   :  { %v3076_v45 = vpop.xlane.xlu1 %3075 }
0x2e53   :  { %8287 = vrcp.f32 %v3076_v45 }
0x2e56   :  { %v3841_v28 = vpop.xlane.xlu0 %3840 }
0x2e57   :  { %8289 = vrcp.f32 %v3841_v28 }
0x2e5a   :  { %v3924_v27 = vpop.permute.xlu0 %3923 }
0x2e5d   :  { %v8288_v57 = vpop.eup %8287 }
0x2e5e   :  { %v3078_v6 = vmul.f32 %v8288_v57, %v8280_v5 }
0x2e60   :  { %v3170_v1 = vsel %vm766_vm7, %v3078_v6, %v3165_v62 }
0x2e61   :  { %v8290_v36 = vpop.eup %8289  ;;  %v3171_v16 = vsel %vm872_vm10, %v3170_v1, %v3168_v56 }
0x2e62   :  { %v3172_v32 = vsel %vm874_vm6, %v3171_v16, 0.0  ;;  %v3843_v52 = vmul.f32 %v8290_v36, %v8282_v8 }
0x2e63   :  { %3174 = vst [vmem:[#allocation8 + $0x18] sm:$0xff] %v3172_v32 }
0x2e64   :  { %v3935_v47 = vsel %vm766_vm7, %v3843_v52, %v3930_v40 }
0x2e8b   :  { %v5371_v51 = vpop.xlane.xlu0 %5370 }
0x2e8c   :  { %8291 = vrcp.f32 %v5371_v51 }
0x2e8d   :  { %8293 = vpow2.f32 %v4602_v49 }
0x2e8f   :  { %v9684_v34 = vpop.permute.xlu0 %6210 }
0x2e90   :  { %v6124_v0 = vpop.f32.mrb[70].mxu1 }
0x2e91   :  { %v6125_v5 = vadd.f32 %v6124_v0, %v9563_v58  ;;  %v7638_v7 = vpop.f32.mrb[71].mxu1 }
0x2e93   :  { %v9689_v53 = vpop.permute.xlu0 %5453  ;;  %v6128_v48 = vsel %vm766_vm7, %v6125_v5, -inf }
0x2e94   :  { %6129 = vmax.xlane.f32.xlu1 %v6128_v48 }
0x2e96   :  { %v8292_v8 = vpop.eup %8291 }
0x2e97   :  { %v5373_v44 = vmul.f32 %v8292_v8, %v8286_v18  ;;  %v6245_v2 = vpop.permute.xlu0 %6244  ;;  %v8294_v31 = vpop.eup %8293 }
0x2e98   :  { %v6247_v20 = vsel %vm874_vm6, %v6238_v25, %v6245_v2  ;;  %v4604_v14 = vsel %vm766_vm7, %v8294_v31, 0.0 }
0x2e99   :  { %6251 = vst.msk [vmem:[#allocation9 + $0x10] sm:$0xf] %vm6250_vm11, %v6247_v20  ;;  %v5465_v58 = vsel %vm766_vm7, %v5373_v44, %v5460_v61 }
0x2ea5   :  { %3919 = vrot.lane.b32.xlu1 %v9825_v3, %s8437_s30 }
0x2ec9   :  { %4605 = vadd.xlane.f32.xlu1 %v4604_v14 }
0x2eda   :  { %4684 = vrot.lane.b32.xlu1 %v9302_v15, %s8437_s30 }
0x2ede   :  { %5449 = vrot.lane.b32.xlu1 %v9439_v38, %s8437_s30 }
0x2ee2   :  { %6214 = vrot.lane.b32.xlu1 %v9575_v54, %s8437_s30 }
0x2ee6   :  { %4688 = vrot.lane.b32.xlu1 %v9296_v33, %s8435_s2 }
0x2f21   :  { %v6130_v21 = vpop.xlane.xlu1 %6129 }
0x2f22   :  { %v6131_v25 = vsub.f32 %v6125_v5, %v6130_v21 }
0x2f24   :  { %v6132_v9 = vmul.f32 1.442695, %v6131_v25 }
0x2f25   :  { %v3920_v26 = vpop.permute.xlu1 %3919 }
0x2f26   :  { %8295 = vpow2.f32 %v6132_v9  ;;  %v3927_v15 = vsel %vm861_vm8, %v3926_v4, %v3920_v26 }
0x2f27   :  { %v3928_v10 = vsel %vm863_vm9, %v3927_v15, %v3924_v27 }
0x2f28   :  { %v3933_v38 = vrot.slane %v3928_v10, 6 }
0x2f2a   :  { %v3936_v18 = vsel %vm872_vm10, %v3935_v47, %v3933_v38 }
0x2f2b   :  { %v3937_v54 = vsel %vm874_vm6, %v3936_v18, 0.0 }
0x2f2c   :  { %3939 = vst [vmem:[#allocation8 + $0x20] sm:$0xff] %v3937_v54 }
0x2f30   :  { %v8296_v33 = vpop.eup %8295 }
0x2f31   :  { %v6134_v23 = vsel %vm766_vm7, %v8296_v33, 0.0 }
0x2f32   :  { %6135 = vadd.xlane.f32.xlu1 %v6134_v23 }
0x2f43   :  { %6218 = vrot.lane.b32.xlu1 %v9559_v50, %s8435_s2 }
0x2f44   :  { %8384 = shalt.err (!%p8381_p0)
}
0x2f45   :  { %s8385_s10 = scalar_lea.hbm %s9780_s4, 384 }
0x2f46   :  { %p8386_p1 = scmp.ne.s32.totalorder %s9780_s4, %s8385_s10  ;;  %p8389_p2 = scmp.lt.u32.totalorder %s8385_s10, %s9780_s4 }
0x2f48   :  { %p8391_p3 = pnand %p8389_p2, %p8386_p1 }
0x2f4a   :  { %8394 = shalt.err (!%p8391_p3)
}
0x2f4b   :  { %6275 = dma.vmem_to_hbm [thread:$0]  %s6270_s6, 384, %s9780_s4, [#allocation10], %s8426_s25, %s8426_s25, %s8427_s26   ;;  %v5456_v45 = vsel %vm111_vm1, %v9456_v22, %v9358_v60  ;;  %v6221_v59 = vsel %vm111_vm1, %v9684_v34, %v9494_v37  ;;  %v9828_v63 = vld [vmem:[#allocation29_spill] sm:$0xff]  ;;  %v9829_v19 = vld [vmem:[#allocation27_spill] sm:$0xff]  ;;  %v9830_v39 = vld [vmem:[#allocation28_spill] sm:$0xff]  ;;  %v6206_v51 = vadd.f32 %v6205_v41, %v9622_v43 }
0x2f4c   :  { %v4676_v57 = vadd.f32 %v9828_v63, %v9622_v43  ;;  %v4691_v6 = vsel %vm111_vm1, %v9830_v39, %v9829_v19  ;;  %s8439_s4 = smov [#allocation8]  }
0x2f4d   :  { %v6225_v5 = vrot.slane %v6206_v51, 7  ;;  %s6257_s16 = sshll.u32 %s8439_s4, 4  ;;  %s6258_s16 = int_to_ptr.vmem [resolvable:$true] %s6257_s16 }
0x2f4e   :  { %v4695_v37 = vrot.slane %v4676_v57, 7  ;;  %s8395_s17 = scalar_lea.vmem %s6258_s16, 1024  ;;  %p8400_p5 = scmp.lt.s32.totalorder %s6258_s16, %s6258_s16 }
0x2f4f   :  { %p8396_p4 = scmp.ne.s32.totalorder %s6258_s16, %s8395_s17  ;;  %p8401_p6 = scmp.lt.s32.totalorder %s8395_s17, %s8395_s17 }
0x2f51   :  { %p8402_p7 = por %p8401_p6, %p8400_p5 }
0x2f53   :  { %p8403_p8 = pnand %p8402_p7, %p8396_p4 }
0x2f56   :  { %v4606_v50 = vpop.xlane.xlu1 %4605 }
0x2f57   :  { %8297 = vrcp.f32 %v4606_v50 }
0x2f5a   :  { %v4685_v13 = vpop.permute.xlu1 %4684 }
0x2f5b   :  { %v4692_v1 = vsel %vm861_vm8, %v4691_v6, %v4685_v13 }
0x2f5e   :  { %v5450_v28 = vpop.permute.xlu1 %5449 }
0x2f5f   :  { %v5457_v29 = vsel %vm861_vm8, %v5456_v45, %v5450_v28 }
0x2f60   :  { %v5458_v11 = vsel %vm863_vm9, %v5457_v29, %v9689_v53 }
0x2f61   :  { %v5463_v17 = vrot.slane %v5458_v11, 6  ;;  %v8298_v12 = vpop.eup %8297 }
0x2f62   :  { %v6215_v35 = vpop.permute.xlu1 %6214  ;;  %v4608_v56 = vmul.f32 %v8298_v12, %v8294_v31 }
0x2f63   :  { %v5466_v62 = vsel %vm872_vm10, %v5465_v58, %v5463_v17  ;;  %v6222_v60 = vsel %vm861_vm8, %v6221_v59, %v6215_v35 }
0x2f64   :  { %v5467_v22 = vsel %vm874_vm6, %v5466_v62, 0.0  ;;  %v4700_v32 = vsel %vm766_vm7, %v4608_v56, %v4695_v37 }
0x2f65   :  { %5469 = vst [vmem:[#allocation8 + $0x30] sm:$0xff] %v5467_v22 }
0x2f66   :  { %v4689_v36 = vpop.permute.xlu1 %4688 }
0x2f67   :  { %v4693_v16 = vsel %vm863_vm9, %v4692_v1, %v4689_v36 }
0x2f68   :  { %v4698_v40 = vrot.slane %v4693_v16, 6 }
0x2f6a   :  { %v4701_v52 = vsel %vm872_vm10, %v4700_v32, %v4698_v40 }
0x2f6b   :  { %v4702_v47 = vsel %vm874_vm6, %v4701_v52, 0.0 }
0x2f6c   :  { %4704 = vst [vmem:[#allocation8 + $0x28] sm:$0xff] %v4702_v47 }
0x2fbf   :  { %v6136_v27 = vpop.xlane.xlu1 %6135 }
0x2fc0   :  { %8299 = vrcp.f32 %v6136_v27 }
0x2fc3   :  { %v6219_v34 = vpop.permute.xlu1 %6218 }
0x2fc4   :  { %v6223_v0 = vsel %vm863_vm9, %v6222_v60, %v6219_v34 }
0x2fc5   :  { %v6228_v53 = vrot.slane %v6223_v0, 6 }
0x2fca   :  { %v8300_v7 = vpop.eup %8299 }
0x2fcb   :  { %v6138_v46 = vmul.f32 %v8300_v7, %v8296_v33 }
0x2fcd   :  { %v6230_v48 = vsel %vm766_vm7, %v6138_v46, %v6225_v5 }
0x2fce   :  { %v6231_v8 = vsel %vm872_vm10, %v6230_v48, %v6228_v53 }
0x2fcf   :  { %v6232_v61 = vsel %vm874_vm6, %v6231_v8, 0.0 }
0x2fd0   :  { %6234 = vst [vmem:[#allocation8 + $0x38] sm:$0xff] %v6232_v61 }
0x2fd1   :  { %8406 = shalt.err (!%p8403_p8)
}
0x2fd2   :  { %s8407_s20 = scalar_lea.hbm %s9779_s3, 1024 }
0x2fd3   :  { %p8408_p9 = scmp.ne.s32.totalorder %s9779_s3, %s8407_s20  ;;  %p8411_p10 = scmp.lt.u32.totalorder %s8407_s20, %s9779_s3 }
0x2fd5   :  { %p8413_p11 = pnand %p8411_p10, %p8408_p9 }
0x2fd7   :  { %8416 = shalt.err (!%p8413_p11)
}
0x2fd8   :  { %6263 = dma.vmem_to_hbm [thread:$0]  %s6258_s16, 1024, %s9779_s3, [#allocation4], %s8426_s25, %s8426_s25, %s8427_s26  }
0x2fd9   :  { %8421 = dma.done.wait [#allocation4], 1024  }
0x2fda   :  { %8422 = vsyncadd [#allocation4], 4294966272 }
0x2fdb   :  { %8423 = dma.done.wait [#allocation10], 384  }
0x2fdc   :  { %8424 = vsyncadd [#allocation10], 4294966912 }
0x2fdd   :  { %6282 = vsyncpa [#allocation3], 1 }
0x2fde   :  { %6283 = vsyncpa [#allocation6], 1 }
0x2fdf   :  { %6284 = vsyncpa [#allocation4], 1 }
0x2fe0   :  { %6285 = vsyncpa [#allocation10], 1 }

</bundles_post_ra>
